<compile_context>
chip_gen: v5e
topology: v5e:2x2
jax: 0.10.0
libtpu: 0.0.40
codegen_flags: <defaults>
</compile_context>

<pallas_src>
import math

import jax
import jax.numpy as jnp
from jax.experimental import pallas as pl
from jax.experimental.pallas import tpu as pltpu

# ----------------------------- configuration --------------------------------
B = 2              # batch
C = 4              # image channels
IMG = 16           # spatial size
PATCH = 4          # patch size
N_PATCH = (IMG // PATCH) ** 2     # 16 patches
EMBED = 32         # encoder embed dim
PRED_DIM = 32      # predictor embed dim
NUM_HEADS = 2
MLP_RATIO = 4
N_CTX = 8          # context tokens per sample
N_TGT = 8          # target tokens per sample
LN_EPS = 1e-5

assert EMBED == PRED_DIM, "packed 1-D param slab assumes a single width"

# rows of the packed (20, 32) 1-D parameter slab
(V_ENC_B_PATCH, V_ENC_LN1_G, V_ENC_LN1_B, V_ENC_BO, V_ENC_LN2_G, V_ENC_LN2_B,
 V_ENC_B2, V_ENC_LNF_G, V_ENC_LNF_B,
 V_PRED_B_IN, V_PRED_MASK_TOK, V_PRED_LN1_G, V_PRED_LN1_B, V_PRED_BO,
 V_PRED_LN2_G, V_PRED_LN2_B, V_PRED_B2, V_PRED_LNF_G, V_PRED_LNF_B,
 V_PRED_B_OUT, _N_VEC) = range(21)


# --------------------------- in-kernel helpers -------------------------------
def _ln(x, g, b):
    mu = jnp.mean(x, axis=-1, keepdims=True)
    var = jnp.mean(jnp.square(x - mu), axis=-1, keepdims=True)
    return (x - mu) * jax.lax.rsqrt(var + LN_EPS) * g + b


def _block_fwd(x, groups, wqkvh_ref, bqkvh_ref, woh_ref, w1_ref, b1, w2_ref,
               ln1_g, ln1_b, bo, ln2_g, ln2_b, b2):
    """Pre-LN transformer block over a batch-folded (M, D) matrix.

    `groups` is a static list of (row_start, row_len); attention is restricted
    to rows within a group (each group = one sample's token set).  Row starts
    are multiples of 8, so all slices are clean sublane slices.
    """
    M, D = x.shape
    H = NUM_HEADS
    dh = D // H
    scale = 1.0 / math.sqrt(dh)

    h = _ln(x, ln1_g, ln1_b)

    # Per-head Q/K/V from stacked per-head weight slabs (no lane slicing of a
    # fused (M, 3D) activation).  Layout: [q_h0..q_hH, k_h0.., v_h0..].
    qh, kh, vh = [], [], []
    for i in range(H):
        qh.append(jnp.dot(h, wqkvh_ref[i],
                          preferred_element_type=jnp.float32) + bqkvh_ref[i])
        kh.append(jnp.dot(h, wqkvh_ref[H + i],
                          preferred_element_type=jnp.float32) + bqkvh_ref[H + i])
        vh.append(jnp.dot(h, wqkvh_ref[2 * H + i],
                          preferred_element_type=jnp.float32) + bqkvh_ref[2 * H + i])

    attn_parts = []
    for (r0, rl) in groups:
        acc = None
        for i in range(H):
            q = qh[i][r0:r0 + rl]                      # (rl, dh) sublane slice
            k = kh[i][r0:r0 + rl]
            v = vh[i][r0:r0 + rl]
            # q @ k^T without materializing a transpose of K
            s = jax.lax.dot_general(q, k, (((1,), (1,)), ((), ())),
                                    preferred_element_type=jnp.float32) * scale
            s = s - jnp.max(s, axis=-1, keepdims=True)
            p = jnp.exp(s)
            p = p / jnp.sum(p, axis=-1, keepdims=True)  # exact softmax divide
            ah = jnp.dot(p, v, preferred_element_type=jnp.float32)   # (rl, dh)
            # head-decomposed output projection: sum_h (head_h @ wo[h])
            contrib = jnp.dot(ah, woh_ref[i], preferred_element_type=jnp.float32)
            acc = contrib if acc is None else acc + contrib
        attn_parts.append(acc)
    attn = (attn_parts[0] if len(attn_parts) == 1
            else jnp.concatenate(attn_parts, axis=0))
    x = x + attn + bo

    h2 = _ln(x, ln2_g, ln2_b)
    # TODO(synk): PyTorch nn.GELU() default is the exact erf form; tanh-approx
    # is used here because erf has no guaranteed Mosaic lowering.
    m = jax.nn.gelu(jnp.dot(h2, w1_ref[...], preferred_element_type=jnp.float32) + b1,
                    approximate=True)
    m = jnp.dot(m, w2_ref[...], preferred_element_type=jnp.float32) + b2
    return x + m


# ------------------------------ fused kernel ---------------------------------
def _ijepa_kernel(patches_ref, cidx_ref, tidx_ref,
                  enc_wpatch_ref, enc_pos_ref,
                  enc_wqkvh_ref, enc_bqkvh_ref, enc_woh_ref,
                  enc_w1_ref, enc_w2_ref,
                  pred_win_ref, pred_pos_ref,
                  pred_wqkvh_ref, pred_bqkvh_ref, pred_woh_ref,
                  pred_w1_ref, pred_w2_ref, pred_wout_ref,
                  vec_ref, b1s_ref,
                  pred_out_ref, tgt_out_ref):
    n_tok = B * N_PATCH

    # ---- encoder: patch embed + pos embed, batch folded into M (32 rows) ----
    tok = (jnp.dot(patches_ref[...], enc_wpatch_ref[...],
                   preferred_element_type=jnp.float32)
           + vec_ref[V_ENC_B_PATCH])                                  # (B*N, D)
    pos = enc_pos_ref[...]
    tok = tok + jnp.concatenate([pos] * B, axis=0)

    # ---- in-kernel mask gathers: block-diagonal one-hot matmuls (MXU) ------
    # cidx/tidx hold GLOBAL token indices (b*N_PATCH + patch_idx) in a column.
    iota_c = jax.lax.broadcasted_iota(jnp.int32, (B * N_CTX, n_tok), 1)
    iota_t = jax.lax.broadcasted_iota(jnp.int32, (B * N_TGT, n_tok), 1)
    oh_c = jnp.where(cidx_ref[...] == iota_c, 1.0, 0.0)               # (B*Nc, B*N)
    oh_t = jnp.where(tidx_ref[...] == iota_t, 1.0, 0.0)               # (B*Nt, B*N)
    ctx_tok = jnp.dot(oh_c, tok, preferred_element_type=jnp.float32)  # (B*Nc, D)
    tgt_tok = jnp.dot(oh_t, tok, preferred_element_type=jnp.float32)  # (B*Nt, D)

    # ---- encoder transformer block over both token sets (masks applied
    #      BEFORE attention, standard I-JEPA); one folded (32, D) pass --------
    enc_in = jnp.concatenate([ctx_tok, tgt_tok], axis=0)              # (2*B*8, D)
    enc_groups = ([(b * N_CTX, N_CTX) for b in range(B)]
                  + [(B * N_CTX + b * N_TGT, N_TGT) for b in range(B)])
    enc_out = _block_fwd(
        enc_in, enc_groups,
        enc_wqkvh_ref, enc_bqkvh_ref, enc_woh_ref,
        enc_w1_ref, b1s_ref[0], enc_w2_ref,
        vec_ref[V_ENC_LN1_G], vec_ref[V_ENC_LN1_B], vec_ref[V_ENC_BO],
        vec_ref[V_ENC_LN2_G], vec_ref[V_ENC_LN2_B], vec_ref[V_ENC_B2])
    enc_out = _ln(enc_out, vec_ref[V_ENC_LNF_G], vec_ref[V_ENC_LNF_B])

    ctx_emb = enc_out[:B * N_CTX]                                     # (B*Nc, D)
    tgt_emb = enc_out[B * N_CTX:]                                     # (B*Nt, D)

    # ---- predictor --------------------------------------------------------
    pred_pos_t = jnp.concatenate([pred_pos_ref[...]] * B, axis=0)     # (B*N, pd)
    pos_c = jnp.dot(oh_c, pred_pos_t, preferred_element_type=jnp.float32)
    pos_t = jnp.dot(oh_t, pred_pos_t, preferred_element_type=jnp.float32)

    x_in = (jnp.dot(ctx_emb, pred_win_ref[...],
                    preferred_element_type=jnp.float32)
            + vec_ref[V_PRED_B_IN] + pos_c)                           # (B*Nc, pd)
    m_in = vec_ref[V_PRED_MASK_TOK] + pos_t                           # (B*Nt, pd)

    # per-sample [context | mask tokens]; pure in-vreg sublane concatenation
    parts = []
    for b in range(B):
        parts.append(x_in[b * N_CTX:(b + 1) * N_CTX])
        parts.append(m_in[b * N_TGT:(b + 1) * N_TGT])
    pred_in = jnp.concatenate(parts, axis=0)                          # (B*(Nc+Nt), pd)
    tpb = N_CTX + N_TGT
    pred_groups = [(b * tpb, tpb) for b in range(B)]

    pred_tok = _block_fwd(
        pred_in, pred_groups,
        pred_wqkvh_ref, pred_bqkvh_ref, pred_woh_ref,
        pred_w1_ref, b1s_ref[1], pred_w2_ref,
        vec_ref[V_PRED_LN1_G], vec_ref[V_PRED_LN1_B], vec_ref[V_PRED_BO],
        vec_ref[V_PRED_LN2_G], vec_ref[V_PRED_LN2_B], vec_ref[V_PRED_B2])
    pred_tok = _ln(pred_tok, vec_ref[V_PRED_LNF_G], vec_ref[V_PRED_LNF_B])

    tgt_rows = [pred_tok[b * tpb + N_CTX:(b + 1) * tpb] for b in range(B)]
    pred_tgt = (tgt_rows[0] if B == 1 else jnp.concatenate(tgt_rows, axis=0))

    pred_out_ref[...] = (jnp.dot(pred_tgt, pred_wout_ref[...],
                                 preferred_element_type=jnp.float32)
                         + vec_ref[V_PRED_B_OUT])
    tgt_out_ref[...] = tgt_emb


# ------------------------------ wrapper ---------------------------------------
def ijepa_forward(x, context_mask, target_mask, packed):
    """Mirrors IJEPA.forward: returns (predictions, target_embeds)."""
    Bb, Cc, Hh, Ww = x.shape
    gh, gw = Hh // PATCH, Ww // PATCH
    n = gh * gw
    # patchify (NCHW -> (B*n_patches, C*ps*ps)); tiny op, fused by XLA.
    # TODO(synk): could be folded into the kernel via an Element-indexed
    # BlockSpec, but the whole image is only 4 KB.
    patches = (x.reshape(Bb, Cc, gh, PATCH, gw, PATCH)
               .transpose(0, 2, 4, 1, 3, 5)
               .reshape(Bb * n, Cc * PATCH * PATCH))

    # global (batch-offset) gather indices as a column vector -> the kernel
    # builds the block-diagonal one-hot with a single broadcasted compare.
    offs = jnp.arange(Bb, dtype=jnp.int32)[:, None] * n
    cidx = (context_mask.astype(jnp.int32) + offs).reshape(Bb * N_CTX, 1)
    tidx = (target_mask.astype(jnp.int32) + offs).reshape(Bb * N_TGT, 1)

    pred_flat, tgt_flat = pl.pallas_call(
        _ijepa_kernel,
        out_shape=(jax.ShapeDtypeStruct((Bb * N_TGT, EMBED), jnp.float32),
                   jax.ShapeDtypeStruct((Bb * N_TGT, EMBED), jnp.float32)),
        # whole problem fits comfortably; cap stays within v7x's 32 MiB scoped VMEM
        compiler_params=pltpu.CompilerParams(vmem_limit_bytes=32 * 1024 * 1024),
    )(patches, cidx, tidx, *packed)

    predictions = pred_flat.reshape(Bb, N_TGT, EMBED)
    # torch.no_grad() on the target branch -> stop_gradient (forward identical)
    target_embeds = jax.lax.stop_gradient(tgt_flat.reshape(Bb, N_TGT, EMBED))
    return predictions, target_embeds


# ------------------------------ param init / packing -------------------------
def _init_dense(key, din, dout, scale=0.02):
    w = scale * jax.random.normal(key, (din, dout), jnp.float32)
    b = jnp.zeros((dout,), jnp.float32)
    return w, b


def _init_block(key, dim):
    ks = jax.random.split(key, 6)
    wq, bq = _init_dense(ks[0], dim, dim)
    wk, bk = _init_dense(ks[1], dim, dim)
    wv, bv = _init_dense(ks[2], dim, dim)
    wo, bo = _init_dense(ks[3], dim, dim)
    w1, b1 = _init_dense(ks[4], dim, MLP_RATIO * dim)
    w2, b2 = _init_dense(ks[5], MLP_RATIO * dim, dim)
    return dict(
        ln1_g=jnp.ones((dim,), jnp.float32), ln1_b=jnp.zeros((dim,), jnp.float32),
        wq=wq, bq=bq, wk=wk, bk=bk, wv=wv, bv=bv, wo=wo, bo=bo,
        ln2_g=jnp.ones((dim,), jnp.float32), ln2_b=jnp.zeros((dim,), jnp.float32),
        w1=w1, b1=b1, w2=w2, b2=b2,
    )


def init_params(key):
    k_enc, k_pred = jax.random.split(key)
    ke = jax.random.split(k_enc, 3)
    w_patch, b_patch = _init_dense(ke[0], C * PATCH * PATCH, EMBED)
    enc_p = dict(
        w_patch=w_patch, b_patch=b_patch,
        pos_embed=0.02 * jax.random.normal(ke[1], (N_PATCH, EMBED), jnp.float32),
        block=_init_block(ke[2], EMBED),
        ln_g=jnp.ones((EMBED,), jnp.float32), ln_b=jnp.zeros((EMBED,), jnp.float32),
    )
    kp = jax.random.split(k_pred, 5)
    w_in, b_in = _init_dense(kp[0], EMBED, PRED_DIM)
    w_out, b_out = _init_dense(kp[1], PRED_DIM, EMBED)
    pred_p = dict(
        w_in=w_in, b_in=b_in, w_out=w_out, b_out=b_out,
        mask_token=0.02 * jax.random.normal(kp[2], (PRED_DIM,), jnp.float32),
        pos_embed=0.02 * jax.random.normal(kp[3], (N_PATCH, PRED_DIM), jnp.float32),
        block=_init_block(kp[4], PRED_DIM),
        ln_g=jnp.ones((PRED_DIM,), jnp.float32), ln_b=jnp.zeros((PRED_DIM,), jnp.float32),
    )
    return enc_p, pred_p


def _pack_block(blk, dim, heads):
    """Stack per-head column blocks of wq/wk/wv (-> (3H, dim, dh)), per-head
    bias chunks (-> (3H, 1, dh)), and per-head row blocks of wo (-> (H, dh, dim))
    so the kernel never lane-slices activations."""
    dh = dim // heads

    def cols(w):  # (dim, dim) -> (heads, dim, dh)
        return w.reshape(dim, heads, dh).transpose(1, 0, 2)

    def bias(b_):  # (dim,) -> (heads, 1, dh)
        return b_.reshape(heads, 1, dh)

    w_qkvh = jnp.concatenate([cols(blk["wq"]), cols(blk["wk"]), cols(blk["wv"])], axis=0)
    b_qkvh = jnp.concatenate([bias(blk["bq"]), bias(blk["bk"]), bias(blk["bv"])], axis=0)
    wo_h = blk["wo"].reshape(heads, dh, dim)
    return w_qkvh, b_qkvh, wo_h


def pack_params(enc_p, pred_p):
    """Done ONCE outside jit: per-head weight slabs + packed 1-D param slabs."""
    eb, pb = enc_p["block"], pred_p["block"]
    enc_wqkvh, enc_bqkvh, enc_woh = _pack_block(eb, EMBED, NUM_HEADS)
    pred_wqkvh, pred_bqkvh, pred_woh = _pack_block(pb, PRED_DIM, NUM_HEADS)
    vec = jnp.stack([
        enc_p["b_patch"], eb["ln1_g"], eb["ln1_b"], eb["bo"],
        eb["ln2_g"], eb["ln2_b"], eb["b2"], enc_p["ln_g"], enc_p["ln_b"],
        pred_p["b_in"], pred_p["mask_token"], pb["ln1_g"], pb["ln1_b"], pb["bo"],
        pb["ln2_g"], pb["ln2_b"], pb["b2"], pred_p["ln_g"], pred_p["ln_b"],
        pred_p["b_out"],
    ], axis=0)                                   # (20, 32)
    b1s = jnp.stack([eb["b1"], pb["b1"]], axis=0)  # (2, 128)
    return (enc_p["w_patch"], enc_p["pos_embed"],
            enc_wqkvh, enc_bqkvh, enc_woh, eb["w1"], eb["w2"],
            pred_p["w_in"], pred_p["pos_embed"],
            pred_wqkvh, pred_bqkvh, pred_woh, pb["w1"], pb["w2"],
            pred_p["w_out"], vec, b1s)


# --------------------------------- main --------------------------------------
if __name__ == "__main__":
    key = jax.random.PRNGKey(0)
    k_x, k_m, k_p = jax.random.split(key, 3)

    x = jax.random.normal(k_x, (B, C, IMG, IMG), jnp.float32)   # NCHW

    # per-sample disjoint context / target patch indices
    perms = jnp.stack(
        [jax.random.permutation(k, N_PATCH) for k in jax.random.split(k_m, B)])
    context_mask = perms[:, :N_CTX].astype(jnp.int32)           # (B, 8)
    target_mask = perms[:, N_CTX:N_CTX + N_TGT].astype(jnp.int32)  # (B, 8)

    enc_p, pred_p = init_params(k_p)
    packed = pack_params(enc_p, pred_p)   # one-time packing, outside jit

    fwd = jax.jit(ijepa_forward)
    predictions, target_embeds = fwd(x, context_mask, target_mask, packed)
    jax.block_until_ready((predictions, target_embeds))

    assert predictions.shape == (B, N_TGT, EMBED)
    assert target_embeds.shape == (B, N_TGT, EMBED)
    assert bool(jnp.all(jnp.isfinite(predictions)))
    assert bool(jnp.all(jnp.isfinite(target_embeds)))
    print("KERNEL_OK")
</pallas_src>

<mosaic_0001>
module attributes {stable_mosaic.version = 11 : i64} {
  func.func @_ijepa_kernel(%arg0: memref<32x64xf32, #tpu.memory_space<vmem>>, %arg1: memref<16x1xi32, #tpu.memory_space<vmem>>, %arg2: memref<16x1xi32, #tpu.memory_space<vmem>>, %arg3: memref<64x32xf32, #tpu.memory_space<vmem>>, %arg4: memref<16x32xf32, #tpu.memory_space<vmem>>, %arg5: memref<6x32x16xf32, #tpu.memory_space<vmem>>, %arg6: memref<6x1x16xf32, #tpu.memory_space<vmem>>, %arg7: memref<2x16x32xf32, #tpu.memory_space<vmem>>, %arg8: memref<32x128xf32, #tpu.memory_space<vmem>>, %arg9: memref<128x32xf32, #tpu.memory_space<vmem>>, %arg10: memref<32x32xf32, #tpu.memory_space<vmem>>, %arg11: memref<16x32xf32, #tpu.memory_space<vmem>>, %arg12: memref<6x32x16xf32, #tpu.memory_space<vmem>>, %arg13: memref<6x1x16xf32, #tpu.memory_space<vmem>>, %arg14: memref<2x16x32xf32, #tpu.memory_space<vmem>>, %arg15: memref<32x128xf32, #tpu.memory_space<vmem>>, %arg16: memref<128x32xf32, #tpu.memory_space<vmem>>, %arg17: memref<32x32xf32, #tpu.memory_space<vmem>>, %arg18: memref<20x32xf32, #tpu.memory_space<vmem>>, %arg19: memref<2x128xf32, #tpu.memory_space<vmem>>, %arg20: memref<16x32xf32, #tpu.memory_space<vmem>>, %arg21: memref<16x32xf32, #tpu.memory_space<vmem>>) attributes {dimension_semantics = [], scalar_prefetch = 0 : i64, scratch_operands = 0 : i64, tpu.core_type = #tpu.core_type<tc>} {
    %c0 = arith.constant 0 : index
    %c0_0 = arith.constant 0 : index
    %0 = vector.load %arg0[%c0, %c0_0] : memref<32x64xf32, #tpu.memory_space<vmem>>, vector<32x64xf32>
    %c0_1 = arith.constant 0 : index
    %c0_2 = arith.constant 0 : index
    %1 = vector.load %arg3[%c0_1, %c0_2] : memref<64x32xf32, #tpu.memory_space<vmem>>, vector<64x32xf32>
    %cst = arith.constant dense<0.000000e+00> : vector<32x32xf32>
    %2 = tpu.matmul %0, %1, %cst {dimension_numbers = #tpu.dot_dimension_numbers<[1], [0], [0], [1], [0, 0, 1, 1], [], []>} : vector<32x64xf32>, vector<64x32xf32>, vector<32x32xf32> -> vector<32x32xf32>
    %c0_3 = arith.constant 0 : index
    %c0_4 = arith.constant 0 : index
    %3 = vector.load %arg18[%c0_3, %c0_4] : memref<20x32xf32, #tpu.memory_space<vmem>>, vector<1x32xf32>
    %4 = vector.shape_cast %3 : vector<1x32xf32> to vector<32xf32>
    %5 = vector.shape_cast %4 : vector<32xf32> to vector<1x32xf32>
    %6 = vector.broadcast %5 : vector<1x32xf32> to vector<32x32xf32>
    %7 = arith.addf %2, %6 : vector<32x32xf32>
    %c0_5 = arith.constant 0 : index
    %c0_6 = arith.constant 0 : index
    %8 = vector.load %arg4[%c0_5, %c0_6] : memref<16x32xf32, #tpu.memory_space<vmem>>, vector<16x32xf32>
    %9 = tpu.concatenate %8, %8 in 0 : vector<16x32xf32>, vector<16x32xf32> -> vector<32x32xf32>
    %10 = arith.addf %7, %9 : vector<32x32xf32>
    %11 = tpu.iota {dimensions = array<i32: 1>} : vector<16x32xi32>
    %12 = tpu.iota {dimensions = array<i32: 1>} : vector<16x32xi32>
    %c0_7 = arith.constant 0 : index
    %c0_8 = arith.constant 0 : index
    %13 = vector.load %arg1[%c0_7, %c0_8] : memref<16x1xi32, #tpu.memory_space<vmem>>, vector<16x1xi32>
    %14 = vector.broadcast %13 : vector<16x1xi32> to vector<16x32xi32>
    %15 = arith.cmpi eq, %14, %11 : vector<16x32xi32>
    %cst_9 = arith.constant 1.000000e+00 : f32
    %cst_10 = arith.constant 0.000000e+00 : f32
    %16 = vector.broadcast %cst_9 : f32 to vector<16x32xf32>
    %17 = vector.broadcast %cst_10 : f32 to vector<16x32xf32>
    %18 = arith.select %15, %16, %17 : vector<16x32xi1>, vector<16x32xf32>
    %c0_11 = arith.constant 0 : index
    %c0_12 = arith.constant 0 : index
    %19 = vector.load %arg2[%c0_11, %c0_12] : memref<16x1xi32, #tpu.memory_space<vmem>>, vector<16x1xi32>
    %20 = vector.broadcast %19 : vector<16x1xi32> to vector<16x32xi32>
    %21 = arith.cmpi eq, %20, %12 : vector<16x32xi32>
    %cst_13 = arith.constant 1.000000e+00 : f32
    %cst_14 = arith.constant 0.000000e+00 : f32
    %22 = vector.broadcast %cst_13 : f32 to vector<16x32xf32>
    %23 = vector.broadcast %cst_14 : f32 to vector<16x32xf32>
    %24 = arith.select %21, %22, %23 : vector<16x32xi1>, vector<16x32xf32>
    %cst_15 = arith.constant dense<0.000000e+00> : vector<16x32xf32>
    %25 = tpu.matmul %18, %10, %cst_15 {dimension_numbers = #tpu.dot_dimension_numbers<[1], [0], [0], [1], [0, 0, 1, 1], [], []>} : vector<16x32xf32>, vector<32x32xf32>, vector<16x32xf32> -> vector<16x32xf32>
    %cst_16 = arith.constant dense<0.000000e+00> : vector<16x32xf32>
    %26 = tpu.matmul %24, %10, %cst_16 {dimension_numbers = #tpu.dot_dimension_numbers<[1], [0], [0], [1], [0, 0, 1, 1], [], []>} : vector<16x32xf32>, vector<32x32xf32>, vector<16x32xf32> -> vector<16x32xf32>
    %27 = tpu.concatenate %25, %26 in 0 : vector<16x32xf32>, vector<16x32xf32> -> vector<32x32xf32>
    %c0_17 = arith.constant 0 : index
    %c0_18 = arith.constant 0 : index
    %28 = vector.load %arg19[%c0_17, %c0_18] : memref<2x128xf32, #tpu.memory_space<vmem>>, vector<1x128xf32>
    %29 = vector.shape_cast %28 : vector<1x128xf32> to vector<128xf32>
    %c1 = arith.constant 1 : index
    %c0_19 = arith.constant 0 : index
    %30 = vector.load %arg18[%c1, %c0_19] : memref<20x32xf32, #tpu.memory_space<vmem>>, vector<1x32xf32>
    %31 = vector.shape_cast %30 : vector<1x32xf32> to vector<32xf32>
    %c2 = arith.constant 2 : index
    %c0_20 = arith.constant 0 : index
    %32 = vector.load %arg18[%c2, %c0_20] : memref<20x32xf32, #tpu.memory_space<vmem>>, vector<1x32xf32>
    %33 = vector.shape_cast %32 : vector<1x32xf32> to vector<32xf32>
    %c3 = arith.constant 3 : index
    %c0_21 = arith.constant 0 : index
    %34 = vector.load %arg18[%c3, %c0_21] : memref<20x32xf32, #tpu.memory_space<vmem>>, vector<1x32xf32>
    %35 = vector.shape_cast %34 : vector<1x32xf32> to vector<32xf32>
    %c4 = arith.constant 4 : index
    %c0_22 = arith.constant 0 : index
    %36 = vector.load %arg18[%c4, %c0_22] : memref<20x32xf32, #tpu.memory_space<vmem>>, vector<1x32xf32>
    %37 = vector.shape_cast %36 : vector<1x32xf32> to vector<32xf32>
    %c5 = arith.constant 5 : index
    %c0_23 = arith.constant 0 : index
    %38 = vector.load %arg18[%c5, %c0_23] : memref<20x32xf32, #tpu.memory_space<vmem>>, vector<1x32xf32>
    %39 = vector.shape_cast %38 : vector<1x32xf32> to vector<32xf32>
    %c6 = arith.constant 6 : index
    %c0_24 = arith.constant 0 : index
    %40 = vector.load %arg18[%c6, %c0_24] : memref<20x32xf32, #tpu.memory_space<vmem>>, vector<1x32xf32>
    %41 = vector.shape_cast %40 : vector<1x32xf32> to vector<32xf32>
    %cst_25 = arith.constant dense<0.000000e+00> : vector<32xf32>
    %42 = vector.multi_reduction <add>, %27, %cst_25 [1] : vector<32x32xf32> to vector<32xf32>
    %43 = vector.shape_cast %42 : vector<32xf32> to vector<32x1xf32>
    %cst_26 = arith.constant 3.200000e+01 : f32
    %44 = vector.broadcast %cst_26 : f32 to vector<32x1xf32>
    %45 = arith.divf %43, %44 : vector<32x1xf32>
    %46 = vector.broadcast %45 : vector<32x1xf32> to vector<32x32xf32>
    %47 = arith.subf %27, %46 : vector<32x32xf32>
    %48 = arith.mulf %47, %47 : vector<32x32xf32>
    %cst_27 = arith.constant dense<0.000000e+00> : vector<32xf32>
    %49 = vector.multi_reduction <add>, %48, %cst_27 [1] : vector<32x32xf32> to vector<32xf32>
    %50 = vector.shape_cast %49 : vector<32xf32> to vector<32x1xf32>
    %cst_28 = arith.constant 3.200000e+01 : f32
    %51 = vector.broadcast %cst_28 : f32 to vector<32x1xf32>
    %52 = arith.divf %50, %51 : vector<32x1xf32>
    %53 = vector.broadcast %45 : vector<32x1xf32> to vector<32x32xf32>
    %54 = arith.subf %27, %53 : vector<32x32xf32>
    %cst_29 = arith.constant 9.99999974E-6 : f32
    %55 = vector.broadcast %cst_29 : f32 to vector<32x1xf32>
    %56 = arith.addf %52, %55 : vector<32x1xf32>
    %57 = math.rsqrt %56 : vector<32x1xf32>
    %58 = vector.broadcast %57 : vector<32x1xf32> to vector<32x32xf32>
    %59 = arith.mulf %54, %58 : vector<32x32xf32>
    %60 = vector.shape_cast %31 : vector<32xf32> to vector<1x32xf32>
    %61 = vector.broadcast %60 : vector<1x32xf32> to vector<32x32xf32>
    %62 = arith.mulf %59, %61 : vector<32x32xf32>
    %63 = vector.shape_cast %33 : vector<32xf32> to vector<1x32xf32>
    %64 = vector.broadcast %63 : vector<1x32xf32> to vector<32x32xf32>
    %65 = arith.addf %62, %64 : vector<32x32xf32>
    %c0_30 = arith.constant 0 : index
    %c0_31 = arith.constant 0 : index
    %c0_32 = arith.constant 0 : index
    %66 = vector.load %arg5[%c0_30, %c0_31, %c0_32] : memref<6x32x16xf32, #tpu.memory_space<vmem>>, vector<1x32x16xf32>
    %67 = vector.shape_cast %66 : vector<1x32x16xf32> to vector<32x16xf32>
    %cst_33 = arith.constant dense<0.000000e+00> : vector<32x16xf32>
    %68 = tpu.matmul %65, %67, %cst_33 {dimension_numbers = #tpu.dot_dimension_numbers<[1], [0], [0], [1], [0, 0, 1, 1], [], []>} : vector<32x32xf32>, vector<32x16xf32>, vector<32x16xf32> -> vector<32x16xf32>
    %c0_34 = arith.constant 0 : index
    %c0_35 = arith.constant 0 : index
    %c0_36 = arith.constant 0 : index
    %69 = vector.load %arg6[%c0_34, %c0_35, %c0_36] : memref<6x1x16xf32, #tpu.memory_space<vmem>>, vector<1x1x16xf32>
    %70 = vector.shape_cast %69 : vector<1x1x16xf32> to vector<1x16xf32>
    %71 = vector.broadcast %70 : vector<1x16xf32> to vector<32x16xf32>
    %72 = arith.addf %68, %71 : vector<32x16xf32>
    %c2_37 = arith.constant 2 : index
    %c0_38 = arith.constant 0 : index
    %c0_39 = arith.constant 0 : index
    %73 = vector.load %arg5[%c2_37, %c0_38, %c0_39] : memref<6x32x16xf32, #tpu.memory_space<vmem>>, vector<1x32x16xf32>
    %74 = vector.shape_cast %73 : vector<1x32x16xf32> to vector<32x16xf32>
    %cst_40 = arith.constant dense<0.000000e+00> : vector<32x16xf32>
    %75 = tpu.matmul %65, %74, %cst_40 {dimension_numbers = #tpu.dot_dimension_numbers<[1], [0], [0], [1], [0, 0, 1, 1], [], []>} : vector<32x32xf32>, vector<32x16xf32>, vector<32x16xf32> -> vector<32x16xf32>
    %c2_41 = arith.constant 2 : index
    %c0_42 = arith.constant 0 : index
    %c0_43 = arith.constant 0 : index
    %76 = vector.load %arg6[%c2_41, %c0_42, %c0_43] : memref<6x1x16xf32, #tpu.memory_space<vmem>>, vector<1x1x16xf32>
    %77 = vector.shape_cast %76 : vector<1x1x16xf32> to vector<1x16xf32>
    %78 = vector.broadcast %77 : vector<1x16xf32> to vector<32x16xf32>
    %79 = arith.addf %75, %78 : vector<32x16xf32>
    %c4_44 = arith.constant 4 : index
    %c0_45 = arith.constant 0 : index
    %c0_46 = arith.constant 0 : index
    %80 = vector.load %arg5[%c4_44, %c0_45, %c0_46] : memref<6x32x16xf32, #tpu.memory_space<vmem>>, vector<1x32x16xf32>
    %81 = vector.shape_cast %80 : vector<1x32x16xf32> to vector<32x16xf32>
    %cst_47 = arith.constant dense<0.000000e+00> : vector<32x16xf32>
    %82 = tpu.matmul %65, %81, %cst_47 {dimension_numbers = #tpu.dot_dimension_numbers<[1], [0], [0], [1], [0, 0, 1, 1], [], []>} : vector<32x32xf32>, vector<32x16xf32>, vector<32x16xf32> -> vector<32x16xf32>
    %c4_48 = arith.constant 4 : index
    %c0_49 = arith.constant 0 : index
    %c0_50 = arith.constant 0 : index
    %83 = vector.load %arg6[%c4_48, %c0_49, %c0_50] : memref<6x1x16xf32, #tpu.memory_space<vmem>>, vector<1x1x16xf32>
    %84 = vector.shape_cast %83 : vector<1x1x16xf32> to vector<1x16xf32>
    %85 = vector.broadcast %84 : vector<1x16xf32> to vector<32x16xf32>
    %86 = arith.addf %82, %85 : vector<32x16xf32>
    %c1_51 = arith.constant 1 : index
    %c0_52 = arith.constant 0 : index
    %c0_53 = arith.constant 0 : index
    %87 = vector.load %arg5[%c1_51, %c0_52, %c0_53] : memref<6x32x16xf32, #tpu.memory_space<vmem>>, vector<1x32x16xf32>
    %88 = vector.shape_cast %87 : vector<1x32x16xf32> to vector<32x16xf32>
    %cst_54 = arith.constant dense<0.000000e+00> : vector<32x16xf32>
    %89 = tpu.matmul %65, %88, %cst_54 {dimension_numbers = #tpu.dot_dimension_numbers<[1], [0], [0], [1], [0, 0, 1, 1], [], []>} : vector<32x32xf32>, vector<32x16xf32>, vector<32x16xf32> -> vector<32x16xf32>
    %c1_55 = arith.constant 1 : index
    %c0_56 = arith.constant 0 : index
    %c0_57 = arith.constant 0 : index
    %90 = vector.load %arg6[%c1_55, %c0_56, %c0_57] : memref<6x1x16xf32, #tpu.memory_space<vmem>>, vector<1x1x16xf32>
    %91 = vector.shape_cast %90 : vector<1x1x16xf32> to vector<1x16xf32>
    %92 = vector.broadcast %91 : vector<1x16xf32> to vector<32x16xf32>
    %93 = arith.addf %89, %92 : vector<32x16xf32>
    %c3_58 = arith.constant 3 : index
    %c0_59 = arith.constant 0 : index
    %c0_60 = arith.constant 0 : index
    %94 = vector.load %arg5[%c3_58, %c0_59, %c0_60] : memref<6x32x16xf32, #tpu.memory_space<vmem>>, vector<1x32x16xf32>
    %95 = vector.shape_cast %94 : vector<1x32x16xf32> to vector<32x16xf32>
    %cst_61 = arith.constant dense<0.000000e+00> : vector<32x16xf32>
    %96 = tpu.matmul %65, %95, %cst_61 {dimension_numbers = #tpu.dot_dimension_numbers<[1], [0], [0], [1], [0, 0, 1, 1], [], []>} : vector<32x32xf32>, vector<32x16xf32>, vector<32x16xf32> -> vector<32x16xf32>
    %c3_62 = arith.constant 3 : index
    %c0_63 = arith.constant 0 : index
    %c0_64 = arith.constant 0 : index
    %97 = vector.load %arg6[%c3_62, %c0_63, %c0_64] : memref<6x1x16xf32, #tpu.memory_space<vmem>>, vector<1x1x16xf32>
    %98 = vector.shape_cast %97 : vector<1x1x16xf32> to vector<1x16xf32>
    %99 = vector.broadcast %98 : vector<1x16xf32> to vector<32x16xf32>
    %100 = arith.addf %96, %99 : vector<32x16xf32>
    %c5_65 = arith.constant 5 : index
    %c0_66 = arith.constant 0 : index
    %c0_67 = arith.constant 0 : index
    %101 = vector.load %arg5[%c5_65, %c0_66, %c0_67] : memref<6x32x16xf32, #tpu.memory_space<vmem>>, vector<1x32x16xf32>
    %102 = vector.shape_cast %101 : vector<1x32x16xf32> to vector<32x16xf32>
    %cst_68 = arith.constant dense<0.000000e+00> : vector<32x16xf32>
    %103 = tpu.matmul %65, %102, %cst_68 {dimension_numbers = #tpu.dot_dimension_numbers<[1], [0], [0], [1], [0, 0, 1, 1], [], []>} : vector<32x32xf32>, vector<32x16xf32>, vector<32x16xf32> -> vector<32x16xf32>
    %c5_69 = arith.constant 5 : index
    %c0_70 = arith.constant 0 : index
    %c0_71 = arith.constant 0 : index
    %104 = vector.load %arg6[%c5_69, %c0_70, %c0_71] : memref<6x1x16xf32, #tpu.memory_space<vmem>>, vector<1x1x16xf32>
    %105 = vector.shape_cast %104 : vector<1x1x16xf32> to vector<1x16xf32>
    %106 = vector.broadcast %105 : vector<1x16xf32> to vector<32x16xf32>
    %107 = arith.addf %103, %106 : vector<32x16xf32>
    %108 = vector.extract_strided_slice %72 {offsets = [0, 0], sizes = [8, 16], strides = [1, 1]} : vector<32x16xf32> to vector<8x16xf32>
    %109 = vector.extract_strided_slice %79 {offsets = [0, 0], sizes = [8, 16], strides = [1, 1]} : vector<32x16xf32> to vector<8x16xf32>
    %110 = vector.extract_strided_slice %86 {offsets = [0, 0], sizes = [8, 16], strides = [1, 1]} : vector<32x16xf32> to vector<8x16xf32>
    %cst_72 = arith.constant dense<0.000000e+00> : vector<8x8xf32>
    %111 = tpu.matmul %108, %109, %cst_72 {dimension_numbers = #tpu.dot_dimension_numbers<[1], [1], [0], [0], [0, 0, 1, 0], [], []>} : vector<8x16xf32>, vector<8x16xf32>, vector<8x8xf32> -> vector<8x8xf32>
    %cst_73 = arith.constant 2.500000e-01 : f32
    %112 = vector.broadcast %cst_73 : f32 to vector<8x8xf32>
    %113 = arith.mulf %111, %112 : vector<8x8xf32>
    %cst_74 = arith.constant dense<0xFF800000> : vector<8xf32>
    %114 = vector.multi_reduction <maximumf>, %113, %cst_74 [1] : vector<8x8xf32> to vector<8xf32>
    %115 = vector.shape_cast %114 : vector<8xf32> to vector<8x1xf32>
    %116 = vector.broadcast %115 : vector<8x1xf32> to vector<8x8xf32>
    %117 = arith.subf %113, %116 : vector<8x8xf32>
    %118 = math.exp %117 : vector<8x8xf32>
    %cst_75 = arith.constant dense<0.000000e+00> : vector<8xf32>
    %119 = vector.multi_reduction <add>, %118, %cst_75 [1] : vector<8x8xf32> to vector<8xf32>
    %120 = vector.shape_cast %119 : vector<8xf32> to vector<8x1xf32>
    %121 = vector.broadcast %120 : vector<8x1xf32> to vector<8x8xf32>
    %122 = arith.divf %118, %121 : vector<8x8xf32>
    %cst_76 = arith.constant dense<0.000000e+00> : vector<8x16xf32>
    %123 = tpu.matmul %122, %110, %cst_76 {dimension_numbers = #tpu.dot_dimension_numbers<[1], [0], [0], [1], [0, 0, 1, 1], [], []>} : vector<8x8xf32>, vector<8x16xf32>, vector<8x16xf32> -> vector<8x16xf32>
    %c0_77 = arith.constant 0 : index
    %c0_78 = arith.constant 0 : index
    %c0_79 = arith.constant 0 : index
    %124 = vector.load %arg7[%c0_77, %c0_78, %c0_79] : memref<2x16x32xf32, #tpu.memory_space<vmem>>, vector<1x16x32xf32>
    %125 = vector.shape_cast %124 : vector<1x16x32xf32> to vector<16x32xf32>
    %cst_80 = arith.constant dense<0.000000e+00> : vector<8x32xf32>
    %126 = tpu.matmul %123, %125, %cst_80 {dimension_numbers = #tpu.dot_dimension_numbers<[1], [0], [0], [1], [0, 0, 1, 1], [], []>} : vector<8x16xf32>, vector<16x32xf32>, vector<8x32xf32> -> vector<8x32xf32>
    %127 = vector.extract_strided_slice %93 {offsets = [0, 0], sizes = [8, 16], strides = [1, 1]} : vector<32x16xf32> to vector<8x16xf32>
    %128 = vector.extract_strided_slice %100 {offsets = [0, 0], sizes = [8, 16], strides = [1, 1]} : vector<32x16xf32> to vector<8x16xf32>
    %129 = vector.extract_strided_slice %107 {offsets = [0, 0], sizes = [8, 16], strides = [1, 1]} : vector<32x16xf32> to vector<8x16xf32>
    %cst_81 = arith.constant dense<0.000000e+00> : vector<8x8xf32>
    %130 = tpu.matmul %127, %128, %cst_81 {dimension_numbers = #tpu.dot_dimension_numbers<[1], [1], [0], [0], [0, 0, 1, 0], [], []>} : vector<8x16xf32>, vector<8x16xf32>, vector<8x8xf32> -> vector<8x8xf32>
    %cst_82 = arith.constant 2.500000e-01 : f32
    %131 = vector.broadcast %cst_82 : f32 to vector<8x8xf32>
    %132 = arith.mulf %130, %131 : vector<8x8xf32>
    %cst_83 = arith.constant dense<0xFF800000> : vector<8xf32>
    %133 = vector.multi_reduction <maximumf>, %132, %cst_83 [1] : vector<8x8xf32> to vector<8xf32>
    %134 = vector.shape_cast %133 : vector<8xf32> to vector<8x1xf32>
    %135 = vector.broadcast %134 : vector<8x1xf32> to vector<8x8xf32>
    %136 = arith.subf %132, %135 : vector<8x8xf32>
    %137 = math.exp %136 : vector<8x8xf32>
    %cst_84 = arith.constant dense<0.000000e+00> : vector<8xf32>
    %138 = vector.multi_reduction <add>, %137, %cst_84 [1] : vector<8x8xf32> to vector<8xf32>
    %139 = vector.shape_cast %138 : vector<8xf32> to vector<8x1xf32>
    %140 = vector.broadcast %139 : vector<8x1xf32> to vector<8x8xf32>
    %141 = arith.divf %137, %140 : vector<8x8xf32>
    %cst_85 = arith.constant dense<0.000000e+00> : vector<8x16xf32>
    %142 = tpu.matmul %141, %129, %cst_85 {dimension_numbers = #tpu.dot_dimension_numbers<[1], [0], [0], [1], [0, 0, 1, 1], [], []>} : vector<8x8xf32>, vector<8x16xf32>, vector<8x16xf32> -> vector<8x16xf32>
    %c1_86 = arith.constant 1 : index
    %c0_87 = arith.constant 0 : index
    %c0_88 = arith.constant 0 : index
    %143 = vector.load %arg7[%c1_86, %c0_87, %c0_88] : memref<2x16x32xf32, #tpu.memory_space<vmem>>, vector<1x16x32xf32>
    %144 = vector.shape_cast %143 : vector<1x16x32xf32> to vector<16x32xf32>
    %cst_89 = arith.constant dense<0.000000e+00> : vector<8x32xf32>
    %145 = tpu.matmul %142, %144, %cst_89 {dimension_numbers = #tpu.dot_dimension_numbers<[1], [0], [0], [1], [0, 0, 1, 1], [], []>} : vector<8x16xf32>, vector<16x32xf32>, vector<8x32xf32> -> vector<8x32xf32>
    %146 = arith.addf %126, %145 : vector<8x32xf32>
    %147 = vector.extract_strided_slice %72 {offsets = [8, 0], sizes = [8, 16], strides = [1, 1]} : vector<32x16xf32> to vector<8x16xf32>
    %148 = vector.extract_strided_slice %79 {offsets = [8, 0], sizes = [8, 16], strides = [1, 1]} : vector<32x16xf32> to vector<8x16xf32>
    %149 = vector.extract_strided_slice %86 {offsets = [8, 0], sizes = [8, 16], strides = [1, 1]} : vector<32x16xf32> to vector<8x16xf32>
    %cst_90 = arith.constant dense<0.000000e+00> : vector<8x8xf32>
    %150 = tpu.matmul %147, %148, %cst_90 {dimension_numbers = #tpu.dot_dimension_numbers<[1], [1], [0], [0], [0, 0, 1, 0], [], []>} : vector<8x16xf32>, vector<8x16xf32>, vector<8x8xf32> -> vector<8x8xf32>
    %cst_91 = arith.constant 2.500000e-01 : f32
    %151 = vector.broadcast %cst_91 : f32 to vector<8x8xf32>
    %152 = arith.mulf %150, %151 : vector<8x8xf32>
    %cst_92 = arith.constant dense<0xFF800000> : vector<8xf32>
    %153 = vector.multi_reduction <maximumf>, %152, %cst_92 [1] : vector<8x8xf32> to vector<8xf32>
    %154 = vector.shape_cast %153 : vector<8xf32> to vector<8x1xf32>
    %155 = vector.broadcast %154 : vector<8x1xf32> to vector<8x8xf32>
    %156 = arith.subf %152, %155 : vector<8x8xf32>
    %157 = math.exp %156 : vector<8x8xf32>
    %cst_93 = arith.constant dense<0.000000e+00> : vector<8xf32>
    %158 = vector.multi_reduction <add>, %157, %cst_93 [1] : vector<8x8xf32> to vector<8xf32>
    %159 = vector.shape_cast %158 : vector<8xf32> to vector<8x1xf32>
    %160 = vector.broadcast %159 : vector<8x1xf32> to vector<8x8xf32>
    %161 = arith.divf %157, %160 : vector<8x8xf32>
    %cst_94 = arith.constant dense<0.000000e+00> : vector<8x16xf32>
    %162 = tpu.matmul %161, %149, %cst_94 {dimension_numbers = #tpu.dot_dimension_numbers<[1], [0], [0], [1], [0, 0, 1, 1], [], []>} : vector<8x8xf32>, vector<8x16xf32>, vector<8x16xf32> -> vector<8x16xf32>
    %c0_95 = arith.constant 0 : index
    %c0_96 = arith.constant 0 : index
    %c0_97 = arith.constant 0 : index
    %163 = vector.load %arg7[%c0_95, %c0_96, %c0_97] : memref<2x16x32xf32, #tpu.memory_space<vmem>>, vector<1x16x32xf32>
    %164 = vector.shape_cast %163 : vector<1x16x32xf32> to vector<16x32xf32>
    %cst_98 = arith.constant dense<0.000000e+00> : vector<8x32xf32>
    %165 = tpu.matmul %162, %164, %cst_98 {dimension_numbers = #tpu.dot_dimension_numbers<[1], [0], [0], [1], [0, 0, 1, 1], [], []>} : vector<8x16xf32>, vector<16x32xf32>, vector<8x32xf32> -> vector<8x32xf32>
    %166 = vector.extract_strided_slice %93 {offsets = [8, 0], sizes = [8, 16], strides = [1, 1]} : vector<32x16xf32> to vector<8x16xf32>
    %167 = vector.extract_strided_slice %100 {offsets = [8, 0], sizes = [8, 16], strides = [1, 1]} : vector<32x16xf32> to vector<8x16xf32>
    %168 = vector.extract_strided_slice %107 {offsets = [8, 0], sizes = [8, 16], strides = [1, 1]} : vector<32x16xf32> to vector<8x16xf32>
    %cst_99 = arith.constant dense<0.000000e+00> : vector<8x8xf32>
    %169 = tpu.matmul %166, %167, %cst_99 {dimension_numbers = #tpu.dot_dimension_numbers<[1], [1], [0], [0], [0, 0, 1, 0], [], []>} : vector<8x16xf32>, vector<8x16xf32>, vector<8x8xf32> -> vector<8x8xf32>
    %cst_100 = arith.constant 2.500000e-01 : f32
    %170 = vector.broadcast %cst_100 : f32 to vector<8x8xf32>
    %171 = arith.mulf %169, %170 : vector<8x8xf32>
    %cst_101 = arith.constant dense<0xFF800000> : vector<8xf32>
    %172 = vector.multi_reduction <maximumf>, %171, %cst_101 [1] : vector<8x8xf32> to vector<8xf32>
    %173 = vector.shape_cast %172 : vector<8xf32> to vector<8x1xf32>
    %174 = vector.broadcast %173 : vector<8x1xf32> to vector<8x8xf32>
    %175 = arith.subf %171, %174 : vector<8x8xf32>
    %176 = math.exp %175 : vector<8x8xf32>
    %cst_102 = arith.constant dense<0.000000e+00> : vector<8xf32>
    %177 = vector.multi_reduction <add>, %176, %cst_102 [1] : vector<8x8xf32> to vector<8xf32>
    %178 = vector.shape_cast %177 : vector<8xf32> to vector<8x1xf32>
    %179 = vector.broadcast %178 : vector<8x1xf32> to vector<8x8xf32>
    %180 = arith.divf %176, %179 : vector<8x8xf32>
    %cst_103 = arith.constant dense<0.000000e+00> : vector<8x16xf32>
    %181 = tpu.matmul %180, %168, %cst_103 {dimension_numbers = #tpu.dot_dimension_numbers<[1], [0], [0], [1], [0, 0, 1, 1], [], []>} : vector<8x8xf32>, vector<8x16xf32>, vector<8x16xf32> -> vector<8x16xf32>
    %c1_104 = arith.constant 1 : index
    %c0_105 = arith.constant 0 : index
    %c0_106 = arith.constant 0 : index
    %182 = vector.load %arg7[%c1_104, %c0_105, %c0_106] : memref<2x16x32xf32, #tpu.memory_space<vmem>>, vector<1x16x32xf32>
    %183 = vector.shape_cast %182 : vector<1x16x32xf32> to vector<16x32xf32>
    %cst_107 = arith.constant dense<0.000000e+00> : vector<8x32xf32>
    %184 = tpu.matmul %181, %183, %cst_107 {dimension_numbers = #tpu.dot_dimension_numbers<[1], [0], [0], [1], [0, 0, 1, 1], [], []>} : vector<8x16xf32>, vector<16x32xf32>, vector<8x32xf32> -> vector<8x32xf32>
    %185 = arith.addf %165, %184 : vector<8x32xf32>
    %186 = vector.extract_strided_slice %72 {offsets = [16, 0], sizes = [8, 16], strides = [1, 1]} : vector<32x16xf32> to vector<8x16xf32>
    %187 = vector.extract_strided_slice %79 {offsets = [16, 0], sizes = [8, 16], strides = [1, 1]} : vector<32x16xf32> to vector<8x16xf32>
    %188 = vector.extract_strided_slice %86 {offsets = [16, 0], sizes = [8, 16], strides = [1, 1]} : vector<32x16xf32> to vector<8x16xf32>
    %cst_108 = arith.constant dense<0.000000e+00> : vector<8x8xf32>
    %189 = tpu.matmul %186, %187, %cst_108 {dimension_numbers = #tpu.dot_dimension_numbers<[1], [1], [0], [0], [0, 0, 1, 0], [], []>} : vector<8x16xf32>, vector<8x16xf32>, vector<8x8xf32> -> vector<8x8xf32>
    %cst_109 = arith.constant 2.500000e-01 : f32
    %190 = vector.broadcast %cst_109 : f32 to vector<8x8xf32>
    %191 = arith.mulf %189, %190 : vector<8x8xf32>
    %cst_110 = arith.constant dense<0xFF800000> : vector<8xf32>
    %192 = vector.multi_reduction <maximumf>, %191, %cst_110 [1] : vector<8x8xf32> to vector<8xf32>
    %193 = vector.shape_cast %192 : vector<8xf32> to vector<8x1xf32>
    %194 = vector.broadcast %193 : vector<8x1xf32> to vector<8x8xf32>
    %195 = arith.subf %191, %194 : vector<8x8xf32>
    %196 = math.exp %195 : vector<8x8xf32>
    %cst_111 = arith.constant dense<0.000000e+00> : vector<8xf32>
    %197 = vector.multi_reduction <add>, %196, %cst_111 [1] : vector<8x8xf32> to vector<8xf32>
    %198 = vector.shape_cast %197 : vector<8xf32> to vector<8x1xf32>
    %199 = vector.broadcast %198 : vector<8x1xf32> to vector<8x8xf32>
    %200 = arith.divf %196, %199 : vector<8x8xf32>
    %cst_112 = arith.constant dense<0.000000e+00> : vector<8x16xf32>
    %201 = tpu.matmul %200, %188, %cst_112 {dimension_numbers = #tpu.dot_dimension_numbers<[1], [0], [0], [1], [0, 0, 1, 1], [], []>} : vector<8x8xf32>, vector<8x16xf32>, vector<8x16xf32> -> vector<8x16xf32>
    %c0_113 = arith.constant 0 : index
    %c0_114 = arith.constant 0 : index
    %c0_115 = arith.constant 0 : index
    %202 = vector.load %arg7[%c0_113, %c0_114, %c0_115] : memref<2x16x32xf32, #tpu.memory_space<vmem>>, vector<1x16x32xf32>
    %203 = vector.shape_cast %202 : vector<1x16x32xf32> to vector<16x32xf32>
    %cst_116 = arith.constant dense<0.000000e+00> : vector<8x32xf32>
    %204 = tpu.matmul %201, %203, %cst_116 {dimension_numbers = #tpu.dot_dimension_numbers<[1], [0], [0], [1], [0, 0, 1, 1], [], []>} : vector<8x16xf32>, vector<16x32xf32>, vector<8x32xf32> -> vector<8x32xf32>
    %205 = vector.extract_strided_slice %93 {offsets = [16, 0], sizes = [8, 16], strides = [1, 1]} : vector<32x16xf32> to vector<8x16xf32>
    %206 = vector.extract_strided_slice %100 {offsets = [16, 0], sizes = [8, 16], strides = [1, 1]} : vector<32x16xf32> to vector<8x16xf32>
    %207 = vector.extract_strided_slice %107 {offsets = [16, 0], sizes = [8, 16], strides = [1, 1]} : vector<32x16xf32> to vector<8x16xf32>
    %cst_117 = arith.constant dense<0.000000e+00> : vector<8x8xf32>
    %208 = tpu.matmul %205, %206, %cst_117 {dimension_numbers = #tpu.dot_dimension_numbers<[1], [1], [0], [0], [0, 0, 1, 0], [], []>} : vector<8x16xf32>, vector<8x16xf32>, vector<8x8xf32> -> vector<8x8xf32>
    %cst_118 = arith.constant 2.500000e-01 : f32
    %209 = vector.broadcast %cst_118 : f32 to vector<8x8xf32>
    %210 = arith.mulf %208, %209 : vector<8x8xf32>
    %cst_119 = arith.constant dense<0xFF800000> : vector<8xf32>
    %211 = vector.multi_reduction <maximumf>, %210, %cst_119 [1] : vector<8x8xf32> to vector<8xf32>
    %212 = vector.shape_cast %211 : vector<8xf32> to vector<8x1xf32>
    %213 = vector.broadcast %212 : vector<8x1xf32> to vector<8x8xf32>
    %214 = arith.subf %210, %213 : vector<8x8xf32>
    %215 = math.exp %214 : vector<8x8xf32>
    %cst_120 = arith.constant dense<0.000000e+00> : vector<8xf32>
    %216 = vector.multi_reduction <add>, %215, %cst_120 [1] : vector<8x8xf32> to vector<8xf32>
    %217 = vector.shape_cast %216 : vector<8xf32> to vector<8x1xf32>
    %218 = vector.broadcast %217 : vector<8x1xf32> to vector<8x8xf32>
    %219 = arith.divf %215, %218 : vector<8x8xf32>
    %cst_121 = arith.constant dense<0.000000e+00> : vector<8x16xf32>
    %220 = tpu.matmul %219, %207, %cst_121 {dimension_numbers = #tpu.dot_dimension_numbers<[1], [0], [0], [1], [0, 0, 1, 1], [], []>} : vector<8x8xf32>, vector<8x16xf32>, vector<8x16xf32> -> vector<8x16xf32>
    %c1_122 = arith.constant 1 : index
    %c0_123 = arith.constant 0 : index
    %c0_124 = arith.constant 0 : index
    %221 = vector.load %arg7[%c1_122, %c0_123, %c0_124] : memref<2x16x32xf32, #tpu.memory_space<vmem>>, vector<1x16x32xf32>
    %222 = vector.shape_cast %221 : vector<1x16x32xf32> to vector<16x32xf32>
    %cst_125 = arith.constant dense<0.000000e+00> : vector<8x32xf32>
    %223 = tpu.matmul %220, %222, %cst_125 {dimension_numbers = #tpu.dot_dimension_numbers<[1], [0], [0], [1], [0, 0, 1, 1], [], []>} : vector<8x16xf32>, vector<16x32xf32>, vector<8x32xf32> -> vector<8x32xf32>
    %224 = arith.addf %204, %223 : vector<8x32xf32>
    %225 = vector.extract_strided_slice %72 {offsets = [24, 0], sizes = [8, 16], strides = [1, 1]} : vector<32x16xf32> to vector<8x16xf32>
    %226 = vector.extract_strided_slice %79 {offsets = [24, 0], sizes = [8, 16], strides = [1, 1]} : vector<32x16xf32> to vector<8x16xf32>
    %227 = vector.extract_strided_slice %86 {offsets = [24, 0], sizes = [8, 16], strides = [1, 1]} : vector<32x16xf32> to vector<8x16xf32>
    %cst_126 = arith.constant dense<0.000000e+00> : vector<8x8xf32>
    %228 = tpu.matmul %225, %226, %cst_126 {dimension_numbers = #tpu.dot_dimension_numbers<[1], [1], [0], [0], [0, 0, 1, 0], [], []>} : vector<8x16xf32>, vector<8x16xf32>, vector<8x8xf32> -> vector<8x8xf32>
    %cst_127 = arith.constant 2.500000e-01 : f32
    %229 = vector.broadcast %cst_127 : f32 to vector<8x8xf32>
    %230 = arith.mulf %228, %229 : vector<8x8xf32>
    %cst_128 = arith.constant dense<0xFF800000> : vector<8xf32>
    %231 = vector.multi_reduction <maximumf>, %230, %cst_128 [1] : vector<8x8xf32> to vector<8xf32>
    %232 = vector.shape_cast %231 : vector<8xf32> to vector<8x1xf32>
    %233 = vector.broadcast %232 : vector<8x1xf32> to vector<8x8xf32>
    %234 = arith.subf %230, %233 : vector<8x8xf32>
    %235 = math.exp %234 : vector<8x8xf32>
    %cst_129 = arith.constant dense<0.000000e+00> : vector<8xf32>
    %236 = vector.multi_reduction <add>, %235, %cst_129 [1] : vector<8x8xf32> to vector<8xf32>
    %237 = vector.shape_cast %236 : vector<8xf32> to vector<8x1xf32>
    %238 = vector.broadcast %237 : vector<8x1xf32> to vector<8x8xf32>
    %239 = arith.divf %235, %238 : vector<8x8xf32>
    %cst_130 = arith.constant dense<0.000000e+00> : vector<8x16xf32>
    %240 = tpu.matmul %239, %227, %cst_130 {dimension_numbers = #tpu.dot_dimension_numbers<[1], [0], [0], [1], [0, 0, 1, 1], [], []>} : vector<8x8xf32>, vector<8x16xf32>, vector<8x16xf32> -> vector<8x16xf32>
    %c0_131 = arith.constant 0 : index
    %c0_132 = arith.constant 0 : index
    %c0_133 = arith.constant 0 : index
    %241 = vector.load %arg7[%c0_131, %c0_132, %c0_133] : memref<2x16x32xf32, #tpu.memory_space<vmem>>, vector<1x16x32xf32>
    %242 = vector.shape_cast %241 : vector<1x16x32xf32> to vector<16x32xf32>
    %cst_134 = arith.constant dense<0.000000e+00> : vector<8x32xf32>
    %243 = tpu.matmul %240, %242, %cst_134 {dimension_numbers = #tpu.dot_dimension_numbers<[1], [0], [0], [1], [0, 0, 1, 1], [], []>} : vector<8x16xf32>, vector<16x32xf32>, vector<8x32xf32> -> vector<8x32xf32>
    %244 = vector.extract_strided_slice %93 {offsets = [24, 0], sizes = [8, 16], strides = [1, 1]} : vector<32x16xf32> to vector<8x16xf32>
    %245 = vector.extract_strided_slice %100 {offsets = [24, 0], sizes = [8, 16], strides = [1, 1]} : vector<32x16xf32> to vector<8x16xf32>
    %246 = vector.extract_strided_slice %107 {offsets = [24, 0], sizes = [8, 16], strides = [1, 1]} : vector<32x16xf32> to vector<8x16xf32>
    %cst_135 = arith.constant dense<0.000000e+00> : vector<8x8xf32>
    %247 = tpu.matmul %244, %245, %cst_135 {dimension_numbers = #tpu.dot_dimension_numbers<[1], [1], [0], [0], [0, 0, 1, 0], [], []>} : vector<8x16xf32>, vector<8x16xf32>, vector<8x8xf32> -> vector<8x8xf32>
    %cst_136 = arith.constant 2.500000e-01 : f32
    %248 = vector.broadcast %cst_136 : f32 to vector<8x8xf32>
    %249 = arith.mulf %247, %248 : vector<8x8xf32>
    %cst_137 = arith.constant dense<0xFF800000> : vector<8xf32>
    %250 = vector.multi_reduction <maximumf>, %249, %cst_137 [1] : vector<8x8xf32> to vector<8xf32>
    %251 = vector.shape_cast %250 : vector<8xf32> to vector<8x1xf32>
    %252 = vector.broadcast %251 : vector<8x1xf32> to vector<8x8xf32>
    %253 = arith.subf %249, %252 : vector<8x8xf32>
    %254 = math.exp %253 : vector<8x8xf32>
    %cst_138 = arith.constant dense<0.000000e+00> : vector<8xf32>
    %255 = vector.multi_reduction <add>, %254, %cst_138 [1] : vector<8x8xf32> to vector<8xf32>
    %256 = vector.shape_cast %255 : vector<8xf32> to vector<8x1xf32>
    %257 = vector.broadcast %256 : vector<8x1xf32> to vector<8x8xf32>
    %258 = arith.divf %254, %257 : vector<8x8xf32>
    %cst_139 = arith.constant dense<0.000000e+00> : vector<8x16xf32>
    %259 = tpu.matmul %258, %246, %cst_139 {dimension_numbers = #tpu.dot_dimension_numbers<[1], [0], [0], [1], [0, 0, 1, 1], [], []>} : vector<8x8xf32>, vector<8x16xf32>, vector<8x16xf32> -> vector<8x16xf32>
    %c1_140 = arith.constant 1 : index
    %c0_141 = arith.constant 0 : index
    %c0_142 = arith.constant 0 : index
    %260 = vector.load %arg7[%c1_140, %c0_141, %c0_142] : memref<2x16x32xf32, #tpu.memory_space<vmem>>, vector<1x16x32xf32>
    %261 = vector.shape_cast %260 : vector<1x16x32xf32> to vector<16x32xf32>
    %cst_143 = arith.constant dense<0.000000e+00> : vector<8x32xf32>
    %262 = tpu.matmul %259, %261, %cst_143 {dimension_numbers = #tpu.dot_dimension_numbers<[1], [0], [0], [1], [0, 0, 1, 1], [], []>} : vector<8x16xf32>, vector<16x32xf32>, vector<8x32xf32> -> vector<8x32xf32>
    %263 = arith.addf %243, %262 : vector<8x32xf32>
    %264 = tpu.concatenate %146, %185, %224, %263 in 0 : vector<8x32xf32>, vector<8x32xf32>, vector<8x32xf32>, vector<8x32xf32> -> vector<32x32xf32>
    %265 = arith.addf %27, %264 : vector<32x32xf32>
    %266 = vector.shape_cast %35 : vector<32xf32> to vector<1x32xf32>
    %267 = vector.broadcast %266 : vector<1x32xf32> to vector<32x32xf32>
    %268 = arith.addf %265, %267 : vector<32x32xf32>
    %cst_144 = arith.constant dense<0.000000e+00> : vector<32xf32>
    %269 = vector.multi_reduction <add>, %268, %cst_144 [1] : vector<32x32xf32> to vector<32xf32>
    %270 = vector.shape_cast %269 : vector<32xf32> to vector<32x1xf32>
    %cst_145 = arith.constant 3.200000e+01 : f32
    %271 = vector.broadcast %cst_145 : f32 to vector<32x1xf32>
    %272 = arith.divf %270, %271 : vector<32x1xf32>
    %273 = vector.broadcast %272 : vector<32x1xf32> to vector<32x32xf32>
    %274 = arith.subf %268, %273 : vector<32x32xf32>
    %275 = arith.mulf %274, %274 : vector<32x32xf32>
    %cst_146 = arith.constant dense<0.000000e+00> : vector<32xf32>
    %276 = vector.multi_reduction <add>, %275, %cst_146 [1] : vector<32x32xf32> to vector<32xf32>
    %277 = vector.shape_cast %276 : vector<32xf32> to vector<32x1xf32>
    %cst_147 = arith.constant 3.200000e+01 : f32
    %278 = vector.broadcast %cst_147 : f32 to vector<32x1xf32>
    %279 = arith.divf %277, %278 : vector<32x1xf32>
    %280 = vector.broadcast %272 : vector<32x1xf32> to vector<32x32xf32>
    %281 = arith.subf %268, %280 : vector<32x32xf32>
    %cst_148 = arith.constant 9.99999974E-6 : f32
    %282 = vector.broadcast %cst_148 : f32 to vector<32x1xf32>
    %283 = arith.addf %279, %282 : vector<32x1xf32>
    %284 = math.rsqrt %283 : vector<32x1xf32>
    %285 = vector.broadcast %284 : vector<32x1xf32> to vector<32x32xf32>
    %286 = arith.mulf %281, %285 : vector<32x32xf32>
    %287 = vector.shape_cast %37 : vector<32xf32> to vector<1x32xf32>
    %288 = vector.broadcast %287 : vector<1x32xf32> to vector<32x32xf32>
    %289 = arith.mulf %286, %288 : vector<32x32xf32>
    %290 = vector.shape_cast %39 : vector<32xf32> to vector<1x32xf32>
    %291 = vector.broadcast %290 : vector<1x32xf32> to vector<32x32xf32>
    %292 = arith.addf %289, %291 : vector<32x32xf32>
    %c0_149 = arith.constant 0 : index
    %c0_150 = arith.constant 0 : index
    %293 = vector.load %arg8[%c0_149, %c0_150] : memref<32x128xf32, #tpu.memory_space<vmem>>, vector<32x128xf32>
    %cst_151 = arith.constant dense<0.000000e+00> : vector<32x128xf32>
    %294 = tpu.matmul %292, %293, %cst_151 {dimension_numbers = #tpu.dot_dimension_numbers<[1], [0], [0], [1], [0, 0, 1, 1], [], []>} : vector<32x32xf32>, vector<32x128xf32>, vector<32x128xf32> -> vector<32x128xf32>
    %295 = vector.shape_cast %29 : vector<128xf32> to vector<1x128xf32>
    %296 = vector.broadcast %295 : vector<1x128xf32> to vector<32x128xf32>
    %297 = arith.addf %294, %296 : vector<32x128xf32>
    %298 = arith.mulf %297, %297 : vector<32x128xf32>
    %299 = arith.mulf %297, %298 : vector<32x128xf32>
    %cst_152 = arith.constant 4.471500e-02 : f32
    %300 = vector.broadcast %cst_152 : f32 to vector<32x128xf32>
    %301 = arith.mulf %300, %299 : vector<32x128xf32>
    %302 = arith.addf %297, %301 : vector<32x128xf32>
    %cst_153 = arith.constant 0.797884583 : f32
    %303 = vector.broadcast %cst_153 : f32 to vector<32x128xf32>
    %304 = arith.mulf %303, %302 : vector<32x128xf32>
    %305 = math.tanh %304 : vector<32x128xf32>
    %cst_154 = arith.constant 1.000000e+00 : f32
    %306 = vector.broadcast %cst_154 : f32 to vector<32x128xf32>
    %307 = arith.addf %306, %305 : vector<32x128xf32>
    %cst_155 = arith.constant 5.000000e-01 : f32
    %308 = vector.broadcast %cst_155 : f32 to vector<32x128xf32>
    %309 = arith.mulf %308, %307 : vector<32x128xf32>
    %310 = arith.mulf %297, %309 : vector<32x128xf32>
    %c0_156 = arith.constant 0 : index
    %c0_157 = arith.constant 0 : index
    %311 = vector.load %arg9[%c0_156, %c0_157] : memref<128x32xf32, #tpu.memory_space<vmem>>, vector<128x32xf32>
    %cst_158 = arith.constant dense<0.000000e+00> : vector<32x32xf32>
    %312 = tpu.matmul %310, %311, %cst_158 {dimension_numbers = #tpu.dot_dimension_numbers<[1], [0], [0], [1], [0, 0, 1, 1], [], []>} : vector<32x128xf32>, vector<128x32xf32>, vector<32x32xf32> -> vector<32x32xf32>
    %313 = vector.shape_cast %41 : vector<32xf32> to vector<1x32xf32>
    %314 = vector.broadcast %313 : vector<1x32xf32> to vector<32x32xf32>
    %315 = arith.addf %312, %314 : vector<32x32xf32>
    %316 = arith.addf %268, %315 : vector<32x32xf32>
    %c7 = arith.constant 7 : index
    %c0_159 = arith.constant 0 : index
    %317 = vector.load %arg18[%c7, %c0_159] : memref<20x32xf32, #tpu.memory_space<vmem>>, vector<1x32xf32>
    %318 = vector.shape_cast %317 : vector<1x32xf32> to vector<32xf32>
    %c8 = arith.constant 8 : index
    %c0_160 = arith.constant 0 : index
    %319 = vector.load %arg18[%c8, %c0_160] : memref<20x32xf32, #tpu.memory_space<vmem>>, vector<1x32xf32>
    %320 = vector.shape_cast %319 : vector<1x32xf32> to vector<32xf32>
    %cst_161 = arith.constant dense<0.000000e+00> : vector<32xf32>
    %321 = vector.multi_reduction <add>, %316, %cst_161 [1] : vector<32x32xf32> to vector<32xf32>
    %322 = vector.shape_cast %321 : vector<32xf32> to vector<32x1xf32>
    %cst_162 = arith.constant 3.200000e+01 : f32
    %323 = vector.broadcast %cst_162 : f32 to vector<32x1xf32>
    %324 = arith.divf %322, %323 : vector<32x1xf32>
    %325 = vector.broadcast %324 : vector<32x1xf32> to vector<32x32xf32>
    %326 = arith.subf %316, %325 : vector<32x32xf32>
    %327 = arith.mulf %326, %326 : vector<32x32xf32>
    %cst_163 = arith.constant dense<0.000000e+00> : vector<32xf32>
    %328 = vector.multi_reduction <add>, %327, %cst_163 [1] : vector<32x32xf32> to vector<32xf32>
    %329 = vector.shape_cast %328 : vector<32xf32> to vector<32x1xf32>
    %cst_164 = arith.constant 3.200000e+01 : f32
    %330 = vector.broadcast %cst_164 : f32 to vector<32x1xf32>
    %331 = arith.divf %329, %330 : vector<32x1xf32>
    %332 = vector.broadcast %324 : vector<32x1xf32> to vector<32x32xf32>
    %333 = arith.subf %316, %332 : vector<32x32xf32>
    %cst_165 = arith.constant 9.99999974E-6 : f32
    %334 = vector.broadcast %cst_165 : f32 to vector<32x1xf32>
    %335 = arith.addf %331, %334 : vector<32x1xf32>
    %336 = math.rsqrt %335 : vector<32x1xf32>
    %337 = vector.broadcast %336 : vector<32x1xf32> to vector<32x32xf32>
    %338 = arith.mulf %333, %337 : vector<32x32xf32>
    %339 = vector.shape_cast %318 : vector<32xf32> to vector<1x32xf32>
    %340 = vector.broadcast %339 : vector<1x32xf32> to vector<32x32xf32>
    %341 = arith.mulf %338, %340 : vector<32x32xf32>
    %342 = vector.shape_cast %320 : vector<32xf32> to vector<1x32xf32>
    %343 = vector.broadcast %342 : vector<1x32xf32> to vector<32x32xf32>
    %344 = arith.addf %341, %343 : vector<32x32xf32>
    %345 = vector.extract_strided_slice %344 {offsets = [0, 0], sizes = [16, 32], strides = [1, 1]} : vector<32x32xf32> to vector<16x32xf32>
    %346 = vector.extract_strided_slice %344 {offsets = [16, 0], sizes = [16, 32], strides = [1, 1]} : vector<32x32xf32> to vector<16x32xf32>
    %c0_166 = arith.constant 0 : index
    %c0_167 = arith.constant 0 : index
    %347 = vector.load %arg11[%c0_166, %c0_167] : memref<16x32xf32, #tpu.memory_space<vmem>>, vector<16x32xf32>
    %348 = tpu.concatenate %347, %347 in 0 : vector<16x32xf32>, vector<16x32xf32> -> vector<32x32xf32>
    %cst_168 = arith.constant dense<0.000000e+00> : vector<16x32xf32>
    %349 = tpu.matmul %18, %348, %cst_168 {dimension_numbers = #tpu.dot_dimension_numbers<[1], [0], [0], [1], [0, 0, 1, 1], [], []>} : vector<16x32xf32>, vector<32x32xf32>, vector<16x32xf32> -> vector<16x32xf32>
    %cst_169 = arith.constant dense<0.000000e+00> : vector<16x32xf32>
    %350 = tpu.matmul %24, %348, %cst_169 {dimension_numbers = #tpu.dot_dimension_numbers<[1], [0], [0], [1], [0, 0, 1, 1], [], []>} : vector<16x32xf32>, vector<32x32xf32>, vector<16x32xf32> -> vector<16x32xf32>
    %c0_170 = arith.constant 0 : index
    %c0_171 = arith.constant 0 : index
    %351 = vector.load %arg10[%c0_170, %c0_171] : memref<32x32xf32, #tpu.memory_space<vmem>>, vector<32x32xf32>
    %cst_172 = arith.constant dense<0.000000e+00> : vector<16x32xf32>
    %352 = tpu.matmul %345, %351, %cst_172 {dimension_numbers = #tpu.dot_dimension_numbers<[1], [0], [0], [1], [0, 0, 1, 1], [], []>} : vector<16x32xf32>, vector<32x32xf32>, vector<16x32xf32> -> vector<16x32xf32>
    %c9 = arith.constant 9 : index
    %c0_173 = arith.constant 0 : index
    %353 = vector.load %arg18[%c9, %c0_173] : memref<20x32xf32, #tpu.memory_space<vmem>>, vector<1x32xf32>
    %354 = vector.shape_cast %353 : vector<1x32xf32> to vector<32xf32>
    %355 = vector.shape_cast %354 : vector<32xf32> to vector<1x32xf32>
    %356 = vector.broadcast %355 : vector<1x32xf32> to vector<16x32xf32>
    %357 = arith.addf %352, %356 : vector<16x32xf32>
    %358 = arith.addf %357, %349 : vector<16x32xf32>
    %c10 = arith.constant 10 : index
    %c0_174 = arith.constant 0 : index
    %359 = vector.load %arg18[%c10, %c0_174] : memref<20x32xf32, #tpu.memory_space<vmem>>, vector<1x32xf32>
    %360 = vector.shape_cast %359 : vector<1x32xf32> to vector<32xf32>
    %361 = vector.shape_cast %360 : vector<32xf32> to vector<1x32xf32>
    %362 = vector.broadcast %361 : vector<1x32xf32> to vector<16x32xf32>
    %363 = arith.addf %362, %350 : vector<16x32xf32>
    %364 = vector.extract_strided_slice %358 {offsets = [0, 0], sizes = [8, 32], strides = [1, 1]} : vector<16x32xf32> to vector<8x32xf32>
    %365 = vector.extract_strided_slice %363 {offsets = [0, 0], sizes = [8, 32], strides = [1, 1]} : vector<16x32xf32> to vector<8x32xf32>
    %366 = vector.extract_strided_slice %358 {offsets = [8, 0], sizes = [8, 32], strides = [1, 1]} : vector<16x32xf32> to vector<8x32xf32>
    %367 = vector.extract_strided_slice %363 {offsets = [8, 0], sizes = [8, 32], strides = [1, 1]} : vector<16x32xf32> to vector<8x32xf32>
    %368 = tpu.concatenate %364, %365, %366, %367 in 0 : vector<8x32xf32>, vector<8x32xf32>, vector<8x32xf32>, vector<8x32xf32> -> vector<32x32xf32>
    %c1_175 = arith.constant 1 : index
    %c0_176 = arith.constant 0 : index
    %369 = vector.load %arg19[%c1_175, %c0_176] : memref<2x128xf32, #tpu.memory_space<vmem>>, vector<1x128xf32>
    %370 = vector.shape_cast %369 : vector<1x128xf32> to vector<128xf32>
    %c11 = arith.constant 11 : index
    %c0_177 = arith.constant 0 : index
    %371 = vector.load %arg18[%c11, %c0_177] : memref<20x32xf32, #tpu.memory_space<vmem>>, vector<1x32xf32>
    %372 = vector.shape_cast %371 : vector<1x32xf32> to vector<32xf32>
    %c12 = arith.constant 12 : index
    %c0_178 = arith.constant 0 : index
    %373 = vector.load %arg18[%c12, %c0_178] : memref<20x32xf32, #tpu.memory_space<vmem>>, vector<1x32xf32>
    %374 = vector.shape_cast %373 : vector<1x32xf32> to vector<32xf32>
    %c13 = arith.constant 13 : index
    %c0_179 = arith.constant 0 : index
    %375 = vector.load %arg18[%c13, %c0_179] : memref<20x32xf32, #tpu.memory_space<vmem>>, vector<1x32xf32>
    %376 = vector.shape_cast %375 : vector<1x32xf32> to vector<32xf32>
    %c14 = arith.constant 14 : index
    %c0_180 = arith.constant 0 : index
    %377 = vector.load %arg18[%c14, %c0_180] : memref<20x32xf32, #tpu.memory_space<vmem>>, vector<1x32xf32>
    %378 = vector.shape_cast %377 : vector<1x32xf32> to vector<32xf32>
    %c15 = arith.constant 15 : index
    %c0_181 = arith.constant 0 : index
    %379 = vector.load %arg18[%c15, %c0_181] : memref<20x32xf32, #tpu.memory_space<vmem>>, vector<1x32xf32>
    %380 = vector.shape_cast %379 : vector<1x32xf32> to vector<32xf32>
    %c16 = arith.constant 16 : index
    %c0_182 = arith.constant 0 : index
    %381 = vector.load %arg18[%c16, %c0_182] : memref<20x32xf32, #tpu.memory_space<vmem>>, vector<1x32xf32>
    %382 = vector.shape_cast %381 : vector<1x32xf32> to vector<32xf32>
    %cst_183 = arith.constant dense<0.000000e+00> : vector<32xf32>
    %383 = vector.multi_reduction <add>, %368, %cst_183 [1] : vector<32x32xf32> to vector<32xf32>
    %384 = vector.shape_cast %383 : vector<32xf32> to vector<32x1xf32>
    %cst_184 = arith.constant 3.200000e+01 : f32
    %385 = vector.broadcast %cst_184 : f32 to vector<32x1xf32>
    %386 = arith.divf %384, %385 : vector<32x1xf32>
    %387 = vector.broadcast %386 : vector<32x1xf32> to vector<32x32xf32>
    %388 = arith.subf %368, %387 : vector<32x32xf32>
    %389 = arith.mulf %388, %388 : vector<32x32xf32>
    %cst_185 = arith.constant dense<0.000000e+00> : vector<32xf32>
    %390 = vector.multi_reduction <add>, %389, %cst_185 [1] : vector<32x32xf32> to vector<32xf32>
    %391 = vector.shape_cast %390 : vector<32xf32> to vector<32x1xf32>
    %cst_186 = arith.constant 3.200000e+01 : f32
    %392 = vector.broadcast %cst_186 : f32 to vector<32x1xf32>
    %393 = arith.divf %391, %392 : vector<32x1xf32>
    %394 = vector.broadcast %386 : vector<32x1xf32> to vector<32x32xf32>
    %395 = arith.subf %368, %394 : vector<32x32xf32>
    %cst_187 = arith.constant 9.99999974E-6 : f32
    %396 = vector.broadcast %cst_187 : f32 to vector<32x1xf32>
    %397 = arith.addf %393, %396 : vector<32x1xf32>
    %398 = math.rsqrt %397 : vector<32x1xf32>
    %399 = vector.broadcast %398 : vector<32x1xf32> to vector<32x32xf32>
    %400 = arith.mulf %395, %399 : vector<32x32xf32>
    %401 = vector.shape_cast %372 : vector<32xf32> to vector<1x32xf32>
    %402 = vector.broadcast %401 : vector<1x32xf32> to vector<32x32xf32>
    %403 = arith.mulf %400, %402 : vector<32x32xf32>
    %404 = vector.shape_cast %374 : vector<32xf32> to vector<1x32xf32>
    %405 = vector.broadcast %404 : vector<1x32xf32> to vector<32x32xf32>
    %406 = arith.addf %403, %405 : vector<32x32xf32>
    %c0_188 = arith.constant 0 : index
    %c0_189 = arith.constant 0 : index
    %c0_190 = arith.constant 0 : index
    %407 = vector.load %arg12[%c0_188, %c0_189, %c0_190] : memref<6x32x16xf32, #tpu.memory_space<vmem>>, vector<1x32x16xf32>
    %408 = vector.shape_cast %407 : vector<1x32x16xf32> to vector<32x16xf32>
    %cst_191 = arith.constant dense<0.000000e+00> : vector<32x16xf32>
    %409 = tpu.matmul %406, %408, %cst_191 {dimension_numbers = #tpu.dot_dimension_numbers<[1], [0], [0], [1], [0, 0, 1, 1], [], []>} : vector<32x32xf32>, vector<32x16xf32>, vector<32x16xf32> -> vector<32x16xf32>
    %c0_192 = arith.constant 0 : index
    %c0_193 = arith.constant 0 : index
    %c0_194 = arith.constant 0 : index
    %410 = vector.load %arg13[%c0_192, %c0_193, %c0_194] : memref<6x1x16xf32, #tpu.memory_space<vmem>>, vector<1x1x16xf32>
    %411 = vector.shape_cast %410 : vector<1x1x16xf32> to vector<1x16xf32>
    %412 = vector.broadcast %411 : vector<1x16xf32> to vector<32x16xf32>
    %413 = arith.addf %409, %412 : vector<32x16xf32>
    %c2_195 = arith.constant 2 : index
    %c0_196 = arith.constant 0 : index
    %c0_197 = arith.constant 0 : index
    %414 = vector.load %arg12[%c2_195, %c0_196, %c0_197] : memref<6x32x16xf32, #tpu.memory_space<vmem>>, vector<1x32x16xf32>
    %415 = vector.shape_cast %414 : vector<1x32x16xf32> to vector<32x16xf32>
    %cst_198 = arith.constant dense<0.000000e+00> : vector<32x16xf32>
    %416 = tpu.matmul %406, %415, %cst_198 {dimension_numbers = #tpu.dot_dimension_numbers<[1], [0], [0], [1], [0, 0, 1, 1], [], []>} : vector<32x32xf32>, vector<32x16xf32>, vector<32x16xf32> -> vector<32x16xf32>
    %c2_199 = arith.constant 2 : index
    %c0_200 = arith.constant 0 : index
    %c0_201 = arith.constant 0 : index
    %417 = vector.load %arg13[%c2_199, %c0_200, %c0_201] : memref<6x1x16xf32, #tpu.memory_space<vmem>>, vector<1x1x16xf32>
    %418 = vector.shape_cast %417 : vector<1x1x16xf32> to vector<1x16xf32>
    %419 = vector.broadcast %418 : vector<1x16xf32> to vector<32x16xf32>
    %420 = arith.addf %416, %419 : vector<32x16xf32>
    %c4_202 = arith.constant 4 : index
    %c0_203 = arith.constant 0 : index
    %c0_204 = arith.constant 0 : index
    %421 = vector.load %arg12[%c4_202, %c0_203, %c0_204] : memref<6x32x16xf32, #tpu.memory_space<vmem>>, vector<1x32x16xf32>
    %422 = vector.shape_cast %421 : vector<1x32x16xf32> to vector<32x16xf32>
    %cst_205 = arith.constant dense<0.000000e+00> : vector<32x16xf32>
    %423 = tpu.matmul %406, %422, %cst_205 {dimension_numbers = #tpu.dot_dimension_numbers<[1], [0], [0], [1], [0, 0, 1, 1], [], []>} : vector<32x32xf32>, vector<32x16xf32>, vector<32x16xf32> -> vector<32x16xf32>
    %c4_206 = arith.constant 4 : index
    %c0_207 = arith.constant 0 : index
    %c0_208 = arith.constant 0 : index
    %424 = vector.load %arg13[%c4_206, %c0_207, %c0_208] : memref<6x1x16xf32, #tpu.memory_space<vmem>>, vector<1x1x16xf32>
    %425 = vector.shape_cast %424 : vector<1x1x16xf32> to vector<1x16xf32>
    %426 = vector.broadcast %425 : vector<1x16xf32> to vector<32x16xf32>
    %427 = arith.addf %423, %426 : vector<32x16xf32>
    %c1_209 = arith.constant 1 : index
    %c0_210 = arith.constant 0 : index
    %c0_211 = arith.constant 0 : index
    %428 = vector.load %arg12[%c1_209, %c0_210, %c0_211] : memref<6x32x16xf32, #tpu.memory_space<vmem>>, vector<1x32x16xf32>
    %429 = vector.shape_cast %428 : vector<1x32x16xf32> to vector<32x16xf32>
    %cst_212 = arith.constant dense<0.000000e+00> : vector<32x16xf32>
    %430 = tpu.matmul %406, %429, %cst_212 {dimension_numbers = #tpu.dot_dimension_numbers<[1], [0], [0], [1], [0, 0, 1, 1], [], []>} : vector<32x32xf32>, vector<32x16xf32>, vector<32x16xf32> -> vector<32x16xf32>
    %c1_213 = arith.constant 1 : index
    %c0_214 = arith.constant 0 : index
    %c0_215 = arith.constant 0 : index
    %431 = vector.load %arg13[%c1_213, %c0_214, %c0_215] : memref<6x1x16xf32, #tpu.memory_space<vmem>>, vector<1x1x16xf32>
    %432 = vector.shape_cast %431 : vector<1x1x16xf32> to vector<1x16xf32>
    %433 = vector.broadcast %432 : vector<1x16xf32> to vector<32x16xf32>
    %434 = arith.addf %430, %433 : vector<32x16xf32>
    %c3_216 = arith.constant 3 : index
    %c0_217 = arith.constant 0 : index
    %c0_218 = arith.constant 0 : index
    %435 = vector.load %arg12[%c3_216, %c0_217, %c0_218] : memref<6x32x16xf32, #tpu.memory_space<vmem>>, vector<1x32x16xf32>
    %436 = vector.shape_cast %435 : vector<1x32x16xf32> to vector<32x16xf32>
    %cst_219 = arith.constant dense<0.000000e+00> : vector<32x16xf32>
    %437 = tpu.matmul %406, %436, %cst_219 {dimension_numbers = #tpu.dot_dimension_numbers<[1], [0], [0], [1], [0, 0, 1, 1], [], []>} : vector<32x32xf32>, vector<32x16xf32>, vector<32x16xf32> -> vector<32x16xf32>
    %c3_220 = arith.constant 3 : index
    %c0_221 = arith.constant 0 : index
    %c0_222 = arith.constant 0 : index
    %438 = vector.load %arg13[%c3_220, %c0_221, %c0_222] : memref<6x1x16xf32, #tpu.memory_space<vmem>>, vector<1x1x16xf32>
    %439 = vector.shape_cast %438 : vector<1x1x16xf32> to vector<1x16xf32>
    %440 = vector.broadcast %439 : vector<1x16xf32> to vector<32x16xf32>
    %441 = arith.addf %437, %440 : vector<32x16xf32>
    %c5_223 = arith.constant 5 : index
    %c0_224 = arith.constant 0 : index
    %c0_225 = arith.constant 0 : index
    %442 = vector.load %arg12[%c5_223, %c0_224, %c0_225] : memref<6x32x16xf32, #tpu.memory_space<vmem>>, vector<1x32x16xf32>
    %443 = vector.shape_cast %442 : vector<1x32x16xf32> to vector<32x16xf32>
    %cst_226 = arith.constant dense<0.000000e+00> : vector<32x16xf32>
    %444 = tpu.matmul %406, %443, %cst_226 {dimension_numbers = #tpu.dot_dimension_numbers<[1], [0], [0], [1], [0, 0, 1, 1], [], []>} : vector<32x32xf32>, vector<32x16xf32>, vector<32x16xf32> -> vector<32x16xf32>
    %c5_227 = arith.constant 5 : index
    %c0_228 = arith.constant 0 : index
    %c0_229 = arith.constant 0 : index
    %445 = vector.load %arg13[%c5_227, %c0_228, %c0_229] : memref<6x1x16xf32, #tpu.memory_space<vmem>>, vector<1x1x16xf32>
    %446 = vector.shape_cast %445 : vector<1x1x16xf32> to vector<1x16xf32>
    %447 = vector.broadcast %446 : vector<1x16xf32> to vector<32x16xf32>
    %448 = arith.addf %444, %447 : vector<32x16xf32>
    %449 = vector.extract_strided_slice %413 {offsets = [0, 0], sizes = [16, 16], strides = [1, 1]} : vector<32x16xf32> to vector<16x16xf32>
    %450 = vector.extract_strided_slice %420 {offsets = [0, 0], sizes = [16, 16], strides = [1, 1]} : vector<32x16xf32> to vector<16x16xf32>
    %451 = vector.extract_strided_slice %427 {offsets = [0, 0], sizes = [16, 16], strides = [1, 1]} : vector<32x16xf32> to vector<16x16xf32>
    %cst_230 = arith.constant dense<0.000000e+00> : vector<16x16xf32>
    %452 = tpu.matmul %449, %450, %cst_230 {dimension_numbers = #tpu.dot_dimension_numbers<[1], [1], [0], [0], [0, 0, 1, 0], [], []>} : vector<16x16xf32>, vector<16x16xf32>, vector<16x16xf32> -> vector<16x16xf32>
    %cst_231 = arith.constant 2.500000e-01 : f32
    %453 = vector.broadcast %cst_231 : f32 to vector<16x16xf32>
    %454 = arith.mulf %452, %453 : vector<16x16xf32>
    %cst_232 = arith.constant dense<0xFF800000> : vector<16xf32>
    %455 = vector.multi_reduction <maximumf>, %454, %cst_232 [1] : vector<16x16xf32> to vector<16xf32>
    %456 = vector.shape_cast %455 : vector<16xf32> to vector<16x1xf32>
    %457 = vector.broadcast %456 : vector<16x1xf32> to vector<16x16xf32>
    %458 = arith.subf %454, %457 : vector<16x16xf32>
    %459 = math.exp %458 : vector<16x16xf32>
    %cst_233 = arith.constant dense<0.000000e+00> : vector<16xf32>
    %460 = vector.multi_reduction <add>, %459, %cst_233 [1] : vector<16x16xf32> to vector<16xf32>
    %461 = vector.shape_cast %460 : vector<16xf32> to vector<16x1xf32>
    %462 = vector.broadcast %461 : vector<16x1xf32> to vector<16x16xf32>
    %463 = arith.divf %459, %462 : vector<16x16xf32>
    %cst_234 = arith.constant dense<0.000000e+00> : vector<16x16xf32>
    %464 = tpu.matmul %463, %451, %cst_234 {dimension_numbers = #tpu.dot_dimension_numbers<[1], [0], [0], [1], [0, 0, 1, 1], [], []>} : vector<16x16xf32>, vector<16x16xf32>, vector<16x16xf32> -> vector<16x16xf32>
    %c0_235 = arith.constant 0 : index
    %c0_236 = arith.constant 0 : index
    %c0_237 = arith.constant 0 : index
    %465 = vector.load %arg14[%c0_235, %c0_236, %c0_237] : memref<2x16x32xf32, #tpu.memory_space<vmem>>, vector<1x16x32xf32>
    %466 = vector.shape_cast %465 : vector<1x16x32xf32> to vector<16x32xf32>
    %cst_238 = arith.constant dense<0.000000e+00> : vector<16x32xf32>
    %467 = tpu.matmul %464, %466, %cst_238 {dimension_numbers = #tpu.dot_dimension_numbers<[1], [0], [0], [1], [0, 0, 1, 1], [], []>} : vector<16x16xf32>, vector<16x32xf32>, vector<16x32xf32> -> vector<16x32xf32>
    %468 = vector.extract_strided_slice %434 {offsets = [0, 0], sizes = [16, 16], strides = [1, 1]} : vector<32x16xf32> to vector<16x16xf32>
    %469 = vector.extract_strided_slice %441 {offsets = [0, 0], sizes = [16, 16], strides = [1, 1]} : vector<32x16xf32> to vector<16x16xf32>
    %470 = vector.extract_strided_slice %448 {offsets = [0, 0], sizes = [16, 16], strides = [1, 1]} : vector<32x16xf32> to vector<16x16xf32>
    %cst_239 = arith.constant dense<0.000000e+00> : vector<16x16xf32>
    %471 = tpu.matmul %468, %469, %cst_239 {dimension_numbers = #tpu.dot_dimension_numbers<[1], [1], [0], [0], [0, 0, 1, 0], [], []>} : vector<16x16xf32>, vector<16x16xf32>, vector<16x16xf32> -> vector<16x16xf32>
    %cst_240 = arith.constant 2.500000e-01 : f32
    %472 = vector.broadcast %cst_240 : f32 to vector<16x16xf32>
    %473 = arith.mulf %471, %472 : vector<16x16xf32>
    %cst_241 = arith.constant dense<0xFF800000> : vector<16xf32>
    %474 = vector.multi_reduction <maximumf>, %473, %cst_241 [1] : vector<16x16xf32> to vector<16xf32>
    %475 = vector.shape_cast %474 : vector<16xf32> to vector<16x1xf32>
    %476 = vector.broadcast %475 : vector<16x1xf32> to vector<16x16xf32>
    %477 = arith.subf %473, %476 : vector<16x16xf32>
    %478 = math.exp %477 : vector<16x16xf32>
    %cst_242 = arith.constant dense<0.000000e+00> : vector<16xf32>
    %479 = vector.multi_reduction <add>, %478, %cst_242 [1] : vector<16x16xf32> to vector<16xf32>
    %480 = vector.shape_cast %479 : vector<16xf32> to vector<16x1xf32>
    %481 = vector.broadcast %480 : vector<16x1xf32> to vector<16x16xf32>
    %482 = arith.divf %478, %481 : vector<16x16xf32>
    %cst_243 = arith.constant dense<0.000000e+00> : vector<16x16xf32>
    %483 = tpu.matmul %482, %470, %cst_243 {dimension_numbers = #tpu.dot_dimension_numbers<[1], [0], [0], [1], [0, 0, 1, 1], [], []>} : vector<16x16xf32>, vector<16x16xf32>, vector<16x16xf32> -> vector<16x16xf32>
    %c1_244 = arith.constant 1 : index
    %c0_245 = arith.constant 0 : index
    %c0_246 = arith.constant 0 : index
    %484 = vector.load %arg14[%c1_244, %c0_245, %c0_246] : memref<2x16x32xf32, #tpu.memory_space<vmem>>, vector<1x16x32xf32>
    %485 = vector.shape_cast %484 : vector<1x16x32xf32> to vector<16x32xf32>
    %cst_247 = arith.constant dense<0.000000e+00> : vector<16x32xf32>
    %486 = tpu.matmul %483, %485, %cst_247 {dimension_numbers = #tpu.dot_dimension_numbers<[1], [0], [0], [1], [0, 0, 1, 1], [], []>} : vector<16x16xf32>, vector<16x32xf32>, vector<16x32xf32> -> vector<16x32xf32>
    %487 = arith.addf %467, %486 : vector<16x32xf32>
    %488 = vector.extract_strided_slice %413 {offsets = [16, 0], sizes = [16, 16], strides = [1, 1]} : vector<32x16xf32> to vector<16x16xf32>
    %489 = vector.extract_strided_slice %420 {offsets = [16, 0], sizes = [16, 16], strides = [1, 1]} : vector<32x16xf32> to vector<16x16xf32>
    %490 = vector.extract_strided_slice %427 {offsets = [16, 0], sizes = [16, 16], strides = [1, 1]} : vector<32x16xf32> to vector<16x16xf32>
    %cst_248 = arith.constant dense<0.000000e+00> : vector<16x16xf32>
    %491 = tpu.matmul %488, %489, %cst_248 {dimension_numbers = #tpu.dot_dimension_numbers<[1], [1], [0], [0], [0, 0, 1, 0], [], []>} : vector<16x16xf32>, vector<16x16xf32>, vector<16x16xf32> -> vector<16x16xf32>
    %cst_249 = arith.constant 2.500000e-01 : f32
    %492 = vector.broadcast %cst_249 : f32 to vector<16x16xf32>
    %493 = arith.mulf %491, %492 : vector<16x16xf32>
    %cst_250 = arith.constant dense<0xFF800000> : vector<16xf32>
    %494 = vector.multi_reduction <maximumf>, %493, %cst_250 [1] : vector<16x16xf32> to vector<16xf32>
    %495 = vector.shape_cast %494 : vector<16xf32> to vector<16x1xf32>
    %496 = vector.broadcast %495 : vector<16x1xf32> to vector<16x16xf32>
    %497 = arith.subf %493, %496 : vector<16x16xf32>
    %498 = math.exp %497 : vector<16x16xf32>
    %cst_251 = arith.constant dense<0.000000e+00> : vector<16xf32>
    %499 = vector.multi_reduction <add>, %498, %cst_251 [1] : vector<16x16xf32> to vector<16xf32>
    %500 = vector.shape_cast %499 : vector<16xf32> to vector<16x1xf32>
    %501 = vector.broadcast %500 : vector<16x1xf32> to vector<16x16xf32>
    %502 = arith.divf %498, %501 : vector<16x16xf32>
    %cst_252 = arith.constant dense<0.000000e+00> : vector<16x16xf32>
    %503 = tpu.matmul %502, %490, %cst_252 {dimension_numbers = #tpu.dot_dimension_numbers<[1], [0], [0], [1], [0, 0, 1, 1], [], []>} : vector<16x16xf32>, vector<16x16xf32>, vector<16x16xf32> -> vector<16x16xf32>
    %c0_253 = arith.constant 0 : index
    %c0_254 = arith.constant 0 : index
    %c0_255 = arith.constant 0 : index
    %504 = vector.load %arg14[%c0_253, %c0_254, %c0_255] : memref<2x16x32xf32, #tpu.memory_space<vmem>>, vector<1x16x32xf32>
    %505 = vector.shape_cast %504 : vector<1x16x32xf32> to vector<16x32xf32>
    %cst_256 = arith.constant dense<0.000000e+00> : vector<16x32xf32>
    %506 = tpu.matmul %503, %505, %cst_256 {dimension_numbers = #tpu.dot_dimension_numbers<[1], [0], [0], [1], [0, 0, 1, 1], [], []>} : vector<16x16xf32>, vector<16x32xf32>, vector<16x32xf32> -> vector<16x32xf32>
    %507 = vector.extract_strided_slice %434 {offsets = [16, 0], sizes = [16, 16], strides = [1, 1]} : vector<32x16xf32> to vector<16x16xf32>
    %508 = vector.extract_strided_slice %441 {offsets = [16, 0], sizes = [16, 16], strides = [1, 1]} : vector<32x16xf32> to vector<16x16xf32>
    %509 = vector.extract_strided_slice %448 {offsets = [16, 0], sizes = [16, 16], strides = [1, 1]} : vector<32x16xf32> to vector<16x16xf32>
    %cst_257 = arith.constant dense<0.000000e+00> : vector<16x16xf32>
    %510 = tpu.matmul %507, %508, %cst_257 {dimension_numbers = #tpu.dot_dimension_numbers<[1], [1], [0], [0], [0, 0, 1, 0], [], []>} : vector<16x16xf32>, vector<16x16xf32>, vector<16x16xf32> -> vector<16x16xf32>
    %cst_258 = arith.constant 2.500000e-01 : f32
    %511 = vector.broadcast %cst_258 : f32 to vector<16x16xf32>
    %512 = arith.mulf %510, %511 : vector<16x16xf32>
    %cst_259 = arith.constant dense<0xFF800000> : vector<16xf32>
    %513 = vector.multi_reduction <maximumf>, %512, %cst_259 [1] : vector<16x16xf32> to vector<16xf32>
    %514 = vector.shape_cast %513 : vector<16xf32> to vector<16x1xf32>
    %515 = vector.broadcast %514 : vector<16x1xf32> to vector<16x16xf32>
    %516 = arith.subf %512, %515 : vector<16x16xf32>
    %517 = math.exp %516 : vector<16x16xf32>
    %cst_260 = arith.constant dense<0.000000e+00> : vector<16xf32>
    %518 = vector.multi_reduction <add>, %517, %cst_260 [1] : vector<16x16xf32> to vector<16xf32>
    %519 = vector.shape_cast %518 : vector<16xf32> to vector<16x1xf32>
    %520 = vector.broadcast %519 : vector<16x1xf32> to vector<16x16xf32>
    %521 = arith.divf %517, %520 : vector<16x16xf32>
    %cst_261 = arith.constant dense<0.000000e+00> : vector<16x16xf32>
    %522 = tpu.matmul %521, %509, %cst_261 {dimension_numbers = #tpu.dot_dimension_numbers<[1], [0], [0], [1], [0, 0, 1, 1], [], []>} : vector<16x16xf32>, vector<16x16xf32>, vector<16x16xf32> -> vector<16x16xf32>
    %c1_262 = arith.constant 1 : index
    %c0_263 = arith.constant 0 : index
    %c0_264 = arith.constant 0 : index
    %523 = vector.load %arg14[%c1_262, %c0_263, %c0_264] : memref<2x16x32xf32, #tpu.memory_space<vmem>>, vector<1x16x32xf32>
    %524 = vector.shape_cast %523 : vector<1x16x32xf32> to vector<16x32xf32>
    %cst_265 = arith.constant dense<0.000000e+00> : vector<16x32xf32>
    %525 = tpu.matmul %522, %524, %cst_265 {dimension_numbers = #tpu.dot_dimension_numbers<[1], [0], [0], [1], [0, 0, 1, 1], [], []>} : vector<16x16xf32>, vector<16x32xf32>, vector<16x32xf32> -> vector<16x32xf32>
    %526 = arith.addf %506, %525 : vector<16x32xf32>
    %527 = tpu.concatenate %487, %526 in 0 : vector<16x32xf32>, vector<16x32xf32> -> vector<32x32xf32>
    %528 = arith.addf %368, %527 : vector<32x32xf32>
    %529 = vector.shape_cast %376 : vector<32xf32> to vector<1x32xf32>
    %530 = vector.broadcast %529 : vector<1x32xf32> to vector<32x32xf32>
    %531 = arith.addf %528, %530 : vector<32x32xf32>
    %cst_266 = arith.constant dense<0.000000e+00> : vector<32xf32>
    %532 = vector.multi_reduction <add>, %531, %cst_266 [1] : vector<32x32xf32> to vector<32xf32>
    %533 = vector.shape_cast %532 : vector<32xf32> to vector<32x1xf32>
    %cst_267 = arith.constant 3.200000e+01 : f32
    %534 = vector.broadcast %cst_267 : f32 to vector<32x1xf32>
    %535 = arith.divf %533, %534 : vector<32x1xf32>
    %536 = vector.broadcast %535 : vector<32x1xf32> to vector<32x32xf32>
    %537 = arith.subf %531, %536 : vector<32x32xf32>
    %538 = arith.mulf %537, %537 : vector<32x32xf32>
    %cst_268 = arith.constant dense<0.000000e+00> : vector<32xf32>
    %539 = vector.multi_reduction <add>, %538, %cst_268 [1] : vector<32x32xf32> to vector<32xf32>
    %540 = vector.shape_cast %539 : vector<32xf32> to vector<32x1xf32>
    %cst_269 = arith.constant 3.200000e+01 : f32
    %541 = vector.broadcast %cst_269 : f32 to vector<32x1xf32>
    %542 = arith.divf %540, %541 : vector<32x1xf32>
    %543 = vector.broadcast %535 : vector<32x1xf32> to vector<32x32xf32>
    %544 = arith.subf %531, %543 : vector<32x32xf32>
    %cst_270 = arith.constant 9.99999974E-6 : f32
    %545 = vector.broadcast %cst_270 : f32 to vector<32x1xf32>
    %546 = arith.addf %542, %545 : vector<32x1xf32>
    %547 = math.rsqrt %546 : vector<32x1xf32>
    %548 = vector.broadcast %547 : vector<32x1xf32> to vector<32x32xf32>
    %549 = arith.mulf %544, %548 : vector<32x32xf32>
    %550 = vector.shape_cast %378 : vector<32xf32> to vector<1x32xf32>
    %551 = vector.broadcast %550 : vector<1x32xf32> to vector<32x32xf32>
    %552 = arith.mulf %549, %551 : vector<32x32xf32>
    %553 = vector.shape_cast %380 : vector<32xf32> to vector<1x32xf32>
    %554 = vector.broadcast %553 : vector<1x32xf32> to vector<32x32xf32>
    %555 = arith.addf %552, %554 : vector<32x32xf32>
    %c0_271 = arith.constant 0 : index
    %c0_272 = arith.constant 0 : index
    %556 = vector.load %arg15[%c0_271, %c0_272] : memref<32x128xf32, #tpu.memory_space<vmem>>, vector<32x128xf32>
    %cst_273 = arith.constant dense<0.000000e+00> : vector<32x128xf32>
    %557 = tpu.matmul %555, %556, %cst_273 {dimension_numbers = #tpu.dot_dimension_numbers<[1], [0], [0], [1], [0, 0, 1, 1], [], []>} : vector<32x32xf32>, vector<32x128xf32>, vector<32x128xf32> -> vector<32x128xf32>
    %558 = vector.shape_cast %370 : vector<128xf32> to vector<1x128xf32>
    %559 = vector.broadcast %558 : vector<1x128xf32> to vector<32x128xf32>
    %560 = arith.addf %557, %559 : vector<32x128xf32>
    %561 = arith.mulf %560, %560 : vector<32x128xf32>
    %562 = arith.mulf %560, %561 : vector<32x128xf32>
    %cst_274 = arith.constant 4.471500e-02 : f32
    %563 = vector.broadcast %cst_274 : f32 to vector<32x128xf32>
    %564 = arith.mulf %563, %562 : vector<32x128xf32>
    %565 = arith.addf %560, %564 : vector<32x128xf32>
    %cst_275 = arith.constant 0.797884583 : f32
    %566 = vector.broadcast %cst_275 : f32 to vector<32x128xf32>
    %567 = arith.mulf %566, %565 : vector<32x128xf32>
    %568 = math.tanh %567 : vector<32x128xf32>
    %cst_276 = arith.constant 1.000000e+00 : f32
    %569 = vector.broadcast %cst_276 : f32 to vector<32x128xf32>
    %570 = arith.addf %569, %568 : vector<32x128xf32>
    %cst_277 = arith.constant 5.000000e-01 : f32
    %571 = vector.broadcast %cst_277 : f32 to vector<32x128xf32>
    %572 = arith.mulf %571, %570 : vector<32x128xf32>
    %573 = arith.mulf %560, %572 : vector<32x128xf32>
    %c0_278 = arith.constant 0 : index
    %c0_279 = arith.constant 0 : index
    %574 = vector.load %arg16[%c0_278, %c0_279] : memref<128x32xf32, #tpu.memory_space<vmem>>, vector<128x32xf32>
    %cst_280 = arith.constant dense<0.000000e+00> : vector<32x32xf32>
    %575 = tpu.matmul %573, %574, %cst_280 {dimension_numbers = #tpu.dot_dimension_numbers<[1], [0], [0], [1], [0, 0, 1, 1], [], []>} : vector<32x128xf32>, vector<128x32xf32>, vector<32x32xf32> -> vector<32x32xf32>
    %576 = vector.shape_cast %382 : vector<32xf32> to vector<1x32xf32>
    %577 = vector.broadcast %576 : vector<1x32xf32> to vector<32x32xf32>
    %578 = arith.addf %575, %577 : vector<32x32xf32>
    %579 = arith.addf %531, %578 : vector<32x32xf32>
    %c17 = arith.constant 17 : index
    %c0_281 = arith.constant 0 : index
    %580 = vector.load %arg18[%c17, %c0_281] : memref<20x32xf32, #tpu.memory_space<vmem>>, vector<1x32xf32>
    %581 = vector.shape_cast %580 : vector<1x32xf32> to vector<32xf32>
    %c18 = arith.constant 18 : index
    %c0_282 = arith.constant 0 : index
    %582 = vector.load %arg18[%c18, %c0_282] : memref<20x32xf32, #tpu.memory_space<vmem>>, vector<1x32xf32>
    %583 = vector.shape_cast %582 : vector<1x32xf32> to vector<32xf32>
    %cst_283 = arith.constant dense<0.000000e+00> : vector<32xf32>
    %584 = vector.multi_reduction <add>, %579, %cst_283 [1] : vector<32x32xf32> to vector<32xf32>
    %585 = vector.shape_cast %584 : vector<32xf32> to vector<32x1xf32>
    %cst_284 = arith.constant 3.200000e+01 : f32
    %586 = vector.broadcast %cst_284 : f32 to vector<32x1xf32>
    %587 = arith.divf %585, %586 : vector<32x1xf32>
    %588 = vector.broadcast %587 : vector<32x1xf32> to vector<32x32xf32>
    %589 = arith.subf %579, %588 : vector<32x32xf32>
    %590 = arith.mulf %589, %589 : vector<32x32xf32>
    %cst_285 = arith.constant dense<0.000000e+00> : vector<32xf32>
    %591 = vector.multi_reduction <add>, %590, %cst_285 [1] : vector<32x32xf32> to vector<32xf32>
    %592 = vector.shape_cast %591 : vector<32xf32> to vector<32x1xf32>
    %cst_286 = arith.constant 3.200000e+01 : f32
    %593 = vector.broadcast %cst_286 : f32 to vector<32x1xf32>
    %594 = arith.divf %592, %593 : vector<32x1xf32>
    %595 = vector.broadcast %587 : vector<32x1xf32> to vector<32x32xf32>
    %596 = arith.subf %579, %595 : vector<32x32xf32>
    %cst_287 = arith.constant 9.99999974E-6 : f32
    %597 = vector.broadcast %cst_287 : f32 to vector<32x1xf32>
    %598 = arith.addf %594, %597 : vector<32x1xf32>
    %599 = math.rsqrt %598 : vector<32x1xf32>
    %600 = vector.broadcast %599 : vector<32x1xf32> to vector<32x32xf32>
    %601 = arith.mulf %596, %600 : vector<32x32xf32>
    %602 = vector.shape_cast %581 : vector<32xf32> to vector<1x32xf32>
    %603 = vector.broadcast %602 : vector<1x32xf32> to vector<32x32xf32>
    %604 = arith.mulf %601, %603 : vector<32x32xf32>
    %605 = vector.shape_cast %583 : vector<32xf32> to vector<1x32xf32>
    %606 = vector.broadcast %605 : vector<1x32xf32> to vector<32x32xf32>
    %607 = arith.addf %604, %606 : vector<32x32xf32>
    %608 = vector.extract_strided_slice %607 {offsets = [8, 0], sizes = [8, 32], strides = [1, 1]} : vector<32x32xf32> to vector<8x32xf32>
    %609 = vector.extract_strided_slice %607 {offsets = [24, 0], sizes = [8, 32], strides = [1, 1]} : vector<32x32xf32> to vector<8x32xf32>
    %610 = tpu.concatenate %608, %609 in 0 : vector<8x32xf32>, vector<8x32xf32> -> vector<16x32xf32>
    %c0_288 = arith.constant 0 : index
    %c0_289 = arith.constant 0 : index
    %611 = vector.load %arg17[%c0_288, %c0_289] : memref<32x32xf32, #tpu.memory_space<vmem>>, vector<32x32xf32>
    %cst_290 = arith.constant dense<0.000000e+00> : vector<16x32xf32>
    %612 = tpu.matmul %610, %611, %cst_290 {dimension_numbers = #tpu.dot_dimension_numbers<[1], [0], [0], [1], [0, 0, 1, 1], [], []>} : vector<16x32xf32>, vector<32x32xf32>, vector<16x32xf32> -> vector<16x32xf32>
    %c19 = arith.constant 19 : index
    %c0_291 = arith.constant 0 : index
    %613 = vector.load %arg18[%c19, %c0_291] : memref<20x32xf32, #tpu.memory_space<vmem>>, vector<1x32xf32>
    %614 = vector.shape_cast %613 : vector<1x32xf32> to vector<32xf32>
    %615 = vector.shape_cast %614 : vector<32xf32> to vector<1x32xf32>
    %616 = vector.broadcast %615 : vector<1x32xf32> to vector<16x32xf32>
    %617 = arith.addf %612, %616 : vector<16x32xf32>
    %c0_292 = arith.constant 0 : index
    %c0_293 = arith.constant 0 : index
    %618 = vector.load %arg20[%c0_292, %c0_293] : memref<16x32xf32, #tpu.memory_space<vmem>>, vector<16x32xf32>
    tpu.vector_store %arg20[%c0_292, %c0_293], %617 {strides = array<i32>} : memref<16x32xf32, #tpu.memory_space<vmem>>, vector<16x32xf32>,
    %c0_294 = arith.constant 0 : index
    %c0_295 = arith.constant 0 : index
    %619 = vector.load %arg21[%c0_294, %c0_295] : memref<16x32xf32, #tpu.memory_space<vmem>>, vector<16x32xf32>
    tpu.vector_store %arg21[%c0_294, %c0_295], %346 {strides = array<i32>} : memref<16x32xf32, #tpu.memory_space<vmem>>, vector<16x32xf32>,
    return
  }
}

</mosaic_0001>

<bundles_post_ra>
// kernel: ijepa_forward.1
= control target key start
LH: loop header
LB: loop body
LE: loop exit
PB: predicated region body
PF: predicated region fallthrough
CT: control target
= control target key end

     0   :  { %s4786_s0 = inlined_call_operand.vmem [shape: f32[32,64], index: 0, kind: input, shape index: {}]   ;;  %s4787_s1 = inlined_call_operand.vmem [shape: s32[16,1], index: 1, kind: input, shape index: {}]   ;;  %s4788_s2 = inlined_call_operand.vmem [shape: s32[16,1], index: 2, kind: input, shape index: {}]   ;;  %s4789_s3 = inlined_call_operand.vmem [shape: f32[64,32], index: 3, kind: input, shape index: {}]   ;;  %s4790_s4 = inlined_call_operand.vmem [shape: f32[16,32], index: 4, kind: input, shape index: {}]   ;;  %s4791_s5 = inlined_call_operand.vmem [shape: f32[6,32,16], index: 5, kind: input, shape index: {}]   ;;  %s4792_s6 = inlined_call_operand.vmem [shape: f32[6,1,16], index: 6, kind: input, shape index: {}]   ;;  %s4793_s7 = inlined_call_operand.vmem [shape: f32[2,16,32], index: 7, kind: input, shape index: {}]   ;;  %s4794_s8 = inlined_call_operand.vmem [shape: f32[32,128], index: 8, kind: input, shape index: {}]   ;;  %s4795_s9 = inlined_call_operand.vmem [shape: f32[128,32], index: 9, kind: input, shape index: {}]   ;;  %s4796_s10 = inlined_call_operand.vmem [shape: f32[32,32], index: 10, kind: input, shape index: {}]   ;;  %s4797_s11 = inlined_call_operand.vmem [shape: f32[16,32], index: 11, kind: input, shape index: {}]   ;;  %s4798_s12 = inlined_call_operand.vmem [shape: f32[6,32,16], index: 12, kind: input, shape index: {}]   ;;  %s4799_s13 = inlined_call_operand.vmem [shape: f32[6,1,16], index: 13, kind: input, shape index: {}]   ;;  %s4800_s14 = inlined_call_operand.vmem [shape: f32[2,16,32], index: 14, kind: input, shape index: {}]   ;;  %s4801_s15 = inlined_call_operand.vmem [shape: f32[32,128], index: 15, kind: input, shape index: {}]   ;;  %s4802_s16 = inlined_call_operand.vmem [shape: f32[128,32], index: 16, kind: input, shape index: {}]   ;;  %s4803_s17 = inlined_call_operand.vmem [shape: f32[32,32], index: 17, kind: input, shape index: {}]   ;;  %s4804_s18 = inlined_call_operand.vmem [shape: f32[20,32], index: 18, kind: input, shape index: {}]   ;;  %s4805_s19 = inlined_call_operand.vmem [shape: f32[2,128], index: 19, kind: input, shape index: {}]   ;;  %s4806_s20 = inlined_call_operand.hbm [shape: f32[16,32], index: 20, kind: output, shape index: {0}]   ;;  %s4807_s21 = inlined_call_operand.hbm [shape: f32[16,32], index: 21, kind: output, shape index: {1}]  }
   0x1   :  { %4814 = sst [smem:[#allocation8_spill]] %s4786_s0 }
   0x2   :  { %4815 = sst [smem:[#allocation9_spill]] %s4787_s1 }
   0x3   :  { %4816 = sst [smem:[#allocation10_spill]] %s4788_s2 }
   0x4   :  { %4817 = sst [smem:[#allocation11_spill]] %s4789_s3 }
   0x5   :  { %4818 = sst [smem:[#allocation12_spill]] %s4790_s4 }
   0x6   :  { %4819 = sst [smem:[#allocation13_spill]] %s4791_s5 }
   0x7   :  { %27 = vsyncpa [#allocation3], 0  ;;  %s4820_s26 = sld [smem:[#allocation11_spill]]  ;;  %vm83_vm0 = vcmask 523264   ;;  %v3489_v9 = vmov 0  }
   0x8   :  { %s4821_s2 = sld [smem:[#allocation9_spill]]  ;;  %3272 = vset.pattern.permute.xlu0 %v3489_v9  ;;  %3273 = vset.pattern.permute.xlu1 %v3489_v9 }
   0x9   :  { %s4822_s3 = sld [smem:[#allocation10_spill]] }
   0xa   :  { %s4823_s22 = sld [smem:[#allocation8_spill]] }
   0xd   :  { %v80_v0 = vld [vmem:[%s4820_s26 + $0x38] sm:$0xff]  ;;  %v79_v1 = vld [vmem:[%s4820_s26 + $0x30] sm:$0xff]  ;;  %v78_v2 = vld [vmem:[%s4820_s26 + $0x28] sm:$0xff] }
   0xe   :  { %104 = vmatpush.msra.mxu0 %v80_v0  ;;  %v77_v3 = vld [vmem:[%s4820_s26 + $0x20] sm:$0xff]  ;;  %v76_v4 = vld [vmem:[%s4820_s26 + $0x18] sm:$0xff]  ;;  %v75_v5 = vld [vmem:[%s4820_s26 + $0x10] sm:$0xff] }
   0xf   :  { %v133_v6 = vld [vmem:[%s4821_s2] sm:$0xff]  ;;  %v74_v8 = vld [vmem:[%s4820_s26 + $0x8] sm:$0xff] }
  0x10   :  { %105 = vmatpush.msra.mxu0 %v79_v1  ;;  %v145_v7 = vld [vmem:[%s4822_s3] sm:$0xff]  ;;  %136 = vperm.xlu0 %3272, %v133_v6   ;;  %v134_v12 = vld [vmem:[%s4821_s2 + $0x8] sm:$0xff] }
  0x11   :  { %v73_v10 = vld [vmem:[%s4820_s26] sm:$0xff]  ;;  %148 = vperm.xlu1 %3273, %v145_v7  }
  0x12   :  { %106 = vmatpush.msra.mxu0 %v78_v2  ;;  %v69_v11 = vld [vmem:[%s4823_s22] sm:$0xff] }
  0x14   :  { %107 = vmatpush.msra.mxu0 %v77_v3 }
  0x16   :  { %108 = vmatpush.msra.mxu0 %v76_v4 }
  0x18   :  { %109 = vmatpush.msra.mxu0 %v75_v5 }
  0x1a   :  { %110 = vmatpush.msra.mxu0 %v74_v8 }
  0x1c   :  { %111 = vmatpush.msra.mxu0 %v73_v10 }
  0x1d   :  { %3071 = vmatmul.msk.f32.vlgmr.msra.gmra.mxu0 %vm83_vm0, %v69_v11 }
  0x1e   :  { %28 = vsyncpa [#allocation5], 0  ;;  %139 = vperm.xlu0 %3272, %v134_v12   ;;  %v70_v13 = vld [vmem:[%s4823_s22 + $0x8] sm:$0xff]  ;;  %v71_v14 = vld [vmem:[%s4823_s22 + $0x10] sm:$0xff]  ;;  %v131_v20 = vlaneseq  ;;  %s4824_s23 = sld [smem:[#allocation12_spill]]  ;;  %v3490_v35 = vmov 0.0  }
  0x1f   :  { %v72_v15 = vld [vmem:[%s4823_s22 + $0x18] sm:$0xff]  ;;  %v146_v16 = vld [vmem:[%s4822_s3 + $0x8] sm:$0xff]  ;;  %v3274_v21 = vld [vmem:[%s4804_s18] ss:$0 sm:$0xff]  ;;  %vm157_vm3 = vcmask 261120   ;;  %v3491_v49 = vmov 32.0  }
  0x20   :  { %151 = vperm.xlu1 %3273, %v146_v16   ;;  %v132_v25 = vand.u32 127, %v131_v20  ;;  %3308 = vrcp.f32 %v3491_v49  ;;  %s4825_s25 = sld [smem:[#allocation13_spill]]  ;;  %v3781_v49 = vld [vmem:[%s4804_s18 + $0x2] ss:$0 sm:$0xff]  ;;  %s3492_s5 = smov [#allocation4]  }
  0x24   :  { %v126_v26 = vld [vmem:[%s4824_s23 + $0x8] sm:$0xff]  ;;  %v125_v31 = vld [vmem:[%s4824_s23] sm:$0xff]  ;;  %s3054_s23 = sshll.u32 %s4807_s21, 4  ;;  %s3055_s23 = int_to_ptr.hbm [resolvable:$true] %s3054_s23 }
  0x25   :  { %3072 = vmatmul.msk.f32.gmra.mxu0 %vm83_vm0, %v70_v13 }
  0x26   :  { %v3309_v50 = vpop.eup %3308  ;;  %v331_v9 = vld [vmem:[%s4825_s25 + $0x18] sm:$0xff]  ;;  %v330_v12 = vld [vmem:[%s4825_s25 + $0x10] sm:$0xff]  ;;  %v3084_v16 = vld [vmem:[%s4825_s25 + $0x48] sm:$0xff] }
  0x27   :  { %v236_v51 = vmul.f32 32.0, %v3309_v50  ;;  %vm240_vm6 = vweird.f32 %v3309_v50  ;;  %v3086_v10 = vld [vmem:[%s4825_s25 + $0x58] sm:$0xff]  ;;  %v3085_v13 = vld [vmem:[%s4825_s25 + $0x50] sm:$0xff]  ;;  %3261 = vmatpush.msra.mxu3 %v331_v9  ;;  %v3110_v20 = vld [vmem:[%s4825_s25 + $0x60] sm:$0xff] }
  0x28   :  { %v3113_v11 = vld [vmem:[%s4825_s25 + $0x78] sm:$0xff] }
  0x29   :  { %v237_v52 = vsub.f32 1.0, %v236_v51  ;;  %516 = vmatpush.msrb.mxu0 %v3113_v11  ;;  %3262 = vmatpush.msra.mxu3 %v330_v12 }
  0x2b   :  { %v238_v53 = vmul.f32 %v3309_v50, %v237_v52  ;;  %v3093_v52 = vld [vmem:[%s4825_s25 + $0x88] sm:$0xff] }
  0x2d   :  { %3073 = vmatmul.msk.f32.gmra.mxu0 %vm83_vm0, %v71_v14  ;;  %v239_v54 = vadd.f32 %v3309_v50, %v238_v53  ;;  %v3112_v14 = vld [vmem:[%s4825_s25 + $0x70] sm:$0xff] }
  0x2e   :  { %517 = vmatpush.msrb.mxu0 %v3112_v14 }
  0x2f   :  { %v3695_v55 = vsel %vm240_vm6, %v3309_v50, %v239_v54 }
  0x35   :  { %3074 = vmatmul.msk.f32.gmra.mxu0 %vm83_vm0, %v72_v15  ;;  %v329_v15 = vld [vmem:[%s4825_s25 + $0x8] sm:$0xff] }
  0x36   :  { %3263 = vmatpush.msra.mxu3 %v329_v15 }
  0x82   :  { %v137_v28 = vpop.permute.xlu0 %136 }
  0x83   :  { %v149_v30 = vpop.permute.xlu1 %148  ;;  %vm141_vm1 = vcmp.eq.s32.totalorder %v137_v28, %v132_v25 }
  0x84   :  { %vm153_vm2 = vcmp.eq.s32.totalorder %v149_v30, %v132_v25  ;;  %v3667_v36 = vsel %vm141_vm1, 1.0, %v3490_v35 }
  0x85   :  { %v3669_v37 = vsel %vm153_vm2, 1.0, %v3490_v35 }
  0x90   :  { %v140_v39 = vpop.permute.xlu0 %139 }
  0x91   :  { %vm142_vm4 = vcmp.eq.s32.totalorder %v140_v39, %v132_v25 }
  0x92   :  { %v3675_v40 = vsel %vm142_vm4, 1.0, %v3490_v35  ;;  %v152_v41 = vpop.permute.xlu1 %151  ;;  %vm572_vm4 = vcmask 130048  }
  0x93   :  { %vm154_vm5 = vcmp.eq.s32.totalorder %v152_v41, %v132_v25  ;;  %v3770_v41 = vld [vmem:[%s4804_s18 + $0x1] ss:$0 sm:$0xff] }
  0x94   :  { %v3679_v42 = vsel %vm154_vm5, 1.0, %v3490_v35  ;;  %vm600_vm5 = vcmask 64512  }
  0x9a   :  { %v113_v17 = vpop.f32.mrf.mxu0 }
  0x9b   :  { %v114_v32 = vadd.f32 %v3274_v21, %v113_v17  ;;  %v3111_v17 = vld [vmem:[%s4825_s25 + $0x68] sm:$0xff] }
  0x9c   :  { %518 = vmatpush.msrb.mxu0 %v3111_v17  ;;  %v3122_v17 = vld [vmem:[%s4825_s25 + $0xb8] sm:$0xff] }
  0x9d   :  { %v127_v38 = vadd.f32 %v125_v31, %v114_v32 }
  0x9e   :  { %519 = vmatpush.msrb.mxu0 %v3110_v20 }
  0xa2   :  { %v116_v18 = vpop.f32.mrf.mxu0 }
  0xa3   :  { %v117_v27 = vadd.f32 %v3274_v21, %v116_v18  ;;  %v328_v18 = vld [vmem:[%s4825_s25] sm:$0xff] }
  0xa4   :  { %3264 = vmatpush.msra.mxu3 %v328_v18 }
  0xa5   :  { %v128_v34 = vadd.f32 %v126_v26, %v117_v27 }
  0xaa   :  { %v119_v19 = vpop.f32.mrf.mxu0 }
  0xab   :  { %v120_v23 = vadd.f32 %v3274_v21, %v119_v19  ;;  %v3083_v19 = vld [vmem:[%s4825_s25 + $0x40] sm:$0xff] }
  0xad   :  { %v129_v33 = vadd.f32 %v125_v31, %v120_v23 }
  0xb2   :  { %v122_v22 = vpop.f32.mrf.mxu0 }
  0xb3   :  { %v123_v24 = vadd.f32 %v3274_v21, %v122_v22 }
  0xb5   :  { %v130_v29 = vadd.f32 %v126_v26, %v123_v24 }
  0xb7   :  { %176 = vmatpush.msra.mxu1 %v130_v29  ;;  %205 = vmatpush.msra.mxu2 %v130_v29 }
  0xb9   :  { %177 = vmatpush.msra.mxu1 %v129_v33  ;;  %206 = vmatpush.msra.mxu2 %v129_v33 }
  0xbb   :  { %178 = vmatpush.msra.mxu1 %v128_v34  ;;  %207 = vmatpush.msra.mxu2 %v128_v34 }
  0xbd   :  { %179 = vmatpush.msra.mxu1 %v127_v38  ;;  %208 = vmatpush.msra.mxu2 %v127_v38 }
  0xbe   :  { %3075 = vmatmul.msk.f32.vlgmr.msra.gmra.mxu1 %vm157_vm3, %v3667_v36  ;;  %3077 = vmatmul.msk.f32.vlgmr.msra.gmra.mxu2 %vm157_vm3, %v3669_v37 }
  0xbf   :  { %360 = vmatpush.msrb.mxu2 %v331_v9  ;;  %399 = vmatpush.msrb.mxu1 %v3086_v10 }
  0xc1   :  { %361 = vmatpush.msrb.mxu2 %v330_v12  ;;  %400 = vmatpush.msrb.mxu1 %v3085_v13 }
  0xc3   :  { %362 = vmatpush.msrb.mxu2 %v329_v15  ;;  %401 = vmatpush.msrb.mxu1 %v3084_v16 }
  0xc5   :  { %363 = vmatpush.msrb.mxu2 %v328_v18  ;;  %402 = vmatpush.msrb.mxu1 %v3083_v19  ;;  %v3103_v18 = vld [vmem:[%s4825_s25 + $0x30] sm:$0xff] }
  0xc6   :  { %3076 = vmatmul.msk.f32.gmra.mxu1 %vm157_vm3, %v3675_v40  ;;  %3078 = vmatmul.msk.f32.gmra.mxu2 %vm157_vm3, %v3679_v42  ;;  %v3121_v19 = vld [vmem:[%s4825_s25 + $0xb0] sm:$0xff] }
  0xc7   :  { %555 = vmatpush.msra.mxu1 %v3122_v17 }
  0xc9   :  { %556 = vmatpush.msra.mxu1 %v3121_v19 }
 0x13b   :  { %v3683_v43 = vpop.f32.mrf.mxu1 }
 0x13c   :  { %v223_v44 = vsel %vm157_vm3, %v3683_v43, 0.0 }
 0x13d   :  { %224 = vadd.xlane.f32.xlu2 %v223_v44 }
 0x141   :  { %v3687_v45 = vpop.f32.mrf.mxu2 }
 0x142   :  { %v229_v46 = vsel %vm157_vm3, %v3687_v45, 0.0 }
 0x143   :  { %230 = vadd.xlane.f32.xlu1 %v229_v46  ;;  %v3691_v47 = vpop.f32.mrf.mxu1  ;;  %v3095_v46 = vld [vmem:[%s4825_s25 + $0x98] sm:$0xff] }
 0x144   :  { %v226_v48 = vsel %vm157_vm3, %v3691_v47, 0.0  ;;  %438 = vmatpush.msra.mxu2 %v3095_v46 }
 0x145   :  { %227 = vadd.xlane.f32.xlu0 %v226_v48  ;;  %v3094_v48 = vld [vmem:[%s4825_s25 + $0x90] sm:$0xff] }
 0x146   :  { %439 = vmatpush.msra.mxu2 %v3094_v48 }
 0x148   :  { %440 = vmatpush.msra.mxu2 %v3093_v52  ;;  %v3888_v52 = vld [vmem:[%s4793_s7 + $0x10] sm:$0xff] }
 0x149   :  { %v3705_v63 = vpop.f32.mrf.mxu2 }
 0x14a   :  { %v232_v1 = vsel %vm157_vm3, %v3705_v63, 0.0 }
 0x1b0   :  { %v225_v56 = vpop.xlane.xlu2 %224 }
 0x1b1   :  { %v242_v57 = vmul.f32 %v3695_v55, %v225_v56 }
 0x1b3   :  { %v3699_v58 = vsub.f32 %v3683_v43, %v242_v57 }
 0x1b5   :  { %v250_v59 = vmul.f32 %v3699_v58, %v3699_v58 }
 0x1b6   :  { %v231_v2 = vpop.xlane.xlu1 %230 }
 0x1b7   :  { %v254_v60 = vsel %vm157_vm3, %v250_v59, 0.0  ;;  %v244_v3 = vmul.f32 %v3695_v55, %v231_v2 }
 0x1b8   :  { %255 = vadd.xlane.f32.xlu2 %v254_v60  ;;  %v228_v61 = vpop.xlane.xlu0 %227 }
 0x1b9   :  { %v243_v62 = vmul.f32 %v3695_v55, %v228_v61  ;;  %v3716_v5 = vsub.f32 %v3687_v45, %v244_v3 }
 0x1bb   :  { %v3708_v0 = vsub.f32 %v3691_v47, %v243_v62  ;;  %v252_v7 = vmul.f32 %v3716_v5, %v3716_v5 }
 0x1bd   :  { %v251_v4 = vmul.f32 %v3708_v0, %v3708_v0  ;;  %v260_v8 = vsel %vm157_vm3, %v252_v7, 0.0 }
 0x1bf   :  { %v257_v6 = vsel %vm157_vm3, %v251_v4, 0.0 }
 0x1c0   :  { %233 = vadd.xlane.f32.xlu2 %v232_v1 }
 0x1c8   :  { %258 = vadd.xlane.f32.xlu2 %v257_v6 }
 0x1d0   :  { %261 = vadd.xlane.f32.xlu2 %v260_v8 }
 0x22b   :  { %v256_v21 = vpop.xlane.xlu2 %255 }
 0x22c   :  { %v266_v22 = vmul.f32 %v256_v21, %v3695_v55  ;;  %v3102_v21 = vld [vmem:[%s4825_s25 + $0x28] sm:$0xff] }
 0x22e   :  { %v270_v23 = vadd.f32 1e-05, %v266_v22  ;;  %v3120_v22 = vld [vmem:[%s4825_s25 + $0xa8] sm:$0xff] }
 0x22f   :  { %557 = vmatpush.msra.mxu1 %v3120_v22 }
 0x230   :  { %3310 = vrsqrt.f32 %v270_v23  ;;  %vm280_vm8 = vweird.f32 %v270_v23 }
 0x233   :  { %v234_v24 = vpop.xlane.xlu2 %233 }
 0x234   :  { %v245_v25 = vmul.f32 %v3695_v55, %v234_v24  ;;  %v3101_v24 = vld [vmem:[%s4825_s25 + $0x20] sm:$0xff] }
 0x236   :  { %v3311_v26 = vpop.eup %3310  ;;  %v3761_v27 = vsub.f32 %v3705_v63, %v245_v25  ;;  %v3119_v25 = vld [vmem:[%s4825_s25 + $0xa0] sm:$0xff] }
 0x237   :  { %v275_v28 = vmul.f32 %v3311_v26, %v270_v23  ;;  %vm281_vm7 = vweird.f32 %v3311_v26  ;;  %558 = vmatpush.msra.mxu1 %v3119_v25 }
 0x238   :  { %v253_v29 = vmul.f32 %v3761_v27, %v3761_v27  ;;  %vm282_vm9 = vmor %vm280_vm8, %vm281_vm7 }
 0x239   :  { %v276_v30 = vmul.f32 %v3311_v26, %v275_v28 }
 0x23a   :  { %v263_v31 = vsel %vm157_vm3, %v253_v29, 0.0 }
 0x23b   :  { %v277_v32 = vmul.f32 0.5, %v276_v30  ;;  %264 = vadd.xlane.f32.xlu2 %v263_v31  ;;  %v259_v33 = vpop.xlane.xlu2 %258 }
 0x23c   :  { %v267_v34 = vmul.f32 %v259_v33, %v3695_v55 }
 0x23d   :  { %v278_v35 = vsub.f32 1.5, %v277_v32 }
 0x23e   :  { %v271_v38 = vadd.f32 1e-05, %v267_v34  ;;  %v3857_v34 = vld [vmem:[%s4792_s6 + $0x2] ss:$0 sm:$0xff] }
 0x23f   :  { %v279_v39 = vmul.f32 %v3311_v26, %v278_v35 }
 0x240   :  { %3312 = vrsqrt.f32 %v271_v38  ;;  %vm290_vm11 = vweird.f32 %v271_v38 }
 0x241   :  { %v283_v44 = vsel %vm282_vm9, %v3311_v26, %v279_v39 }
 0x242   :  { %v314_v50 = vmul.f32 %v283_v44, %v3699_v58  ;;  %v3092_v58 = vld [vmem:[%s4825_s25 + $0x80] sm:$0xff] }
 0x243   :  { %v262_v51 = vpop.xlane.xlu2 %261  ;;  %441 = vmatpush.msra.mxu2 %v3092_v58 }
 0x244   :  { %v319_v53 = vmul.f32 %v3770_v41, %v314_v50  ;;  %v268_v54 = vmul.f32 %v262_v51, %v3695_v55 }
 0x246   :  { %v3313_v56 = vpop.eup %3312  ;;  %v3790_v57 = vadd.f32 %v3781_v49, %v319_v53  ;;  %v272_v59 = vadd.f32 1e-05, %v268_v54  ;;  %v3893_v53 = vld [vmem:[%s4792_s6 + $0x3] ss:$0 sm:$0xff] }
 0x247   :  { %v285_v60 = vmul.f32 %v3313_v56, %v271_v38  ;;  %vm291_vm10 = vweird.f32 %v3313_v56 }
 0x248   :  { %3314 = vrsqrt.f32 %v272_v59  ;;  %3079 = vmatmul.msk.f32.vlgmr.msrb.gmra.mxu2 %vm157_vm3, %v3790_v57  ;;  %3088 = vmatmul.msk.f32.vlgmr.msrb.gmra.mxu1 %vm157_vm3, %v3790_v57  ;;  %vm292_vm12 = vmor %vm290_vm11, %vm291_vm10  ;;  %vm300_vm14 = vweird.f32 %v272_v59 }
 0x249   :  { %v286_v61 = vmul.f32 %v3313_v56, %v285_v60  ;;  %3115 = vmatmul.msk.f32.vlgmr.msrb.gmra.mxu0 %vm157_vm3, %v3790_v57 }
 0x24b   :  { %v287_v62 = vmul.f32 0.5, %v286_v61 }
 0x24d   :  { %v288_v1 = vsub.f32 1.5, %v287_v62  ;;  %v3913_v62 = vld [vmem:[%s4792_s6 + $0x4] ss:$0 sm:$0xff] }
 0x24e   :  { %v3315_v2 = vpop.eup %3314 }
 0x24f   :  { %v289_v3 = vmul.f32 %v3313_v56, %v288_v1  ;;  %v295_v4 = vmul.f32 %v3315_v2, %v272_v59  ;;  %vm301_vm13 = vweird.f32 %v3315_v2 }
 0x250   :  { %vm302_vm15 = vmor %vm300_vm14, %vm301_vm13 }
 0x251   :  { %v293_v6 = vsel %vm292_vm12, %v3313_v56, %v289_v3  ;;  %v296_v7 = vmul.f32 %v3315_v2, %v295_v4 }
 0x252   :  { %v315_v8 = vmul.f32 %v293_v6, %v3708_v0 }
 0x253   :  { %v297_v9 = vmul.f32 0.5, %v296_v7 }
 0x254   :  { %v320_v10 = vmul.f32 %v3770_v41, %v315_v8 }
 0x255   :  { %v298_v11 = vsub.f32 1.5, %v297_v9  ;;  %v3928_v9 = vld [vmem:[%s4792_s6 + $0x5] ss:$0 sm:$0xff] }
 0x256   :  { %v3804_v12 = vadd.f32 %v3781_v49, %v320_v10 }
 0x257   :  { %v299_v13 = vmul.f32 %v3315_v2, %v298_v11 }
 0x258   :  { %3080 = vmatmul.msk.f32.gmra.mxu2 %vm157_vm3, %v3804_v12  ;;  %3089 = vmatmul.msk.f32.gmra.mxu1 %vm157_vm3, %v3804_v12 }
 0x259   :  { %v303_v14 = vsel %vm302_vm15, %v3315_v2, %v299_v13  ;;  %3116 = vmatmul.msk.f32.gmra.mxu0 %vm157_vm3, %v3804_v12 }
 0x25a   :  { %v316_v0 = vmul.f32 %v303_v14, %v3716_v5  ;;  %v3104_v5 = vld [vmem:[%s4825_s25 + $0x38] sm:$0xff] }
 0x25b   :  { %477 = vmatpush.msrb.mxu3 %v3104_v5 }
 0x25c   :  { %v321_v15 = vmul.f32 %v3770_v41, %v316_v0 }
 0x25d   :  { %478 = vmatpush.msrb.mxu3 %v3103_v18  ;;  %v3943_v18 = vld [vmem:[%s4792_s6 + $0x1] ss:$0 sm:$0xff] }
 0x25e   :  { %v3815_v16 = vadd.f32 %v3781_v49, %v321_v15 }
 0x25f   :  { %479 = vmatpush.msrb.mxu3 %v3102_v21 }
 0x260   :  { %3081 = vmatmul.msk.f32.gmra.mxu2 %vm157_vm3, %v3815_v16  ;;  %3090 = vmatmul.msk.f32.gmra.mxu1 %vm157_vm3, %v3815_v16 }
 0x261   :  { %3117 = vmatmul.msk.f32.gmra.mxu0 %vm157_vm3, %v3815_v16  ;;  %480 = vmatpush.msrb.mxu3 %v3101_v24 }
 0x268   :  { %3097 = vmatmul.msk.f32.vlgmr.msra.gmra.mxu2 %vm157_vm3, %v3790_v57 }
 0x270   :  { %3098 = vmatmul.msk.f32.gmra.mxu2 %vm157_vm3, %v3804_v12 }
 0x278   :  { %3099 = vmatmul.msk.f32.gmra.mxu2 %vm157_vm3, %v3815_v16 }
 0x2ae   :  { %v265_v20 = vpop.xlane.xlu2 %264 }
 0x2af   :  { %v269_v23 = vmul.f32 %v265_v20, %v3695_v55 }
 0x2b1   :  { %v273_v26 = vadd.f32 1e-05, %v269_v23 }
 0x2b3   :  { %3316 = vrsqrt.f32 %v273_v26  ;;  %vm310_vm1 = vweird.f32 %v273_v26 }
 0x2b9   :  { %v3317_v28 = vpop.eup %3316 }
 0x2ba   :  { %v305_v29 = vmul.f32 %v3317_v28, %v273_v26  ;;  %vm311_vm0 = vweird.f32 %v3317_v28 }
 0x2bb   :  { %vm312_vm2 = vmor %vm310_vm1, %vm311_vm0 }
 0x2bc   :  { %v306_v30 = vmul.f32 %v3317_v28, %v305_v29 }
 0x2be   :  { %v307_v31 = vmul.f32 0.5, %v306_v30 }
 0x2c0   :  { %v308_v32 = vsub.f32 1.5, %v307_v31 }
 0x2c2   :  { %v309_v33 = vmul.f32 %v3317_v28, %v308_v32 }
 0x2c4   :  { %v313_v35 = vsel %vm312_vm2, %v3317_v28, %v309_v33 }
 0x2c5   :  { %v317_v38 = vmul.f32 %v313_v35, %v3761_v27  ;;  %v404_v39 = vpop.f32.mrf.mxu1  ;;  %v3871_v27 = vld [vmem:[%s4792_s6] ss:$0 sm:$0xff] }
 0x2c6   :  { %v405_v44 = vadd.f32 %v3857_v34, %v404_v39  ;;  %v521_v50 = vpop.f32.mrf.mxu0 }
 0x2c7   :  { %v322_v46 = vmul.f32 %v3770_v41, %v317_v38  ;;  %v522_v3 = vadd.f32 %v3893_v53, %v521_v50 }
 0x2c8   :  { %3128 = vmatpush.xpose.msk.msrb.mxu2 %vm572_vm4, %v405_v44 }
 0x2c9   :  { %v327_v48 = vadd.f32 %v3781_v49, %v322_v46  ;;  %v3881_v49 = vld [vmem:[%s4793_s7 + $0x18] sm:$0xff] }
 0x2ca   :  { %744 = vmatpush.msra.mxu0 %v3881_v49 }
 0x2cb   :  { %3082 = vmatmul.msk.f32.vlgmr.msra.gmra.mxu3 %vm157_vm3, %v327_v48  ;;  %3091 = vmatmul.msk.f32.gmra.mxu1 %vm157_vm3, %v327_v48  ;;  %v365_v51 = vpop.f32.mrf.mxu2 }
 0x2cc   :  { %3100 = vmatmul.msk.f32.gmra.mxu2 %vm157_vm3, %v327_v48  ;;  %3118 = vmatmul.msk.f32.gmra.mxu0 %vm157_vm3, %v327_v48  ;;  %v366_v41 = vadd.f32 %v3871_v27, %v365_v51 }
 0x2cd   :  { %745 = vmatpush.msra.mxu0 %v3888_v52 }
 0x2d3   :  { %3106 = vmatmul.msk.f32.vlgmr.msrb.gmra.mxu3 %vm157_vm3, %v3790_v57  ;;  %3124 = vmatmul.msk.f32.vlgmr.msra.gmra.mxu1 %vm157_vm3, %v3790_v57 }
 0x2d4   :  { %3129 = vmatmul.msk.f32.vlgmr.msrb.gmra.mxu2 %vm572_vm4, %v366_v41 }
 0x2d5   :  { %v407_v54 = vpop.f32.mrf.mxu1 }
 0x2d6   :  { %v524_v56 = vpop.f32.mrf.mxu0  ;;  %v408_v14 = vadd.f32 %v3857_v34, %v407_v54 }
 0x2d7   :  { %v525_v57 = vadd.f32 %v3893_v53, %v524_v56 }
 0x2d9   :  { %3141 = vmatpush.xpose.msk.msrb.mxu1 %vm572_vm4, %v525_v57 }
 0x2db   :  { %v3898_v59 = vpop.f32.mrf.mxu2  ;;  %3107 = vmatmul.msk.f32.gmra.mxu3 %vm157_vm3, %v3804_v12  ;;  %3125 = vmatmul.msk.f32.gmra.mxu1 %vm157_vm3, %v3804_v12 }
 0x2dd   :  { %v410_v58 = vpop.f32.mrf.mxu1 }
 0x2de   :  { %v411_v60 = vadd.f32 %v3857_v34, %v410_v58  ;;  %v3938_v17 = vpop.f32.mrf.mxu0 }
 0x2e0   :  { %3146 = vmatpush.xpose.msk.msra.mxu1 %vm572_vm4, %v411_v60 }
 0x2e3   :  { %v371_v61 = vpop.f32.mrf.mxu2  ;;  %3108 = vmatmul.msk.f32.gmra.mxu3 %vm157_vm3, %v3815_v16  ;;  %3126 = vmatmul.msk.f32.gmra.mxu1 %vm157_vm3, %v3815_v16 }
 0x2e4   :  { %v372_v22 = vadd.f32 %v3871_v27, %v371_v61  ;;  %v3962_v61 = vld [vmem:[%s4793_s7 + $0x8] sm:$0xff] }
 0x2eb   :  { %v443_v1 = vpop.f32.mrf.mxu2  ;;  %3109 = vmatmul.msk.f32.gmra.mxu3 %vm157_vm3, %v327_v48  ;;  %3127 = vmatmul.msk.f32.gmra.mxu1 %vm157_vm3, %v327_v48 }
 0x2ec   :  { %v444_v2 = vadd.f32 %v3913_v62, %v443_v1  ;;  %v3968_v1 = vld [vmem:[%s4793_s7] sm:$0xff] }
 0x2ee   :  { %643 = vmatpush.msra.mxu2 %v444_v2 }
 0x2f0   :  { %3131 = vmatpush.xpose.msk.msrb.mxu2 %vm572_vm4, %v522_v3 }
 0x2f3   :  { %v446_v4 = vpop.f32.mrf.mxu2 }
 0x2f4   :  { %v447_v6 = vadd.f32 %v3913_v62, %v446_v4 }
 0x2f6   :  { %842 = vmatpush.msrb.mxu0 %v447_v6 }
 0x2fb   :  { %v3921_v7 = vpop.f32.mrf.mxu2 }
 0x2fc   :  { %v450_v6 = vadd.f32 %v3913_v62, %v3921_v7 }
 0x348   :  { %v3923_v8 = vpop.f32.mrf.mxu1 }
 0x349   :  { %v530_v21 = vpop.f32.mrf.mxu0 }
 0x34a   :  { %v531_v23 = vadd.f32 %v3893_v53, %v530_v21 }
 0x34e   :  { %v3930_v10 = vpop.f32.mrf.mxu3 }
 0x34f   :  { %v3932_v11 = vpop.f32.mrf.mxu2 }
 0x350   :  { %v560_v12 = vpop.f32.mrf.mxu1 }
 0x351   :  { %v561_v13 = vadd.f32 %v3928_v9, %v560_v12 }
 0x353   :  { %719 = vmatpush.msra.mxu3 %v561_v13 }
 0x355   :  { %3138 = vmatpush.xpose.msk.msrb.mxu3 %vm572_vm4, %v408_v14 }
 0x356   :  { %v482_v0 = vpop.f32.mrf.mxu3 }
 0x357   :  { %v596_v15 = vpop.f32.mrf.mxu2  ;;  %v483_v2 = vadd.f32 %v3943_v18, %v482_v0 }
 0x358   :  { %v599_v16 = vmul.f32 0.25, %v596_v15  ;;  %v563_v24 = vpop.f32.mrf.mxu1 }
 0x359   :  { %v564_v3 = vadd.f32 %v3928_v9, %v563_v24 }
 0x35a   :  { %v601_v5 = vsel %vm600_vm5, %v599_v16, -inf }
 0x35b   :  { %602 = vmax.xlane.f32.xlu2 %v601_v5 }
 0x35e   :  { %v485_v19 = vpop.f32.mrf.mxu3 }
 0x35f   :  { %v486_v20 = vadd.f32 %v3943_v18, %v485_v19 }
 0x360   :  { %v3953_v25 = vpop.f32.mrf.mxu1 }
 0x361   :  { %3142 = vmatmul.msk.f32.vlgmr.msrb.gmra.mxu1 %vm572_vm4, %v486_v20 }
 0x362   :  { %1132 = vmatpush.msrb.mxu1 %v3881_v49 }
 0x364   :  { %1133 = vmatpush.msrb.mxu1 %v3888_v52 }
 0x368   :  { %v3955_v30 = vpop.f32.mrf.mxu1 }
 0x369   :  { %3147 = vmatmul.msk.f32.vlgmr.msra.gmra.mxu1 %vm572_vm4, %v372_v22 }
 0x36a   :  { %3157 = vmatpush.xpose.msk.msra.mxu1 %vm572_vm4, %v531_v23 }
 0x3ce   :  { %v603_v26 = vpop.xlane.xlu2 %602 }
 0x3cf   :  { %v604_v28 = vsub.f32 %v599_v16, %v603_v26 }
 0x3d1   :  { %v605_v29 = vmul.f32 1.442695, %v604_v28 }
 0x3d3   :  { %3318 = vpow2.f32 %v605_v29 }
 0x3d9   :  { %v3319_v31 = vpop.eup %3318 }
 0x3da   :  { %v607_v32 = vsel %vm600_vm5, %v3319_v31, 0.0 }
 0x3db   :  { %608 = vadd.xlane.f32.xlu2 %v607_v32 }
 0x3de   :  { %v870_v33 = vpop.f32.mrf.mxu1 }
 0x3df   :  { %v873_v35 = vmul.f32 0.25, %v870_v33 }
 0x3e1   :  { %v874_v38 = vsel %vm600_vm5, %v873_v35, -inf }
 0x3e2   :  { %875 = vmax.xlane.f32.xlu1 %v874_v38 }
 0x44e   :  { %v609_v39 = vpop.xlane.xlu2 %608 }
 0x44f   :  { %3320 = vrcp.f32 %v609_v39  ;;  %v621_v50 = vand.u32 2147483648, %v609_v39  ;;  %v619_v41 = vand.u32 2147483647, %v609_v39  ;;  %vm615_vm7 = vweird.f32 %v609_v39 }
 0x451   :  { %v622_v56 = vor.u32 1.1754944e-38, %v621_v50  ;;  %vm620_vm9 = vcmp.eq.f32.partialorder %v619_v41, 8.507059e+37 }
 0x455   :  { %v3321_v44 = vpop.eup %3320  ;;  %v876_v4 = vpop.xlane.xlu1 %875 }
 0x456   :  { %v611_v46 = vmul.f32 %v3321_v44, %v609_v39  ;;  %vm616_vm6 = vweird.f32 %v3321_v44  ;;  %v877_v13 = vsub.f32 %v873_v35, %v876_v4 }
 0x457   :  { %vm617_vm8 = vmor %vm615_vm7, %vm616_vm6 }
 0x458   :  { %v612_v48 = vsub.f32 1.0, %v611_v46  ;;  %v878_v14 = vmul.f32 1.442695, %v877_v13 }
 0x45a   :  { %v613_v51 = vmul.f32 %v3321_v44, %v612_v48  ;;  %3322 = vpow2.f32 %v878_v14  ;;  %v414_v14 = vadd.f32 %v3857_v34, %v3923_v8 }
 0x45c   :  { %v614_v54 = vadd.f32 %v3321_v44, %v613_v51 }
 0x45e   :  { %v618_v57 = vsel %vm617_vm8, %v3321_v44, %v614_v54 }
 0x45f   :  { %v623_v58 = vsel %vm620_vm9, %v622_v56, %v618_v57 }
 0x460   :  { %v624_v60 = vmul.f32 %v3319_v31, %v623_v58  ;;  %v3323_v5 = vpop.eup %3322 }
 0x461   :  { %v880_v19 = vsel %vm600_vm5, %v3323_v5, 0.0 }
 0x462   :  { %3130 = vmatmul.msk.f32.vlgmr.msra.gmra.mxu2 %vm600_vm5, %v624_v60 }
 0x463   :  { %767 = vmatpush.msra.mxu2 %v3962_v61 }
 0x465   :  { %768 = vmatpush.msra.mxu2 %v3968_v1 }
 0x46a   :  { %3132 = vmatmul.msk.f32.vlgmr.msrb.gmra.mxu2 %vm572_vm4, %v483_v2 }
 0x46b   :  { %916 = vmatpush.msrb.mxu2 %v564_v3 }
 0x4e5   :  { %v645_v12 = vpop.f32.mrf.mxu2 }
 0x4e6   :  { %3137 = vmatmul.msk.f32.vlgmr.msra.gmra.mxu2 %vm572_vm4, %v645_v12  ;;  %v528_v12 = vadd.f32 %v3893_v53, %v3938_v17  ;;  %v375_v53 = vadd.f32 %v3871_v27, %v3930_v10 }
 0x4e7   :  { %1036 = vmatpush.msra.mxu2 %v450_v6  ;;  %v369_v6 = vadd.f32 %v3871_v27, %v3898_v59 }
 0x4ed   :  { %v673_v15 = vpop.f32.mrf.mxu2 }
 0x4ee   :  { %v676_v16 = vmul.f32 0.25, %v673_v15 }
 0x4f0   :  { %v677_v0 = vsel %vm600_vm5, %v676_v16, -inf }
 0x4f1   :  { %678 = vmax.xlane.f32.xlu0 %v677_v0 }
 0x4f9   :  { %881 = vadd.xlane.f32.xlu0 %v880_v19 }
 0x564   :  { %v679_v20 = vpop.xlane.xlu0 %678 }
 0x565   :  { %v680_v21 = vsub.f32 %v676_v16, %v679_v20  ;;  %v488_v16 = vpop.f32.mrf.mxu3 }
 0x566   :  { %v489_v0 = vadd.f32 %v3943_v18, %v488_v16 }
 0x567   :  { %v681_v22 = vmul.f32 1.442695, %v680_v21  ;;  %v4016_v21 = vld [vmem:[%s4804_s18 + $0x3] ss:$0 sm:$0xff] }
 0x569   :  { %3324 = vpow2.f32 %v681_v22  ;;  %v770_v13 = vpop.f32.mrf.mxu2 }
 0x56c   :  { %v882_v7 = vpop.xlane.xlu0 %881 }
 0x56d   :  { %3326 = vrcp.f32 %v882_v7  ;;  %v894_v31 = vand.u32 2147483648, %v882_v7  ;;  %v892_v33 = vand.u32 2147483647, %v882_v7  ;;  %vm888_vm11 = vweird.f32 %v882_v7  ;;  %v4004_v34 = vpop.f32.mrf.mxu3 }
 0x56f   :  { %v3325_v23 = vpop.eup %3324  ;;  %v895_v38 = vor.u32 1.1754944e-38, %v894_v31  ;;  %vm893_vm13 = vcmp.eq.f32.partialorder %v892_v33, 8.507059e+37 }
 0x570   :  { %v683_v24 = vsel %vm600_vm5, %v3325_v23, 0.0 }
 0x571   :  { %684 = vadd.xlane.f32.xlu2 %v683_v24 }
 0x573   :  { %v3327_v26 = vpop.eup %3326 }
 0x574   :  { %v884_v28 = vmul.f32 %v3327_v26, %v882_v7  ;;  %vm889_vm10 = vweird.f32 %v3327_v26 }
 0x575   :  { %vm890_vm12 = vmor %vm888_vm11, %vm889_vm10 }
 0x576   :  { %v885_v29 = vsub.f32 1.0, %v884_v28 }
 0x578   :  { %v886_v32 = vmul.f32 %v3327_v26, %v885_v29 }
 0x57a   :  { %v887_v35 = vadd.f32 %v3327_v26, %v886_v32  ;;  %v990_v32 = vpop.f32.mrf.mxu1 }
 0x57b   :  { %v993_v33 = vmul.f32 0.25, %v990_v32  ;;  %v453_v32 = vadd.f32 %v3913_v62, %v3932_v11 }
 0x57c   :  { %v891_v39 = vsel %vm890_vm12, %v3327_v26, %v887_v35 }
 0x57d   :  { %v896_v44 = vsel %vm893_vm13, %v895_v38, %v891_v39 }
 0x57e   :  { %v897_v46 = vmul.f32 %v3323_v5, %v896_v44 }
 0x580   :  { %3143 = vmatmul.msk.f32.vlgmr.msrb.gmra.mxu2 %vm600_vm5, %v897_v46 }
 0x581   :  { %1155 = vmatpush.msrb.mxu2 %v3962_v61 }
 0x583   :  { %1156 = vmatpush.msrb.mxu2 %v3968_v1 }
 0x5e4   :  { %v685_v48 = vpop.xlane.xlu2 %684 }
 0x5e5   :  { %3328 = vrcp.f32 %v685_v48  ;;  %v697_v54 = vand.u32 2147483648, %v685_v48  ;;  %v695_v57 = vand.u32 2147483647, %v685_v48  ;;  %vm691_vm15 = vweird.f32 %v685_v48 }
 0x5e7   :  { %v698_v60 = vor.u32 1.1754944e-38, %v697_v54  ;;  %vm696_vm1 = vcmp.eq.f32.partialorder %v695_v57, 8.507059e+37 }
 0x5eb   :  { %v3329_v50 = vpop.eup %3328 }
 0x5ec   :  { %v687_v51 = vmul.f32 %v3329_v50, %v685_v48  ;;  %vm692_vm14 = vweird.f32 %v3329_v50 }
 0x5ed   :  { %vm693_vm0 = vmor %vm691_vm15, %vm692_vm14 }
 0x5ee   :  { %v688_v41 = vsub.f32 1.0, %v687_v51 }
 0x5f0   :  { %v689_v56 = vmul.f32 %v3329_v50, %v688_v41 }
 0x5f2   :  { %v690_v58 = vadd.f32 %v3329_v50, %v689_v56 }
 0x5f4   :  { %v694_v2 = vsel %vm693_vm0, %v3329_v50, %v690_v58 }
 0x5f5   :  { %v699_v3 = vsel %vm696_vm1, %v698_v60, %v694_v2 }
 0x5f6   :  { %v700_v4 = vmul.f32 %v3325_v23, %v699_v3 }
 0x5f8   :  { %3133 = vmatmul.msk.f32.vlgmr.msra.gmra.mxu3 %vm600_vm5, %v700_v4 }
 0x5f9   :  { %938 = vmatpush.msra.mxu3 %v3881_v49 }
 0x5fb   :  { %939 = vmatpush.msra.mxu3 %v3888_v52 }
 0x600   :  { %3139 = vmatmul.msk.f32.vlgmr.msrb.gmra.mxu3 %vm572_vm4, %v369_v6 }
 0x601   :  { %3149 = vmatpush.xpose.msk.msrb.mxu3 %vm572_vm4, %v528_v12 }
 0x603   :  { %v918_v15 = vpop.f32.mrf.mxu2 }
 0x608   :  { %3144 = vmatmul.msk.f32.vlgmr.msra.gmra.mxu3 %vm572_vm4, %v918_v15 }
 0x609   :  { %3154 = vmatpush.xpose.msk.msra.mxu3 %vm572_vm4, %v414_v14 }
 0x610   :  { %3150 = vmatmul.msk.f32.vlgmr.msrb.gmra.mxu3 %vm572_vm4, %v489_v0 }
 0x611   :  { %1326 = vmatpush.msrb.mxu3 %v3881_v49 }
 0x613   :  { %1327 = vmatpush.msrb.mxu3 %v3888_v52 }
 0x618   :  { %3155 = vmatmul.msk.f32.vlgmr.msra.gmra.mxu3 %vm572_vm4, %v375_v53 }
 0x67b   :  { %v721_v59 = vpop.f32.mrf.mxu3 }
 0x67c   :  { %3136 = vmatmul.msk.f32.vlgmr.msra.gmra.mxu0 %vm572_vm4, %v721_v59 }
 0x67d   :  { %961 = vmatpush.msra.mxu0 %v3962_v61 }
 0x67f   :  { %962 = vmatpush.msra.mxu0 %v3968_v1 }
 0x683   :  { %v796_v8 = vpop.f32.mrf.mxu3 }
 0x684   :  { %v799_v17 = vmul.f32 0.25, %v796_v8 }
 0x686   :  { %v800_v49 = vsel %vm600_vm5, %v799_v17, -inf }
 0x687   :  { %801 = vmax.xlane.f32.xlu1 %v800_v49 }
 0x68b   :  { %v4010_v52 = vpop.f32.mrf.mxu3 }
 0x693   :  { %v1064_v5 = vpop.f32.mrf.mxu3 }
 0x694   :  { %v1067_v27 = vmul.f32 0.25, %v1064_v5  ;;  %v567_v5 = vadd.f32 %v3928_v9, %v3953_v25 }
 0x696   :  { %v1068_v10 = vsel %vm600_vm5, %v1067_v27, -inf }
 0x697   :  { %1069 = vmax.xlane.f32.xlu0 %v1068_v10 }
 0x69b   :  { %v1184_v57 = vpop.f32.mrf.mxu3 }
 0x69c   :  { %v4037_v58 = vmul.f32 0.25, %v1184_v57 }
 0x69e   :  { %v1188_v12 = vsel %vm600_vm5, %v4037_v58, -inf }
 0x6f9   :  { %v747_v19 = vpop.f32.mrf.mxu0 }
 0x6fa   :  { %v771_v20 = vadd.f32 %v770_v13, %v747_v19  ;;  %v802_v22 = vpop.xlane.xlu1 %801 }
 0x6fb   :  { %v803_v7 = vsub.f32 %v799_v17, %v802_v22 }
 0x6fc   :  { %v1355_v23 = vadd.f32 %v771_v20, %v3683_v43  ;;  %v994_v43 = vsel %vm600_vm5, %v993_v33, -inf }
 0x6fd   :  { %v804_v24 = vmul.f32 1.442695, %v803_v7 }
 0x6fe   :  { %v4020_v26 = vadd.f32 %v4016_v21, %v1355_v23 }
 0x6ff   :  { %3330 = vpow2.f32 %v804_v24 }
 0x700   :  { %v1364_v28 = vsel %vm157_vm3, %v4020_v26, 0.0 }
 0x701   :  { %1365 = vadd.xlane.f32.xlu0 %v1364_v28 }
 0x705   :  { %v3331_v29 = vpop.eup %3330 }
 0x706   :  { %v806_v31 = vsel %vm600_vm5, %v3331_v29, 0.0 }
 0x707   :  { %807 = vadd.xlane.f32.xlu2 %v806_v31 }
 0x70a   :  { %v1070_v35 = vpop.xlane.xlu0 %1069 }
 0x70b   :  { %v1071_v38 = vsub.f32 %v1067_v27, %v1070_v35 }
 0x70d   :  { %v1072_v39 = vmul.f32 1.442695, %v1071_v38 }
 0x70f   :  { %3332 = vpow2.f32 %v1072_v39  ;;  %995 = vmax.xlane.f32.xlu2 %v994_v43 }
 0x715   :  { %v4026_v44 = vpop.eup %3332 }
 0x716   :  { %v1074_v46 = vsel %vm600_vm5, %v4026_v44, 0.0 }
 0x717   :  { %1075 = vadd.xlane.f32.xlu1 %v1074_v46 }
 0x774   :  { %v1366_v48 = vpop.xlane.xlu0 %1365 }
 0x775   :  { %v1376_v50 = vmul.f32 %v1366_v48, %v3695_v55 }
 0x777   :  { %v4032_v51 = vsub.f32 %v4020_v26, %v1376_v50 }
 0x779   :  { %v1384_v41 = vmul.f32 %v4032_v51, %v4032_v51 }
 0x77a   :  { %v808_v54 = vpop.xlane.xlu2 %807 }
 0x77b   :  { %3334 = vrcp.f32 %v808_v54  ;;  %v1388_v56 = vsel %vm157_vm3, %v1384_v41, 0.0  ;;  %v820_v13 = vand.u32 2147483648, %v808_v54  ;;  %v818_v16 = vand.u32 2147483647, %v808_v54 }
 0x77c   :  { %1389 = vadd.xlane.f32.xlu0 %v1388_v56  ;;  %vm814_vm6 = vweird.f32 %v808_v54 }
 0x77d   :  { %v821_v53 = vor.u32 1.1754944e-38, %v820_v13  ;;  %vm819_vm8 = vcmp.eq.f32.partialorder %v818_v16, 8.507059e+37  ;;  %v1465_v16 = vld [vmem:[%s4794_s8 + $0x18] sm:$0xff] }
 0x781   :  { %v3335_v60 = vpop.eup %3334 }
 0x782   :  { %v810_v2 = vmul.f32 %v3335_v60, %v808_v54  ;;  %v996_v3 = vpop.xlane.xlu2 %995  ;;  %vm815_vm2 = vweird.f32 %v3335_v60 }
 0x783   :  { %v997_v4 = vsub.f32 %v993_v33, %v996_v3  ;;  %vm816_vm7 = vmor %vm814_vm6, %vm815_vm2 }
 0x784   :  { %v811_v6 = vsub.f32 1.0, %v810_v2  ;;  %1189 = vmax.xlane.f32.xlu0 %v1188_v12 }
 0x785   :  { %v998_v14 = vmul.f32 1.442695, %v997_v4 }
 0x786   :  { %v812_v15 = vmul.f32 %v3335_v60, %v811_v6 }
 0x787   :  { %3336 = vpow2.f32 %v998_v14 }
 0x788   :  { %v813_v0 = vadd.f32 %v3335_v60, %v812_v15 }
 0x78a   :  { %v817_v59 = vsel %vm816_vm7, %v3335_v60, %v813_v0  ;;  %v1076_v10 = vpop.xlane.xlu1 %1075  ;;  %v570_v60 = vadd.f32 %v3928_v9, %v3955_v30 }
 0x78b   :  { %v822_v8 = vsel %vm819_vm8, %v821_v53, %v817_v59  ;;  %3338 = vrcp.f32 %v1076_v10  ;;  %vm1082_vm10 = vweird.f32 %v1076_v10  ;;  %v1086_v25 = vand.u32 2147483647, %v1076_v10 }
 0x78c   :  { %v823_v17 = vmul.f32 %v3331_v29, %v822_v8  ;;  %v1088_v29 = vand.u32 2147483648, %v1076_v10  ;;  %v1462_v8 = vld [vmem:[%s4794_s8] sm:$0xff] }
 0x78d   :  { %v3337_v49 = vpop.eup %3336  ;;  %vm1087_vm12 = vcmp.eq.f32.partialorder %v1086_v25, 8.507059e+37 }
 0x78e   :  { %3140 = vmatmul.msk.f32.vlgmr.msrb.gmra.mxu0 %vm600_vm5, %v823_v17  ;;  %v1000_v27 = vsel %vm600_vm5, %v3337_v49, 0.0  ;;  %v1089_v39 = vor.u32 1.1754944e-38, %v1088_v29  ;;  %v492_v17 = vadd.f32 %v3943_v18, %v4004_v34 }
 0x78f   :  { %1110 = vmatpush.msrb.mxu0 %v567_v5  ;;  %1001 = vadd.xlane.f32.xlu2 %v1000_v27 }
 0x791   :  { %v3339_v19 = vpop.eup %3338 }
 0x792   :  { %v1078_v20 = vmul.f32 %v3339_v19, %v1076_v10  ;;  %vm1083_vm9 = vweird.f32 %v3339_v19 }
 0x793   :  { %vm1084_vm11 = vmor %vm1082_vm10, %vm1083_vm9 }
 0x794   :  { %v1079_v22 = vsub.f32 1.0, %v1078_v20 }
 0x796   :  { %v1080_v23 = vmul.f32 %v3339_v19, %v1079_v22 }
 0x798   :  { %v1081_v24 = vadd.f32 %v3339_v19, %v1080_v23 }
 0x79a   :  { %v1085_v35 = vsel %vm1084_vm11, %v3339_v19, %v1081_v24  ;;  %v4090_v19 = vld [vmem:[%s4804_s18 + $0x5] ss:$0 sm:$0xff] }
 0x79b   :  { %v1090_v50 = vsel %vm1087_vm12, %v1089_v39, %v1085_v35 }
 0x79c   :  { %v1091_v62 = vmul.f32 %v4026_v44, %v1090_v50 }
 0x7ef   :  { %v1390_v2 = vpop.xlane.xlu0 %1389 }
 0x7f0   :  { %v1400_v3 = vmul.f32 %v1390_v2, %v3695_v55 }
 0x7f2   :  { %v1404_v4 = vadd.f32 1e-05, %v1400_v3 }
 0x7f4   :  { %vm1414_vm2 = vweird.f32 %v1404_v4 }
 0x7f7   :  { %v1190_v23 = vpop.xlane.xlu0 %1189 }
 0x802   :  { %v1002_v7 = vpop.xlane.xlu2 %1001 }
 0x803   :  { %3340 = vrcp.f32 %v1002_v7  ;;  %v1014_v43 = vand.u32 2147483648, %v1002_v7  ;;  %v1012_v48 = vand.u32 2147483647, %v1002_v7  ;;  %vm1008_vm14 = vweird.f32 %v1002_v7 }
 0x804   :  { %3342 = vrsqrt.f32 %v1404_v4 }
 0x805   :  { %v1015_v54 = vor.u32 1.1754944e-38, %v1014_v43  ;;  %vm1013_vm0 = vcmp.eq.f32.partialorder %v1012_v48, 8.507059e+37  ;;  %v1558_v48 = vld [vmem:[%s4795_s9 + $0x70] sm:$0xff] }
 0x809   :  { %v3341_v28 = vpop.eup %3340 }
 0x80a   :  { %v1004_v31 = vmul.f32 %v3341_v28, %v1002_v7  ;;  %vm1009_vm13 = vweird.f32 %v3341_v28  ;;  %v3343_v44 = vpop.eup %3342 }
 0x80b   :  { %v844_v33 = vpop.f32.mrf.mxu0  ;;  %vm1010_vm15 = vmor %vm1008_vm14, %vm1009_vm13  ;;  %v1409_v6 = vmul.f32 %v3343_v44, %v1404_v4  ;;  %vm1415_vm1 = vweird.f32 %v3343_v44 }
 0x80c   :  { %v1005_v38 = vsub.f32 1.0, %v1004_v31  ;;  %3145 = vmatmul.msk.f32.vlgmr.msra.gmra.mxu0 %vm572_vm4, %v844_v33  ;;  %vm1416_vm6 = vmor %vm1414_vm2, %vm1415_vm1 }
 0x80d   :  { %1230 = vmatpush.msra.mxu0 %v453_v32  ;;  %v1410_v12 = vmul.f32 %v3343_v44, %v1409_v6 }
 0x80e   :  { %v1006_v46 = vmul.f32 %v3341_v28, %v1005_v38 }
 0x80f   :  { %v1411_v13 = vmul.f32 0.5, %v1410_v12 }
 0x810   :  { %v1007_v41 = vadd.f32 %v3341_v28, %v1006_v46 }
 0x811   :  { %v1412_v30 = vsub.f32 1.5, %v1411_v13 }
 0x812   :  { %v1011_v56 = vsel %vm1010_vm15, %v3341_v28, %v1007_v41  ;;  %v1191_v28 = vsub.f32 %v4037_v58, %v1190_v23  ;;  %v1559_v58 = vld [vmem:[%s4795_s9 + $0x78] sm:$0xff]  ;;  %v1549_v23 = vld [vmem:[%s4795_s9 + $0x28] sm:$0xff] }
 0x813   :  { %v1016_v11 = vsel %vm1013_vm0, %v1015_v54, %v1011_v56  ;;  %v1413_v0 = vmul.f32 %v3343_v44, %v1412_v30 }
 0x814   :  { %3151 = vmatmul.msk.f32.vlgmr.msrb.gmra.mxu0 %vm600_vm5, %v1091_v62  ;;  %v1017_v57 = vmul.f32 %v3337_v49, %v1016_v11  ;;  %v4081_v49 = vld [vmem:[%s4804_s18 + $0x4] ss:$0 sm:$0xff]  ;;  %v1192_v29 = vmul.f32 1.442695, %v1191_v28 }
 0x815   :  { %1349 = vmatpush.msrb.mxu0 %v3962_v61  ;;  %v1417_v59 = vsel %vm1416_vm6, %v3343_v44, %v1413_v0  ;;  %v1548_v28 = vld [vmem:[%s4795_s9 + $0x20] sm:$0xff] }
 0x816   :  { %3148 = vmatmul.msk.f32.vlgmr.msra.gmra.mxu2 %vm600_vm5, %v1017_v57  ;;  %v1448_v5 = vmul.f32 %v1417_v59, %v4032_v51  ;;  %3344 = vpow2.f32 %v1192_v29  ;;  %v1547_v29 = vld [vmem:[%s4795_s9 + $0x18] sm:$0xff] }
 0x817   :  { %1304 = vmatpush.msra.mxu2 %v570_v60  ;;  %1350 = vmatpush.msrb.mxu0 %v3968_v1 }
 0x818   :  { %v1453_v10 = vmul.f32 %v4081_v49, %v1448_v5  ;;  %v1555_v5 = vld [vmem:[%s4795_s9 + $0x58] sm:$0xff] }
 0x81a   :  { %v1458_v18 = vadd.f32 %v4090_v19, %v1453_v10  ;;  %v1553_v10 = vld [vmem:[%s4795_s9 + $0x48] sm:$0xff] }
 0x81c   :  { %v3345_v33 = vpop.eup %3344 }
 0x81d   :  { %v1194_v35 = vsel %vm600_vm5, %v3345_v33, 0.0 }
 0x889   :  { %v964_v14 = vpop.f32.mrf.mxu0 }
 0x88a   :  { %v965_v15 = vadd.f32 %v964_v14, %v4010_v52  ;;  %v1463_v52 = vld [vmem:[%s4794_s8 + $0x8] sm:$0xff] }
 0x88c   :  { %v1356_v9 = vadd.f32 %v965_v15, %v3691_v47  ;;  %v1464_v47 = vld [vmem:[%s4794_s8 + $0x10] sm:$0xff]  ;;  %s3052_s8 = sshll.u32 %s3492_s5, 4  ;;  %s3053_s8 = int_to_ptr.vmem [resolvable:$true] %s3052_s8 }
 0x88e   :  { %v4059_v61 = vadd.f32 %v4016_v21, %v1356_v9 }
 0x890   :  { %v1367_v1 = vsel %vm157_vm3, %v4059_v61, 0.0 }
 0x891   :  { %v1112_v53 = vpop.f32.mrf.mxu0  ;;  %1368 = vadd.xlane.f32.xlu1 %v1367_v1 }
 0x892   :  { %3152 = vmatmul.msk.f32.vlgmr.msrb.gmra.mxu1 %vm572_vm4, %v1112_v53 }
 0x893   :  { %1491 = vmatpush.msrb.mxu1 %v1465_v16 }
 0x895   :  { %1492 = vmatpush.msrb.mxu1 %v1464_v47 }
 0x897   :  { %1493 = vmatpush.msrb.mxu1 %v1463_v52 }
 0x899   :  { %v1038_v27 = vpop.f32.mrf.mxu2  ;;  %1494 = vmatpush.msrb.mxu1 %v1462_v8  ;;  %v1557_v8 = vld [vmem:[%s4795_s9 + $0x68] sm:$0xff] }
 0x89a   :  { %3153 = vmatmul.msk.f32.vlgmr.msrb.gmra.mxu2 %vm572_vm4, %v1038_v27  ;;  %3158 = vmatmul.msk.f32.vlgmr.msra.gmra.mxu1 %vm572_vm4, %v492_v17  ;;  %v1556_v17 = vld [vmem:[%s4795_s9 + $0x60] sm:$0xff]  ;;  %v1554_v27 = vld [vmem:[%s4795_s9 + $0x50] sm:$0xff] }
 0x89b   :  { %1561 = vmatpush.msrb.mxu2 %v1559_v58 }
 0x89d   :  { %1562 = vmatpush.msrb.mxu2 %v1558_v48 }
 0x89f   :  { %1563 = vmatpush.msrb.mxu2 %v1557_v8 }
 0x8a1   :  { %1564 = vmatpush.msrb.mxu2 %v1556_v17 }
 0x8a2   :  { %3162 = vmatmul.msk.f32.vlgmr.msrb.gmra.mxu1 %vm157_vm3, %v1458_v18  ;;  %v1552_v18 = vld [vmem:[%s4795_s9 + $0x40] sm:$0xff] }
 0x8a3   :  { %1565 = vmatpush.msrb.mxu2 %v1555_v5 }
 0x8a5   :  { %1566 = vmatpush.msrb.mxu2 %v1554_v27  ;;  %v3287_v27 = vld [vmem:[%s4804_s18 + $0x6] ss:$0 sm:$0xff] }
 0x8a7   :  { %1567 = vmatpush.msrb.mxu2 %v1553_v10 }
 0x8a9   :  { %1568 = vmatpush.msrb.mxu2 %v1552_v18 }
 0x904   :  { %v1369_v34 = vpop.xlane.xlu1 %1368 }
 0x905   :  { %v1377_v51 = vmul.f32 %v1369_v34, %v3695_v55  ;;  %v4138_v34 = vld [vmem:[%s4805_s19] ss:$0 sm:$0xff] }
 0x907   :  { %v1381_v20 = vsub.f32 %v4059_v61, %v1377_v51  ;;  %v1551_v51 = vld [vmem:[%s4795_s9 + $0x38] sm:$0xff] }
 0x908   :  { %1569 = vmatpush.msrb.mxu2 %v1551_v51 }
 0x909   :  { %v1385_v22 = vmul.f32 %v1381_v20, %v1381_v20 }
 0x90b   :  { %v1391_v7 = vsel %vm157_vm3, %v1385_v22, 0.0  ;;  %v1550_v22 = vld [vmem:[%s4795_s9 + $0x30] sm:$0xff] }
 0x90c   :  { %1392 = vadd.xlane.f32.xlu1 %v1391_v7  ;;  %1570 = vmatpush.msrb.mxu2 %v1550_v22 }
 0x90e   :  { %1571 = vmatpush.msrb.mxu2 %v1549_v23 }
 0x90f   :  { %v4097_v24 = vpop.f32.mrf.mxu1 }
 0x910   :  { %1572 = vmatpush.msrb.mxu2 %v1548_v28 }
 0x912   :  { %1573 = vmatpush.msrb.mxu2 %v1547_v29 }
 0x917   :  { %v1258_v25 = vpop.f32.mrf.mxu1 }
 0x918   :  { %v1261_v31 = vmul.f32 0.25, %v1258_v25 }
 0x91a   :  { %v1262_v32 = vsel %vm600_vm5, %v1261_v31, -inf }
 0x91b   :  { %1263 = vmax.xlane.f32.xlu2 %v1262_v32 }
 0x91d   :  { %v1158_v17 = vpop.f32.mrf.mxu2 }
 0x923   :  { %1195 = vadd.xlane.f32.xlu2 %v1194_v35  ;;  %v1544_v35 = vld [vmem:[%s4795_s9] sm:$0xff] }
 0x97f   :  { %v1393_v38 = vpop.xlane.xlu1 %1392 }
 0x980   :  { %v1401_v39 = vmul.f32 %v1393_v38, %v3695_v55  ;;  %v1695_v38 = vld [vmem:[%s4797_s11 + $0x8] sm:$0xff] }
 0x981   :  { %1708 = vmatpush.msra.mxu3 %v1695_v38 }
 0x982   :  { %v1405_v43 = vadd.f32 1e-05, %v1401_v39  ;;  %v1694_v39 = vld [vmem:[%s4797_s11] sm:$0xff]  ;;  %s3493_s11 = smov 128  }
 0x983   :  { %1709 = vmatpush.msra.mxu3 %v1694_v39 }
 0x984   :  { %3346 = vrsqrt.f32 %v1405_v43  ;;  %vm1424_vm8 = vweird.f32 %v1405_v43 }
 0x985   :  { %1710 = vmatpush.msra.mxu3 %v1695_v38 }
 0x987   :  { %1711 = vmatpush.msra.mxu3 %v1694_v39 }
 0x98a   :  { %v3347_v46 = vpop.eup %3346 }
 0x98b   :  { %v1419_v50 = vmul.f32 %v3347_v46, %v1405_v43  ;;  %vm1425_vm7 = vweird.f32 %v3347_v46 }
 0x98c   :  { %vm1426_vm9 = vmor %vm1424_vm8, %vm1425_vm7 }
 0x98d   :  { %v1420_v41 = vmul.f32 %v3347_v46, %v1419_v50 }
 0x98e   :  { %v1264_v54 = vpop.xlane.xlu2 %1263 }
 0x98f   :  { %v1421_v56 = vmul.f32 0.5, %v1420_v41  ;;  %v1265_v62 = vsub.f32 %v1261_v31, %v1264_v54  ;;  %v1546_v31 = vld [vmem:[%s4795_s9 + $0x10] sm:$0xff] }
 0x990   :  { %1574 = vmatpush.msrb.mxu2 %v1546_v31 }
 0x991   :  { %v1422_v11 = vsub.f32 1.5, %v1421_v56  ;;  %v1266_v57 = vmul.f32 1.442695, %v1265_v62 }
 0x993   :  { %v1423_v60 = vmul.f32 %v3347_v46, %v1422_v11  ;;  %3348 = vpow2.f32 %v1266_v57 }
 0x995   :  { %v1427_v2 = vsel %vm1426_vm9, %v3347_v46, %v1423_v60 }
 0x996   :  { %v1196_v3 = vpop.xlane.xlu2 %1195  ;;  %v1449_v4 = vmul.f32 %v1427_v2, %v1381_v20  ;;  %v1496_v20 = vpop.f32.mrf.mxu1 }
 0x997   :  { %3350 = vrcp.f32 %v1196_v3  ;;  %v1208_v30 = vand.u32 2147483648, %v1196_v3  ;;  %v1206_v16 = vand.u32 2147483647, %v1196_v3  ;;  %vm1202_vm11 = vweird.f32 %v1196_v3 }
 0x998   :  { %v1454_v44 = vmul.f32 %v4081_v49, %v1449_v4  ;;  %v1497_v7 = vadd.f32 %v4138_v34, %v1496_v20 }
 0x999   :  { %v4110_v6 = vpop.eup %3348  ;;  %v1209_v53 = vor.u32 1.1754944e-38, %v1208_v30  ;;  %vm1207_vm13 = vcmp.eq.f32.partialorder %v1206_v16, 8.507059e+37 }
 0x99a   :  { %v1268_v12 = vsel %vm600_vm5, %v4110_v6, 0.0  ;;  %v1459_v13 = vadd.f32 %v4090_v19, %v1454_v44  ;;  %v1508_v25 = vmul.f32 %v1497_v7, %v1497_v7 }
 0x99b   :  { %1269 = vadd.xlane.f32.xlu1 %v1268_v12 }
 0x99c   :  { %3163 = vmatmul.msk.f32.gmra.mxu1 %vm157_vm3, %v1459_v13  ;;  %v1512_v32 = vmul.f32 %v1508_v25, %v1497_v7 }
 0x99d   :  { %v3351_v14 = vpop.eup %3350 }
 0x99e   :  { %v1198_v15 = vmul.f32 %v3351_v14, %v1196_v3  ;;  %vm1203_vm10 = vweird.f32 %v3351_v14  ;;  %v1516_v43 = vmul.f32 0.044715, %v1512_v32 }
 0x99f   :  { %vm1204_vm12 = vmor %vm1202_vm11, %vm1203_vm10 }
 0x9a0   :  { %v1199_v9 = vsub.f32 1.0, %v1198_v15  ;;  %v1520_v58 = vadd.f32 %v1516_v43, %v1497_v7 }
 0x9a2   :  { %v1200_v1 = vmul.f32 %v3351_v14, %v1199_v9  ;;  %v1524_v48 = vmul.f32 0.7978846, %v1520_v58 }
 0x9a4   :  { %v1201_v0 = vadd.f32 %v3351_v14, %v1200_v1 }
 0x9a6   :  { %v1205_v47 = vsel %vm1204_vm12, %v3351_v14, %v1201_v0 }
 0x9a7   :  { %v1210_v52 = vsel %vm1207_vm13, %v1209_v53, %v1205_v47 }
 0x9a8   :  { %v1211_v59 = vmul.f32 %v3345_v33, %v1210_v52  ;;  %v1545_v33 = vld [vmem:[%s4795_s9 + $0x8] sm:$0xff] }
 0x9a9   :  { %1575 = vmatpush.msrb.mxu2 %v1545_v33 }
 0x9aa   :  { %3156 = vmatmul.msk.f32.vlgmr.msra.gmra.mxu0 %vm600_vm5, %v1211_v59 }
 0x9ab   :  { %1731 = vmatpush.msra.mxu0 %v1695_v38  ;;  %1576 = vmatpush.msrb.mxu2 %v1544_v35 }
 0x9ad   :  { %1732 = vmatpush.msra.mxu0 %v1694_v39 }
 0x9af   :  { %1733 = vmatpush.msra.mxu0 %v1695_v38 }
 0x9b1   :  { %1734 = vmatpush.msra.mxu0 %v1694_v39 }
 0xa0e   :  { %v1270_v46 = vpop.xlane.xlu1 %1269 }
 0xa0f   :  { %3352 = vrcp.f32 %v1270_v46  ;;  %v1282_v56 = vand.u32 2147483648, %v1270_v46  ;;  %v1280_v57 = vand.u32 2147483647, %v1270_v46  ;;  %vm1276_vm15 = vweird.f32 %v1270_v46 }
 0xa10   :  { %3354 = vtanh.f32 %v1524_v48 }
 0xa11   :  { %v1283_v44 = vor.u32 1.1754944e-38, %v1282_v56  ;;  %vm1281_vm1 = vcmp.eq.f32.partialorder %v1280_v57, 8.507059e+37 }
 0xa15   :  { %v3353_v50 = vpop.eup %3352 }
 0xa16   :  { %v1272_v41 = vmul.f32 %v3353_v50, %v1270_v46  ;;  %vm1277_vm14 = vweird.f32 %v3353_v50  ;;  %v3355_v4 = vpop.eup %3354 }
 0xa17   :  { %vm1278_vm0 = vmor %vm1276_vm15, %vm1277_vm14  ;;  %v1532_v9 = vadd.f32 1.0, %v3355_v4  ;;  %v1742_v4 = vld [vmem:[%s4796_s10] sm:$0xff] }
 0xa18   :  { %v1273_v54 = vsub.f32 1.0, %v1272_v41 }
 0xa19   :  { %v1499_v62 = vpop.f32.mrf.mxu1  ;;  %v1536_v16 = vmul.f32 0.5, %v1532_v9 }
 0xa1a   :  { %v1274_v11 = vmul.f32 %v3353_v50, %v1273_v54  ;;  %v1500_v60 = vadd.f32 %v4138_v34, %v1499_v62  ;;  %v4225_v54 = vld [vmem:[%s4804_s18 + $0xa] ss:$0 sm:$0xff] }
 0xa1b   :  { %v1540_v47 = vmul.f32 %v1536_v16, %v1497_v7 }
 0xa1c   :  { %v1275_v2 = vadd.f32 %v3353_v50, %v1274_v11  ;;  %v1509_v3 = vmul.f32 %v1500_v60, %v1500_v60 }
 0xa1e   :  { %v1279_v12 = vsel %vm1278_vm0, %v3353_v50, %v1275_v2  ;;  %v1513_v13 = vmul.f32 %v1509_v3, %v1500_v60  ;;  %v1744_v2 = vld [vmem:[%s4796_s10 + $0x10] sm:$0xff]  ;;  %v1743_v3 = vld [vmem:[%s4796_s10 + $0x8] sm:$0xff] }
 0xa1f   :  { %v1284_v14 = vsel %vm1281_vm1, %v1283_v44, %v1279_v12 }
 0xa20   :  { %v1285_v15 = vmul.f32 %v4110_v6, %v1284_v14  ;;  %v1517_v30 = vmul.f32 0.044715, %v1513_v13 }
 0xa22   :  { %3159 = vmatmul.msk.f32.vlgmr.msra.gmra.mxu2 %vm600_vm5, %v1285_v15  ;;  %v1521_v1 = vadd.f32 %v1517_v30, %v1500_v60 }
 0xa24   :  { %v1525_v0 = vmul.f32 0.7978846, %v1521_v1 }
 0xa26   :  { %3356 = vtanh.f32 %v1525_v0 }
 0xa27   :  { %v1232_v53 = vpop.f32.mrf.mxu0 }
 0xa28   :  { %3161 = vmatmul.msk.f32.vlgmr.msrb.gmra.mxu0 %vm572_vm4, %v1232_v53 }
 0xa2a   :  { %1577 = vmatmul.f32.vlgmr.msrb.gmra.mxu2 %v1540_v47 }
 0xa2c   :  { %v3357_v52 = vpop.eup %3356 }
 0xa2d   :  { %v1533_v59 = vadd.f32 1.0, %v3357_v52 }
 0xa2f   :  { %v1537_v8 = vmul.f32 0.5, %v1533_v59 }
 0xa30   :  { %3168 = vmatmul.msk.f32.vlgmr.msra.gmra.mxu0 %vm157_vm3, %v3669_v37 }
 0xa31   :  { %v1541_v6 = vmul.f32 %v1537_v8, %v1500_v60  ;;  %v1745_v60 = vld [vmem:[%s4796_s10 + $0x18] sm:$0xff] }
 0xa33   :  { %1580 = vmatmul.f32.gmra.mxu2 %v1541_v6 }
 0xa38   :  { %3169 = vmatmul.msk.f32.gmra.mxu0 %vm157_vm3, %v3679_v42  ;;  %v1159_v42 = vadd.f32 %v1158_v17, %v4097_v24 }
 0xa3a   :  { %v1357_v23 = vadd.f32 %v1159_v42, %v3687_v45 }
 0xaa5   :  { %v1306_v5 = vpop.f32.mrf.mxu2  ;;  %v1352_v25 = vpop.f32.mrf.mxu0 }
 0xaa6   :  { %3160 = vmatmul.msk.f32.vlgmr.msrb.gmra.mxu3 %vm572_vm4, %v1306_v5 }
 0xaa7   :  { %1766 = vmatpush.msrb.mxu3 %v1745_v60 }
 0xaa9   :  { %1767 = vmatpush.msrb.mxu3 %v1744_v2 }
 0xaab   :  { %1768 = vmatpush.msrb.mxu3 %v1743_v3 }
 0xaad   :  { %v1578_v10 = vpop.f32.mrf.mxu2  ;;  %v1736_v62 = vpop.f32.mrf.mxu0  ;;  %1769 = vmatpush.msrb.mxu3 %v1742_v4 }
 0xaae   :  { %v1579_v18 = vadd.f32 %v3287_v27, %v1578_v10  ;;  %3166 = vmatmul.msk.f32.vlgmr.msra.gmra.mxu3 %vm157_vm3, %v3667_v36  ;;  %v4194_v36 = vadd.f32 %v4016_v21, %v1357_v23  ;;  %v4229_v11 = vadd.f32 %v4225_v54, %v1736_v62 }
 0xab0   :  { %v1590_v37 = vadd.f32 %v1579_v18, %v4020_v26  ;;  %v1370_v26 = vsel %vm157_vm3, %v4194_v36, 0.0  ;;  %v1793_v57 = vsel %vm157_vm3, %v4229_v11, 0.0 }
 0xab2   :  { %v1596_v51 = vsel %vm157_vm3, %v1590_v37, 0.0 }
 0xab3   :  { %1597 = vadd.xlane.f32.xlu0 %v1596_v51 }
 0xab6   :  { %v1581_v20 = vpop.f32.mrf.mxu2  ;;  %3167 = vmatmul.msk.f32.gmra.mxu3 %vm157_vm3, %v3675_v40 }
 0xab7   :  { %v1582_v22 = vadd.f32 %v3287_v27, %v1581_v20 }
 0xab9   :  { %v1591_v7 = vadd.f32 %v1582_v22, %v4059_v61 }
 0xabb   :  { %v1599_v28 = vsel %vm157_vm3, %v1591_v7, 0.0 }
 0xabc   :  { %1600 = vadd.xlane.f32.xlu1 %v1599_v28 }
 0xac4   :  { %1371 = vadd.xlane.f32.xlu1 %v1370_v26 }
 0xb26   :  { %v1598_v29 = vpop.xlane.xlu0 %1597 }
 0xb27   :  { %v1608_v40 = vmul.f32 %v1598_v29, %v3695_v55 }
 0xb29   :  { %v4199_v24 = vsub.f32 %v1590_v37, %v1608_v40  ;;  %v1329_v31 = vpop.f32.mrf.mxu3  ;;  %v3289_v37 = vld [vmem:[%s4804_s18 + $0x7] ss:$0 sm:$0xff] }
 0xb2a   :  { %v1353_v61 = vadd.f32 %v1352_v25, %v1329_v31 }
 0xb2b   :  { %v1616_v45 = vmul.f32 %v4199_v24, %v4199_v24 }
 0xb2c   :  { %v1358_v32 = vadd.f32 %v1353_v61, %v3705_v63 }
 0xb2d   :  { %v1620_v33 = vsel %vm157_vm3, %v1616_v45, 0.0 }
 0xb2e   :  { %1621 = vadd.xlane.f32.xlu2 %v1620_v33  ;;  %v4207_v39 = vadd.f32 %v4016_v21, %v1358_v32 }
 0xb2f   :  { %v1601_v35 = vpop.xlane.xlu1 %1600 }
 0xb30   :  { %v1609_v38 = vmul.f32 %v1601_v35, %v3695_v55  ;;  %v1373_v58 = vsel %vm157_vm3, %v4207_v39, 0.0 }
 0xb32   :  { %v4209_v43 = vsub.f32 %v1591_v7, %v1609_v38  ;;  %v3290_v7 = vld [vmem:[%s4804_s18 + $0x8] ss:$0 sm:$0xff] }
 0xb34   :  { %v1617_v46 = vmul.f32 %v4209_v43, %v4209_v43 }
 0xb36   :  { %1374 = vadd.xlane.f32.xlu2 %v1373_v58  ;;  %v1623_v63 = vsel %vm157_vm3, %v1617_v46, 0.0 }
 0xb37   :  { %v1372_v48 = vpop.xlane.xlu1 %1371  ;;  %1624 = vadd.xlane.f32.xlu0 %v1623_v63 }
 0xb38   :  { %v1378_v50 = vmul.f32 %v1372_v48, %v3695_v55 }
 0xb3a   :  { %v4218_v41 = vsub.f32 %v4194_v36, %v1378_v50 }
 0xb3c   :  { %v1386_v21 = vmul.f32 %v4218_v41, %v4218_v41 }
 0xb3e   :  { %v1394_v56 = vsel %vm157_vm3, %v1386_v21, 0.0 }
 0xb3f   :  { %1395 = vadd.xlane.f32.xlu0 %v1394_v56 }
 0xb47   :  { %1794 = vadd.xlane.f32.xlu0 %v1793_v57  ;;  %v1713_v57 = vpop.f32.mrf.mxu3 }
 0xba1   :  { %v1622_v44 = vpop.xlane.xlu2 %1621 }
 0xba2   :  { %v1632_v12 = vmul.f32 %v1622_v44, %v3695_v55 }
 0xba4   :  { %v1636_v13 = vadd.f32 1e-05, %v1632_v12 }
 0xba6   :  { %3358 = vrsqrt.f32 %v1636_v13  ;;  %vm1646_vm2 = vweird.f32 %v1636_v13 }
 0xba9   :  { %v1375_v14 = vpop.xlane.xlu2 %1374 }
 0xbaa   :  { %v1379_v15 = vmul.f32 %v1375_v14, %v3695_v55  ;;  %v1625_v9 = vpop.xlane.xlu0 %1624 }
 0xbab   :  { %v1633_v30 = vmul.f32 %v1625_v9, %v3695_v55 }
 0xbac   :  { %v3359_v1 = vpop.eup %3358  ;;  %v4249_v16 = vsub.f32 %v4207_v39, %v1379_v15  ;;  %v3291_v15 = vld [vmem:[%s4804_s18 + $0x9] ss:$0 sm:$0xff] }
 0xbad   :  { %v1641_v0 = vmul.f32 %v3359_v1, %v1636_v13  ;;  %v1637_v53 = vadd.f32 1e-05, %v1633_v30  ;;  %vm1647_vm5 = vweird.f32 %v3359_v1 }
 0xbae   :  { %v1387_v47 = vmul.f32 %v4249_v16, %v4249_v16  ;;  %vm1648_vm6 = vmor %vm1646_vm2, %vm1647_vm5 }
 0xbaf   :  { %v1642_v52 = vmul.f32 %v3359_v1, %v1641_v0  ;;  %3360 = vrsqrt.f32 %v1637_v53  ;;  %vm1656_vm8 = vweird.f32 %v1637_v53 }
 0xbb0   :  { %v1397_v59 = vsel %vm157_vm3, %v1387_v47, 0.0  ;;  %v1739_v47 = vpop.f32.mrf.mxu0 }
 0xbb1   :  { %v1643_v8 = vmul.f32 0.5, %v1642_v52  ;;  %1398 = vadd.xlane.f32.xlu1 %v1397_v59 }
 0xbb2   :  { %v1396_v6 = vpop.xlane.xlu0 %1395 }
 0xbb3   :  { %v1644_v17 = vsub.f32 1.5, %v1643_v8  ;;  %v1402_v5 = vmul.f32 %v1396_v6, %v3695_v55 }
 0xbb5   :  { %v3361_v27 = vpop.eup %3360  ;;  %v1645_v10 = vmul.f32 %v3359_v1, %v1644_v17  ;;  %v1406_v18 = vadd.f32 1e-05, %v1402_v5 }
 0xbb6   :  { %v1651_v51 = vmul.f32 %v3361_v27, %v1637_v53  ;;  %vm1657_vm7 = vweird.f32 %v3361_v27 }
 0xbb7   :  { %v1649_v20 = vsel %vm1648_vm6, %v3359_v1, %v1645_v10  ;;  %3362 = vrsqrt.f32 %v1406_v18  ;;  %vm1658_vm9 = vmor %vm1656_vm8, %vm1657_vm7  ;;  %vm1434_vm11 = vweird.f32 %v1406_v18 }
 0xbb8   :  { %v1680_v42 = vmul.f32 %v1649_v20, %v4199_v24  ;;  %v1652_v22 = vmul.f32 %v3361_v27, %v1651_v51 }
 0xbba   :  { %v1685_v23 = vmul.f32 %v3289_v37, %v1680_v42  ;;  %v1653_v28 = vmul.f32 0.5, %v1652_v22 }
 0xbbc   :  { %v1654_v26 = vsub.f32 1.5, %v1653_v28  ;;  %v1690_v29 = vadd.f32 %v3290_v7, %v1685_v23 }
 0xbbd   :  { %v3363_v40 = vpop.eup %3362 }
 0xbbe   :  { %v1655_v25 = vmul.f32 %v3361_v27, %v1654_v26  ;;  %v1429_v31 = vmul.f32 %v3363_v40, %v1406_v18  ;;  %3170 = vmatmul.msk.f32.vlgmr.msrb.gmra.mxu3 %vm157_vm3, %v1690_v29  ;;  %vm1435_vm10 = vweird.f32 %v3363_v40 }
 0xbbf   :  { %vm1436_vm12 = vmor %vm1434_vm11, %vm1435_vm10 }
 0xbc0   :  { %v1659_v61 = vsel %vm1658_vm9, %v3361_v27, %v1655_v25  ;;  %v1430_v45 = vmul.f32 %v3363_v40, %v1429_v31 }
 0xbc1   :  { %v1681_v24 = vmul.f32 %v1659_v61, %v4209_v43 }
 0xbc2   :  { %v1431_v32 = vmul.f32 0.5, %v1430_v45 }
 0xbc3   :  { %v1686_v33 = vmul.f32 %v3289_v37, %v1681_v24 }
 0xbc4   :  { %v1432_v35 = vsub.f32 1.5, %v1431_v32 }
 0xbc5   :  { %v1691_v38 = vadd.f32 %v3290_v7, %v1686_v33 }
 0xbc6   :  { %v1433_v46 = vmul.f32 %v3363_v40, %v1432_v35 }
 0xbc7   :  { %3171 = vmatmul.msk.f32.gmra.mxu3 %vm157_vm3, %v1691_v38 }
 0xbc8   :  { %v1437_v58 = vsel %vm1436_vm12, %v3363_v40, %v1433_v46 }
 0xbc9   :  { %v1450_v63 = vmul.f32 %v1437_v58, %v4218_v41  ;;  %v1716_v41 = vpop.f32.mrf.mxu3 }
 0xbcb   :  { %v1455_v48 = vmul.f32 %v4081_v49, %v1450_v63 }
 0xbcd   :  { %v1460_v50 = vadd.f32 %v4090_v19, %v1455_v48 }
 0xbcf   :  { %3164 = vmatmul.msk.f32.gmra.mxu1 %vm157_vm3, %v1460_v50 }
 0xc24   :  { %v1399_v43 = vpop.xlane.xlu1 %1398 }
 0xc25   :  { %v1403_v21 = vmul.f32 %v1399_v43, %v3695_v55 }
 0xc27   :  { %v1407_v56 = vadd.f32 1e-05, %v1403_v21 }
 0xc29   :  { %3364 = vrsqrt.f32 %v1407_v56  ;;  %vm1444_vm14 = vweird.f32 %v1407_v56 }
 0xc2f   :  { %v3365_v62 = vpop.eup %3364 }
 0xc30   :  { %v1439_v60 = vmul.f32 %v3365_v62, %v1407_v56  ;;  %vm1445_vm13 = vweird.f32 %v3365_v62 }
 0xc31   :  { %vm1446_vm15 = vmor %vm1444_vm14, %vm1445_vm13 }
 0xc32   :  { %v1440_v2 = vmul.f32 %v3365_v62, %v1439_v60 }
 0xc34   :  { %v1441_v3 = vmul.f32 0.5, %v1440_v2 }
 0xc36   :  { %v1442_v4 = vsub.f32 1.5, %v1441_v3 }
 0xc38   :  { %v1443_v44 = vmul.f32 %v3365_v62, %v1442_v4 }
 0xc3a   :  { %v1447_v12 = vsel %vm1446_vm15, %v3365_v62, %v1443_v44 }
 0xc3b   :  { %v1451_v13 = vmul.f32 %v1447_v12, %v4249_v16  ;;  %v1795_v16 = vpop.xlane.xlu0 %1794  ;;  %v1891_v12 = vld [vmem:[%s4798_s12 + $0x18] sm:$0xff] }
 0xc3c   :  { %v1803_v59 = vmul.f32 %v1795_v16, %v3695_v55  ;;  %1920 = vmatpush.msrb.mxu0 %v1891_v12  ;;  %v1889_v16 = vld [vmem:[%s4798_s12 + $0x8] sm:$0xff] }
 0xc3d   :  { %v1456_v14 = vmul.f32 %v4081_v49, %v1451_v13  ;;  %v4282_v49 = vadd.f32 %v4225_v54, %v1739_v47  ;;  %v3179_v13 = vld [vmem:[%s4798_s12 + $0x58] sm:$0xff]  ;;  %v3205_v47 = vld [vmem:[%s4798_s12 + $0x70] sm:$0xff] }
 0xc3e   :  { %v4291_v27 = vsub.f32 %v4229_v11, %v1803_v59  ;;  %1959 = vmatpush.msra.mxu1 %v3179_v13  ;;  %v3186_v59 = vld [vmem:[%s4798_s12 + $0x88] sm:$0xff] }
 0xc3f   :  { %v1461_v9 = vadd.f32 %v4090_v19, %v1456_v14  ;;  %v1799_v5 = vsel %vm157_vm3, %v4282_v49, 0.0  ;;  %v3188_v14 = vld [vmem:[%s4798_s12 + $0x98] sm:$0xff]  ;;  %v3213_v13 = vld [vmem:[%s4798_s12 + $0xa8] sm:$0xff] }
 0xc40   :  { %v1811_v37 = vmul.f32 %v4291_v27, %v4291_v27  ;;  %1998 = vmatpush.msra.mxu3 %v3188_v14  ;;  %v3293_v14 = vld [vmem:[%s4804_s18 + $0xc] ss:$0 sm:$0xff] }
 0xc41   :  { %3165 = vmatmul.msk.f32.gmra.mxu1 %vm157_vm3, %v1461_v9  ;;  %v1771_v30 = vpop.f32.mrf.mxu3  ;;  %v3206_v9 = vld [vmem:[%s4798_s12 + $0x78] sm:$0xff] }
 0xc42   :  { %v1772_v1 = vadd.f32 %v3291_v15, %v1771_v30  ;;  %v1817_v42 = vsel %vm157_vm3, %v1811_v37, 0.0  ;;  %2076 = vmatpush.msra.mxu2 %v3206_v9  ;;  %v1890_v30 = vld [vmem:[%s4798_s12 + $0x10] sm:$0xff] }
 0xc43   :  { %1921 = vmatpush.msrb.mxu0 %v1890_v30 }
 0xc44   :  { %v4277_v0 = vadd.f32 %v1772_v1, %v1713_v57  ;;  %v3178_v1 = vld [vmem:[%s4798_s12 + $0x50] sm:$0xff]  ;;  %2077 = vmatpush.msra.mxu2 %v3205_v47 }
 0xc45   :  { %1960 = vmatpush.msra.mxu1 %v3178_v1  ;;  %1922 = vmatpush.msrb.mxu0 %v1889_v16  ;;  %v3212_v16 = vld [vmem:[%s4798_s12 + $0xa0] sm:$0xff] }
 0xc46   :  { %v1790_v53 = vsel %vm157_vm3, %v4277_v0, 0.0 }
 0xc47   :  { %1791 = vadd.xlane.f32.xlu2 %v1790_v53  ;;  %v3187_v53 = vld [vmem:[%s4798_s12 + $0x90] sm:$0xff] }
 0xc48   :  { %1999 = vmatpush.msra.mxu3 %v3187_v53 }
 0xc4a   :  { %v1774_v52 = vpop.f32.mrf.mxu3  ;;  %2000 = vmatpush.msra.mxu3 %v3186_v59 }
 0xc4b   :  { %v1775_v8 = vadd.f32 %v3291_v15, %v1774_v52  ;;  %v3177_v52 = vld [vmem:[%s4798_s12 + $0x48] sm:$0xff] }
 0xc4c   :  { %v1502_v19 = vpop.f32.mrf.mxu1  ;;  %1961 = vmatpush.msra.mxu1 %v3177_v52 }
 0xc4d   :  { %v4285_v6 = vadd.f32 %v1775_v8, %v1716_v41  ;;  %v1503_v17 = vadd.f32 %v4138_v34, %v1502_v19  ;;  %v3204_v8 = vld [vmem:[%s4798_s12 + $0x68] sm:$0xff]  ;;  %v1888_v19 = vld [vmem:[%s4798_s12] sm:$0xff] }
 0xc4e   :  { %2078 = vmatpush.msra.mxu2 %v3204_v8  ;;  %1923 = vmatpush.msrb.mxu0 %v1888_v19 }
 0xc4f   :  { %v1510_v10 = vmul.f32 %v1503_v17, %v1503_v17  ;;  %1800 = vadd.xlane.f32.xlu2 %v1799_v5  ;;  %v1796_v54 = vsel %vm157_vm3, %v4285_v6, 0.0  ;;  %v3185_v5 = vld [vmem:[%s4798_s12 + $0x80] sm:$0xff] }
 0xc50   :  { %1797 = vadd.xlane.f32.xlu1 %v1796_v54  ;;  %2001 = vmatpush.msra.mxu3 %v3185_v5 }
 0xc51   :  { %v1514_v18 = vmul.f32 %v1510_v10, %v1503_v17  ;;  %v3203_v10 = vld [vmem:[%s4798_s12 + $0x60] sm:$0xff] }
 0xc52   :  { %2079 = vmatpush.msra.mxu2 %v3203_v10 }
 0xc53   :  { %v1518_v51 = vmul.f32 0.044715, %v1514_v18 }
 0xc55   :  { %v1522_v20 = vadd.f32 %v1518_v51, %v1503_v17 }
 0xc57   :  { %v1526_v22 = vmul.f32 0.7978846, %v1522_v20 }
 0xc58   :  { %1818 = vadd.xlane.f32.xlu1 %v1817_v42 }
 0xc59   :  { %3366 = vtanh.f32 %v1526_v22 }
 0xc5f   :  { %v3367_v7 = vpop.eup %3366 }
 0xc60   :  { %v1534_v23 = vadd.f32 1.0, %v3367_v7 }
 0xc62   :  { %v1538_v28 = vmul.f32 0.5, %v1534_v23 }
 0xc64   :  { %v1542_v26 = vmul.f32 %v1538_v28, %v1503_v17  ;;  %v3176_v17 = vld [vmem:[%s4798_s12 + $0x40] sm:$0xff] }
 0xc65   :  { %1962 = vmatpush.msra.mxu1 %v3176_v17 }
 0xc66   :  { %1583 = vmatmul.f32.gmra.mxu2 %v1542_v26 }
 0xcba   :  { %v1792_v29 = vpop.xlane.xlu2 %1791 }
 0xcbb   :  { %v1802_v40 = vmul.f32 %v1792_v29, %v3695_v55 }
 0xcbd   :  { %v4300_v25 = vsub.f32 %v4277_v0, %v1802_v40 }
 0xcbe   :  { %v1505_v31 = vpop.f32.mrf.mxu1 }
 0xcbf   :  { %v1506_v61 = vadd.f32 %v4138_v34, %v1505_v31  ;;  %v1810_v45 = vmul.f32 %v4300_v25, %v4300_v25 }
 0xcc1   :  { %v1511_v24 = vmul.f32 %v1506_v61, %v1506_v61  ;;  %v1814_v32 = vsel %vm157_vm3, %v1810_v45, 0.0 }
 0xcc2   :  { %1815 = vadd.xlane.f32.xlu0 %v1814_v32  ;;  %v1801_v33 = vpop.xlane.xlu2 %1800 }
 0xcc3   :  { %v1515_v35 = vmul.f32 %v1511_v24, %v1506_v61  ;;  %v1805_v38 = vmul.f32 %v1801_v33, %v3695_v55  ;;  %v1798_v46 = vpop.xlane.xlu1 %1797  ;;  %v3197_v24 = vld [vmem:[%s4798_s12 + $0x38] sm:$0xff] }
 0xcc4   :  { %v1804_v58 = vmul.f32 %v1798_v46, %v3695_v55  ;;  %2037 = vmatpush.msra.mxu0 %v3197_v24 }
 0xcc5   :  { %v4309_v63 = vsub.f32 %v4282_v49, %v1805_v38  ;;  %v1519_v48 = vmul.f32 0.044715, %v1515_v35 }
 0xcc6   :  { %v4312_v34 = vsub.f32 %v4285_v6, %v1804_v58 }
 0xcc7   :  { %v1813_v50 = vmul.f32 %v4309_v63, %v4309_v63  ;;  %v1523_v43 = vadd.f32 %v1519_v48, %v1506_v61 }
 0xcc8   :  { %v1812_v21 = vmul.f32 %v4312_v34, %v4312_v34 }
 0xcc9   :  { %v1823_v56 = vsel %vm157_vm3, %v1813_v50, 0.0  ;;  %v1527_v62 = vmul.f32 0.7978846, %v1523_v43 }
 0xcca   :  { %1824 = vadd.xlane.f32.xlu0 %v1823_v56  ;;  %v1820_v57 = vsel %vm157_vm3, %v1812_v21, 0.0  ;;  %v3292_v21 = vld [vmem:[%s4804_s18 + $0xb] ss:$0 sm:$0xff] }
 0xccb   :  { %1821 = vadd.xlane.f32.xlu2 %v1820_v57  ;;  %3368 = vtanh.f32 %v1527_v62  ;;  %v1819_v44 = vpop.xlane.xlu1 %1818  ;;  %v3215_v62 = vld [vmem:[%s4798_s12 + $0xb8] sm:$0xff]  ;;  %v3196_v57 = vld [vmem:[%s4798_s12 + $0x30] sm:$0xff] }
 0xccc   :  { %v1827_v41 = vmul.f32 %v1819_v44, %v3695_v55  ;;  %2115 = vmatpush.msrb.mxu1 %v3215_v62  ;;  %2038 = vmatpush.msra.mxu0 %v3196_v57  ;;  %v3195_v44 = vld [vmem:[%s4798_s12 + $0x28] sm:$0xff] }
 0xcce   :  { %v4330_v15 = vadd.f32 1e-05, %v1827_v41  ;;  %2039 = vmatpush.msra.mxu0 %v3195_v44  ;;  %v4478_v44 = vld [vmem:[%s4799_s13 + $0x1] ss:$0 sm:$0xff] }
 0xcd0   :  { %3370 = vrsqrt.f32 %v4330_v15  ;;  %vm1850_vm6 = vweird.f32 %v4330_v15 }
 0xcd1   :  { %v3369_v60 = vpop.eup %3368 }
 0xcd2   :  { %v1535_v2 = vadd.f32 1.0, %v3369_v60 }
 0xcd4   :  { %v1539_v3 = vmul.f32 0.5, %v1535_v2 }
 0xcd6   :  { %v1543_v4 = vmul.f32 %v1539_v3, %v1506_v61  ;;  %v3371_v18 = vpop.eup %3370 }
 0xcd7   :  { %v1845_v20 = vmul.f32 %v3371_v18, %v4330_v15  ;;  %vm1851_vm1 = vweird.f32 %v3371_v18 }
 0xcd8   :  { %1586 = vmatmul.f32.gmra.mxu2 %v1543_v4  ;;  %vm4393_vm7 = vmor %vm1850_vm6, %vm1851_vm1  ;;  %v3214_v4 = vld [vmem:[%s4798_s12 + $0xb0] sm:$0xff] }
 0xcd9   :  { %v1846_v42 = vmul.f32 %v3371_v18, %v1845_v20  ;;  %2116 = vmatpush.msrb.mxu1 %v3214_v4  ;;  %v3234_v20 = vld [vmem:[%s4800_s14 + $0x18] sm:$0xff] }
 0xcdb   :  { %v1847_v40 = vmul.f32 0.5, %v1846_v42  ;;  %2117 = vmatpush.msrb.mxu1 %v3213_v13 }
 0xcdd   :  { %v1848_v32 = vsub.f32 1.5, %v1847_v40  ;;  %2118 = vmatpush.msrb.mxu1 %v3212_v16 }
 0xcdf   :  { %v1849_v58 = vmul.f32 %v3371_v18, %v1848_v32  ;;  %v3296_v32 = vld [vmem:[%s4799_s13 + $0x4] ss:$0 sm:$0xff] }
 0xce1   :  { %v1853_v41 = vsel %vm4393_vm7, %v3371_v18, %v1849_v58 }
 0xce2   :  { %v1875_v30 = vmul.f32 %v1853_v41, %v4291_v27 }
 0xce4   :  { %v1880_v27 = vmul.f32 %v3292_v21, %v1875_v30  ;;  %v4488_v30 = vld [vmem:[%s4799_s13 + $0x5] ss:$0 sm:$0xff] }
 0xce6   :  { %v1885_v19 = vadd.f32 %v3293_v14, %v1880_v27 }
 0xd35   :  { %v1816_v54 = vpop.xlane.xlu0 %1815 }
 0xd36   :  { %v1826_v37 = vmul.f32 %v1816_v54, %v3695_v55 }
 0xd38   :  { %v1830_v51 = vadd.f32 1e-05, %v1826_v37 }
 0xd3a   :  { %3372 = vrsqrt.f32 %v1830_v51  ;;  %vm1840_vm5 = vweird.f32 %v1830_v51 }
 0xd3d   :  { %v1825_v22 = vpop.xlane.xlu0 %1824 }
 0xd3e   :  { %v1829_v7 = vmul.f32 %v1825_v22, %v3695_v55  ;;  %v1822_v23 = vpop.xlane.xlu2 %1821 }
 0xd3f   :  { %v1828_v28 = vmul.f32 %v1822_v23, %v3695_v55  ;;  %v3233_v23 = vld [vmem:[%s4800_s14 + $0x10] sm:$0xff] }
 0xd40   :  { %v3373_v26 = vpop.eup %3372  ;;  %v4376_v29 = vadd.f32 1e-05, %v1829_v7 }
 0xd41   :  { %v1835_v31 = vmul.f32 %v3373_v26, %v1830_v51  ;;  %v1832_v61 = vadd.f32 1e-05, %v1828_v28  ;;  %vm1841_vm0 = vweird.f32 %v3373_v26  ;;  %v3295_v28 = vld [vmem:[%s4799_s13 + $0x2] ss:$0 sm:$0xff] }
 0xd42   :  { %3374 = vrsqrt.f32 %v4376_v29  ;;  %vm1842_vm2 = vmor %vm1840_vm5, %vm1841_vm0  ;;  %vm1870_vm12 = vweird.f32 %v4376_v29 }
 0xd43   :  { %v1836_v45 = vmul.f32 %v3373_v26, %v1835_v31  ;;  %3376 = vrsqrt.f32 %v1832_v61  ;;  %vm1860_vm9 = vweird.f32 %v1832_v61 }
 0xd45   :  { %v1837_v33 = vmul.f32 0.5, %v1836_v45  ;;  %v3294_v45 = vld [vmem:[%s4799_s13] ss:$0 sm:$0xff] }
 0xd47   :  { %v1838_v35 = vsub.f32 1.5, %v1837_v33  ;;  %v3297_v33 = vld [vmem:[%s4799_s13 + $0x3] ss:$0 sm:$0xff] }
 0xd48   :  { %v3375_v38 = vpop.eup %3374 }
 0xd49   :  { %v3377_v46 = vpop.eup %3376  ;;  %v1839_v48 = vmul.f32 %v3373_v26, %v1838_v35  ;;  %v1865_v50 = vmul.f32 %v3375_v38, %v4376_v29  ;;  %vm1871_vm11 = vweird.f32 %v3375_v38 }
 0xd4a   :  { %v1855_v43 = vmul.f32 %v3377_v46, %v1832_v61  ;;  %vm1861_vm8 = vweird.f32 %v3377_v46  ;;  %vm1872_vm13 = vmor %vm1870_vm12, %vm1871_vm11 }
 0xd4b   :  { %v1843_v56 = vsel %vm1842_vm2, %v3373_v26, %v1839_v48  ;;  %v1866_v12 = vmul.f32 %v3375_v38, %v1865_v50  ;;  %vm1862_vm10 = vmor %vm1860_vm9, %vm1861_vm8 }
 0xd4c   :  { %v1874_v2 = vmul.f32 %v1843_v56, %v4300_v25  ;;  %v1856_v3 = vmul.f32 %v3377_v46, %v1855_v43  ;;  %v3194_v25 = vld [vmem:[%s4798_s12 + $0x20] sm:$0xff] }
 0xd4d   :  { %2040 = vmatpush.msra.mxu0 %v3194_v25  ;;  %v1867_v47 = vmul.f32 0.5, %v1866_v12 }
 0xd4e   :  { %v1879_v15 = vmul.f32 %v3292_v21, %v1874_v2  ;;  %v1857_v9 = vmul.f32 0.5, %v1856_v3 }
 0xd4f   :  { %v1868_v59 = vsub.f32 1.5, %v1867_v47 }
 0xd50   :  { %v1884_v1 = vadd.f32 %v3293_v14, %v1879_v15  ;;  %v1858_v53 = vsub.f32 1.5, %v1857_v9 }
 0xd51   :  { %v1869_v5 = vmul.f32 %v3375_v38, %v1868_v59 }
 0xd52   :  { %v1859_v52 = vmul.f32 %v3377_v46, %v1858_v53  ;;  %3172 = vmatmul.msk.f32.vlgmr.msrb.gmra.mxu0 %vm157_vm3, %v1884_v1  ;;  %3181 = vmatmul.msk.f32.vlgmr.msra.gmra.mxu1 %vm157_vm3, %v1884_v1 }
 0xd53   :  { %3190 = vmatmul.msk.f32.vlgmr.msra.gmra.mxu3 %vm157_vm3, %v1884_v1  ;;  %3208 = vmatmul.msk.f32.vlgmr.msra.gmra.mxu2 %vm157_vm3, %v1884_v1  ;;  %v1873_v54 = vsel %vm1872_vm13, %v3375_v38, %v1869_v5 }
 0xd54   :  { %v1863_v8 = vsel %vm1862_vm10, %v3377_v46, %v1859_v52  ;;  %v1877_v18 = vmul.f32 %v1873_v54, %v4309_v63  ;;  %v4446_v63 = vpop.f32.mrf.mxu2  ;;  %2385 = vmatpush.msra.mxu1 %v3234_v20 }
 0xd55   :  { %v1876_v17 = vmul.f32 %v1863_v8, %v4312_v34 }
 0xd56   :  { %v1882_v34 = vmul.f32 %v3292_v21, %v1877_v18  ;;  %2386 = vmatpush.msra.mxu1 %v3233_v23 }
 0xd57   :  { %v1881_v10 = vmul.f32 %v3292_v21, %v1876_v17 }
 0xd58   :  { %v1887_v51 = vadd.f32 %v3293_v14, %v1882_v34 }
 0xd59   :  { %v1886_v37 = vadd.f32 %v3293_v14, %v1881_v10 }
 0xd5a   :  { %3173 = vmatmul.msk.f32.gmra.mxu0 %vm157_vm3, %v1885_v19  ;;  %3182 = vmatmul.msk.f32.gmra.mxu1 %vm157_vm3, %v1885_v19 }
 0xd5b   :  { %3191 = vmatmul.msk.f32.gmra.mxu3 %vm157_vm3, %v1885_v19  ;;  %3209 = vmatmul.msk.f32.gmra.mxu2 %vm157_vm3, %v1885_v19 }
 0xd5c   :  { %v4451_v42 = vpop.f32.mrf.mxu2 }
 0xd62   :  { %3174 = vmatmul.msk.f32.gmra.mxu0 %vm157_vm3, %v1886_v37  ;;  %3183 = vmatmul.msk.f32.gmra.mxu1 %vm157_vm3, %v1886_v37 }
 0xd63   :  { %3192 = vmatmul.msk.f32.gmra.mxu3 %vm157_vm3, %v1886_v37  ;;  %3210 = vmatmul.msk.f32.gmra.mxu2 %vm157_vm3, %v1886_v37 }
 0xd6a   :  { %3175 = vmatmul.msk.f32.gmra.mxu0 %vm157_vm3, %v1887_v51  ;;  %3184 = vmatmul.msk.f32.gmra.mxu1 %vm157_vm3, %v1887_v51 }
 0xd6b   :  { %3193 = vmatmul.msk.f32.gmra.mxu3 %vm157_vm3, %v1887_v51  ;;  %3211 = vmatmul.msk.f32.gmra.mxu2 %vm157_vm3, %v1887_v51 }
 0xd72   :  { %3199 = vmatmul.msk.f32.vlgmr.msra.gmra.mxu0 %vm157_vm3, %v1884_v1  ;;  %3217 = vmatmul.msk.f32.vlgmr.msrb.gmra.mxu1 %vm157_vm3, %v1884_v1 }
 0xd7a   :  { %3200 = vmatmul.msk.f32.gmra.mxu0 %vm157_vm3, %v1885_v19  ;;  %3218 = vmatmul.msk.f32.gmra.mxu1 %vm157_vm3, %v1885_v19 }
 0xd82   :  { %3201 = vmatmul.msk.f32.gmra.mxu0 %vm157_vm3, %v1886_v37  ;;  %3219 = vmatmul.msk.f32.gmra.mxu1 %vm157_vm3, %v1886_v37 }
 0xd8a   :  { %3202 = vmatmul.msk.f32.gmra.mxu0 %vm157_vm3, %v1887_v51  ;;  %3220 = vmatmul.msk.f32.gmra.mxu1 %vm157_vm3, %v1887_v51 }
 0xdcf   :  { %v1925_v22 = vpop.f32.mrf.mxu0  ;;  %v1964_v7 = vpop.f32.mrf.mxu1 }
 0xdd0   :  { %v1965_v24 = vadd.f32 %v3295_v28, %v1964_v7  ;;  %v1926_v43 = vadd.f32 %v3294_v45, %v1925_v22 }
 0xdd6   :  { %v2003_v26 = vpop.f32.mrf.mxu3  ;;  %v2081_v29 = vpop.f32.mrf.mxu2 }
 0xdd7   :  { %v1928_v40 = vpop.f32.mrf.mxu0  ;;  %v1967_v31 = vpop.f32.mrf.mxu1  ;;  %v2004_v21 = vadd.f32 %v3296_v32, %v2003_v26  ;;  %v2082_v56 = vadd.f32 %v3297_v33, %v2081_v29 }
 0xdd8   :  { %v1968_v61 = vadd.f32 %v3295_v28, %v1967_v31  ;;  %v1929_v2 = vadd.f32 %v3294_v45, %v1928_v40 }
 0xdda   :  { %3221 = vmatpush.xpose.msk.msrb.mxu3 %vm572_vm4, %v1968_v61 }
 0xdde   :  { %v2006_v35 = vpop.f32.mrf.mxu3  ;;  %v2084_v38 = vpop.f32.mrf.mxu2  ;;  %3222 = vmatpush.xpose.msk.msrb.mxu3 %vm572_vm4, %v1965_v24 }
 0xddf   :  { %v2007_v46 = vadd.f32 %v3296_v32, %v2006_v35  ;;  %v2085_v58 = vadd.f32 %v3297_v33, %v2084_v38  ;;  %v1931_v48 = vpop.f32.mrf.mxu0  ;;  %v1970_v50 = vpop.f32.mrf.mxu1 }
 0xde0   :  { %v1971_v4 = vadd.f32 %v3295_v28, %v1970_v50  ;;  %v1932_v17 = vadd.f32 %v3294_v45, %v1931_v48 }
 0xde1   :  { %3227 = vmatpush.xpose.msk.msrb.mxu0 %vm572_vm4, %v2085_v58  ;;  %3223 = vmatmul.msk.f32.vlgmr.msrb.gmra.mxu3 %vm572_vm4, %v1926_v43 }
 0xde2   :  { %2237 = vmatpush.msra.mxu3 %v2007_v46 }
 0xde4   :  { %2238 = vmatpush.msra.mxu3 %v2004_v21 }
 0xde5   :  { %3228 = vmatpush.xpose.msk.msrb.mxu0 %vm572_vm4, %v2082_v56 }
 0xde6   :  { %v2087_v62 = vpop.f32.mrf.mxu2  ;;  %v2009_v41 = vpop.f32.mrf.mxu3 }
 0xde7   :  { %v1934_v57 = vpop.f32.mrf.mxu0  ;;  %v1973_v60 = vpop.f32.mrf.mxu1  ;;  %v2088_v9 = vadd.f32 %v3297_v33, %v2087_v62  ;;  %v2010_v8 = vadd.f32 %v3296_v32, %v2009_v41 }
 0xde8   :  { %v1974_v3 = vadd.f32 %v3295_v28, %v1973_v60  ;;  %v1935_v10 = vadd.f32 %v3294_v45, %v1934_v57 }
 0xde9   :  { %3224 = vmatmul.msk.f32.gmra.mxu3 %vm572_vm4, %v1929_v2 }
 0xdea   :  { %3239 = vmatpush.xpose.msk.msra.mxu0 %vm572_vm4, %v1974_v3  ;;  %v2247_v3 = vld [vmem:[%s4800_s14 + $0x8] sm:$0xff] }
 0xdeb   :  { %2414 = vmatpush.msrb.mxu3 %v2247_v3 }
 0xdee   :  { %v2090_v12 = vpop.f32.mrf.mxu2  ;;  %3240 = vmatpush.xpose.msk.msra.mxu0 %vm572_vm4, %v1971_v4  ;;  %v2012_v47 = vpop.f32.mrf.mxu3  ;;  %v2246_v4 = vld [vmem:[%s4800_s14] sm:$0xff]  ;;  %s3041_s14 = sshll.u32 %s4806_s20, 4  ;;  %s3042_s14 = int_to_ptr.hbm [resolvable:$true] %s3041_s14 }
 0xdef   :  { %v2091_v13 = vadd.f32 %v3297_v33, %v2090_v12  ;;  %v2042_v25 = vpop.f32.mrf.mxu0  ;;  %v2120_v14 = vpop.f32.mrf.mxu1  ;;  %v2013_v59 = vadd.f32 %v3296_v32, %v2012_v47  ;;  %2415 = vmatpush.msrb.mxu3 %v2246_v4 }
 0xdf0   :  { %v2043_v15 = vadd.f32 %v4478_v44, %v2042_v25  ;;  %v2121_v27 = vadd.f32 %v4488_v30, %v2120_v14 }
 0xdf1   :  { %3245 = vmatpush.xpose.msk.msrb.mxu1 %vm572_vm4, %v2091_v13 }
 0xdf2   :  { %3229 = vmatmul.msk.f32.vlgmr.msrb.gmra.mxu0 %vm572_vm4, %v2043_v15 }
 0xdf3   :  { %2671 = vmatpush.msrb.mxu0 %v3234_v20 }
 0xdf5   :  { %3246 = vmatpush.xpose.msk.msrb.mxu1 %vm572_vm4, %v2088_v9  ;;  %2672 = vmatpush.msrb.mxu0 %v3233_v23 }
 0xdf7   :  { %v2045_v1 = vpop.f32.mrf.mxu0  ;;  %v2123_v53 = vpop.f32.mrf.mxu1 }
 0xdf8   :  { %v2046_v16 = vadd.f32 %v4478_v44, %v2045_v1  ;;  %v2124_v52 = vadd.f32 %v4488_v30, %v2123_v53 }
 0xdfa   :  { %3230 = vmatmul.msk.f32.gmra.mxu0 %vm572_vm4, %v2046_v16  ;;  %2353 = vmatpush.msrb.mxu2 %v2124_v52 }
 0xdfc   :  { %2354 = vmatpush.msrb.mxu2 %v2121_v27 }
 0xdfe   :  { %2528 = vmatpush.msra.mxu2 %v2013_v59 }
 0xdff   :  { %v2048_v19 = vpop.f32.mrf.mxu0 }
 0xe00   :  { %2529 = vmatpush.msra.mxu2 %v2010_v8  ;;  %v4495_v5 = vadd.f32 %v4478_v44, %v2048_v19 }
 0xe02   :  { %3241 = vmatmul.msk.f32.vlgmr.msra.gmra.mxu0 %vm572_vm4, %v1932_v17 }
 0xe07   :  { %v4499_v54 = vpop.f32.mrf.mxu0 }
 0xe0a   :  { %3242 = vmatmul.msk.f32.gmra.mxu0 %vm572_vm4, %v1935_v10 }
 0xe64   :  { %v2161_v7 = vpop.f32.mrf.mxu3 }
 0xe65   :  { %v2167_v23 = vmul.f32 0.25, %v2161_v7 }
 0xe67   :  { %v2169_v28 = vsel %vm572_vm4, %v2167_v23, -inf }
 0xe6c   :  { %v2164_v33 = vpop.f32.mrf.mxu3 }
 0xe6d   :  { %v2168_v35 = vmul.f32 0.25, %v2164_v33 }
 0xe6f   :  { %v2277_v18 = vpop.f32.mrf.mxu0  ;;  %v2172_v50 = vsel %vm572_vm4, %v2168_v35, -inf }
 0xe70   :  { %v2283_v37 = vmul.f32 0.25, %v2277_v18 }
 0xe72   :  { %v2285_v34 = vsel %vm572_vm4, %v2283_v37, -inf }
 0xe73   :  { %2286 = vmax.xlane.f32.xlu1 %v2285_v34 }
 0xe77   :  { %v2280_v51 = vpop.f32.mrf.mxu0 }
 0xe78   :  { %v2284_v20 = vmul.f32 0.25, %v2280_v51 }
 0xe7a   :  { %v2288_v22 = vsel %vm572_vm4, %v2284_v20, -inf }
 0xe7b   :  { %2289 = vmax.xlane.f32.xlu2 %v2288_v22 }
 0xe7f   :  { %v2452_v21 = vpop.f32.mrf.mxu0 }
 0xe80   :  { %v4510_v56 = vmul.f32 0.25, %v2452_v21 }
 0xe82   :  { %v2460_v57 = vsel %vm572_vm4, %v4510_v56, -inf }
 0xe83   :  { %2170 = vmax.xlane.f32.xlu2 %v2169_v28 }
 0xe87   :  { %v2455_v7 = vpop.f32.mrf.mxu0 }
 0xee6   :  { %v2287_v26 = vpop.xlane.xlu1 %2286 }
 0xee7   :  { %v2291_v29 = vsub.f32 %v2283_v37, %v2287_v26 }
 0xee9   :  { %v2293_v40 = vmul.f32 1.442695, %v2291_v29 }
 0xeeb   :  { %3378 = vpow2.f32 %v2293_v40  ;;  %v4529_v40 = vmul.f32 0.25, %v2455_v7 }
 0xeee   :  { %v2290_v31 = vpop.xlane.xlu2 %2289 }
 0xeef   :  { %v2292_v61 = vsub.f32 %v2284_v20, %v2290_v31 }
 0xef1   :  { %v3379_v45 = vpop.eup %3378  ;;  %v2295_v24 = vmul.f32 1.442695, %v2292_v61 }
 0xef2   :  { %v2297_v32 = vsel %vm572_vm4, %v3379_v45, 0.0 }
 0xef3   :  { %3380 = vpow2.f32 %v2295_v24  ;;  %2298 = vadd.xlane.f32.xlu0 %v2297_v32 }
 0xef6   :  { %v2171_v38 = vpop.xlane.xlu2 %2170 }
 0xef7   :  { %v2175_v46 = vsub.f32 %v2167_v23, %v2171_v38  ;;  %v2126_v23 = vpop.f32.mrf.mxu1 }
 0xef9   :  { %v4505_v58 = vpop.eup %3380  ;;  %v2177_v48 = vmul.f32 1.442695, %v2175_v46  ;;  %v2463_v46 = vsel %vm572_vm4, %v4529_v40, -inf }
 0xefa   :  { %v2300_v43 = vsel %vm572_vm4, %v4505_v58, 0.0 }
 0xefb   :  { %3382 = vpow2.f32 %v2177_v48  ;;  %2173 = vmax.xlane.f32.xlu0 %v2172_v50  ;;  %2301 = vadd.xlane.f32.xlu1 %v2300_v43 }
 0xeff   :  { %v2129_v43 = vpop.f32.mrf.mxu1 }
 0xf01   :  { %v4512_v62 = vpop.eup %3382 }
 0xf02   :  { %v2181_v60 = vsel %vm572_vm4, %v4512_v62, 0.0 }
 0xf03   :  { %2461 = vmax.xlane.f32.xlu0 %v2460_v57  ;;  %2182 = vadd.xlane.f32.xlu1 %v2181_v60  ;;  %v2130_v60 = vadd.f32 %v4488_v30, %v2129_v43 }
 0xf66   :  { %v2299_v2 = vpop.xlane.xlu0 %2298 }
 0xf67   :  { %3384 = vrcp.f32 %v2299_v2  ;;  %v2314_v9 = vand.u32 2147483648, %v2299_v2  ;;  %v2312_v47 = vand.u32 2147483647, %v2299_v2  ;;  %vm2308_vm15 = vweird.f32 %v2299_v2 }
 0xf69   :  { %v2315_v27 = vor.u32 1.1754944e-38, %v2314_v9  ;;  %vm2313_vm1 = vcmp.eq.f32.partialorder %v2312_v47, 8.507059e+37 }
 0xf6d   :  { %v3385_v41 = vpop.eup %3384 }
 0xf6e   :  { %v2304_v12 = vmul.f32 %v3385_v41, %v2299_v2  ;;  %v2174_v13 = vpop.xlane.xlu0 %2173  ;;  %v2302_v25 = vpop.xlane.xlu1 %2301  ;;  %vm2309_vm14 = vweird.f32 %v3385_v41  ;;  %v2127_v2 = vadd.f32 %v4488_v30, %v2126_v23 }
 0xf6f   :  { %v2176_v14 = vsub.f32 %v2168_v35, %v2174_v13  ;;  %3386 = vrcp.f32 %v2302_v25  ;;  %vm2310_vm0 = vmor %vm2308_vm15, %vm2309_vm14  ;;  %v2329_v34 = vand.u32 2147483648, %v2302_v25  ;;  %v2327_v20 = vand.u32 2147483647, %v2302_v25 }
 0xf70   :  { %v2305_v15 = vsub.f32 1.0, %v2304_v12  ;;  %vm2323_vm2 = vweird.f32 %v2302_v25 }
 0xf71   :  { %v2179_v1 = vmul.f32 1.442695, %v2176_v14  ;;  %v2330_v29 = vor.u32 1.1754944e-38, %v2329_v34  ;;  %vm2328_vm7 = vcmp.eq.f32.partialorder %v2327_v20, 8.507059e+37 }
 0xf72   :  { %v2306_v53 = vmul.f32 %v3385_v41, %v2305_v15 }
 0xf73   :  { %3388 = vpow2.f32 %v2179_v1 }
 0xf74   :  { %v2307_v16 = vadd.f32 %v3385_v41, %v2306_v53 }
 0xf75   :  { %v3387_v52 = vpop.eup %3386 }
 0xf76   :  { %v2311_v59 = vsel %vm2310_vm0, %v3385_v41, %v2307_v16  ;;  %v2319_v8 = vmul.f32 %v3387_v52, %v2302_v25  ;;  %v2183_v19 = vpop.xlane.xlu1 %2182  ;;  %vm2324_vm5 = vweird.f32 %v3387_v52 }
 0xf77   :  { %v2316_v17 = vsel %vm2313_vm1, %v2315_v27, %v2311_v59  ;;  %3390 = vrcp.f32 %v2183_v19  ;;  %vm2325_vm6 = vmor %vm2323_vm2, %vm2324_vm5  ;;  %v2198_v33 = vand.u32 2147483648, %v2183_v19  ;;  %v2196_v38 = vand.u32 2147483647, %v2183_v19  ;;  %v2462_v59 = vpop.xlane.xlu0 %2461 }
 0xf78   :  { %v2317_v10 = vmul.f32 %v3379_v45, %v2316_v17  ;;  %v2320_v18 = vsub.f32 1.0, %v2319_v8  ;;  %vm2192_vm9 = vweird.f32 %v2183_v19 }
 0xf79   :  { %v4524_v37 = vpop.eup %3388  ;;  %v2199_v50 = vor.u32 1.1754944e-38, %v2198_v33  ;;  %vm2197_vm11 = vcmp.eq.f32.partialorder %v2196_v38, 8.507059e+37 }
 0xf7a   :  { %v2321_v51 = vmul.f32 %v3387_v52, %v2320_v18  ;;  %3231 = vmatmul.msk.f32.vlgmr.msrb.gmra.mxu2 %vm572_vm4, %v2317_v10  ;;  %v2184_v22 = vsel %vm572_vm4, %v4524_v37, 0.0 }
 0xf7b   :  { %2185 = vadd.xlane.f32.xlu2 %v2184_v22  ;;  %2700 = vmatpush.msrb.mxu2 %v2247_v3 }
 0xf7c   :  { %v2322_v28 = vadd.f32 %v3387_v52, %v2321_v51 }
 0xf7d   :  { %v3391_v26 = vpop.eup %3390  ;;  %2701 = vmatpush.msrb.mxu2 %v2246_v4 }
 0xf7e   :  { %v2188_v31 = vmul.f32 %v3391_v26, %v2183_v19  ;;  %v2326_v61 = vsel %vm2325_vm6, %v3387_v52, %v2322_v28  ;;  %vm2193_vm8 = vweird.f32 %v3391_v26  ;;  %v2052_v52 = vadd.f32 %v4478_v44, %v4499_v54 }
 0xf7f   :  { %v2331_v45 = vsel %vm2328_vm7, %v2330_v29, %v2326_v61  ;;  %vm2194_vm10 = vmor %vm2192_vm9, %vm2193_vm8  ;;  %v2466_v19 = vsub.f32 %v4510_v56, %v2462_v59 }
 0xf80   :  { %v2189_v24 = vsub.f32 1.0, %v2188_v31  ;;  %v2332_v32 = vmul.f32 %v4505_v58, %v2331_v45 }
 0xf81   :  { %v2468_v10 = vmul.f32 1.442695, %v2466_v19 }
 0xf82   :  { %v2190_v35 = vmul.f32 %v3391_v26, %v2189_v24  ;;  %3232 = vmatmul.msk.f32.gmra.mxu2 %vm572_vm4, %v2332_v32 }
 0xf83   :  { %2464 = vmax.xlane.f32.xlu2 %v2463_v46  ;;  %v4563_v46 = vld [vmem:[%s4804_s18 + $0xd] ss:$0 sm:$0xff] }
 0xf84   :  { %v2191_v48 = vadd.f32 %v3391_v26, %v2190_v35 }
 0xf86   :  { %v2195_v21 = vsel %vm2194_vm10, %v3391_v26, %v2191_v48 }
 0xf87   :  { %v2200_v57 = vsel %vm2197_vm11, %v2199_v50, %v2195_v21 }
 0xf88   :  { %v2201_v58 = vmul.f32 %v4512_v62, %v2200_v57 }
 0xf8a   :  { %3225 = vmatmul.msk.f32.vlgmr.msra.gmra.mxu3 %vm572_vm4, %v2201_v58 }
 0xf8b   :  { %2642 = vmatpush.msra.mxu3 %v2130_v60 }
 0xf8d   :  { %2643 = vmatpush.msra.mxu3 %v2127_v2 }
 0xfee   :  { %v2186_v3 = vpop.xlane.xlu2 %2185 }
 0xfef   :  { %3392 = vrcp.f32 %v2186_v3  ;;  %v2213_v13 = vand.u32 2147483648, %v2186_v3  ;;  %v2211_v14 = vand.u32 2147483647, %v2186_v3  ;;  %vm2207_vm13 = vweird.f32 %v2186_v3 }
 0xff0   :  { %3394 = vpow2.f32 %v2468_v10 }
 0xff1   :  { %v2214_v62 = vor.u32 1.1754944e-38, %v2213_v13  ;;  %vm2212_vm15 = vcmp.eq.f32.partialorder %v2211_v14, 8.507059e+37 }
 0xff5   :  { %v3393_v4 = vpop.eup %3392 }
 0xff6   :  { %v2203_v41 = vmul.f32 %v3393_v4, %v2186_v3  ;;  %vm2208_vm12 = vweird.f32 %v3393_v4  ;;  %v2465_v18 = vpop.xlane.xlu2 %2464  ;;  %v3395_v54 = vpop.eup %3394 }
 0xff7   :  { %vm2209_vm14 = vmor %vm2207_vm13, %vm2208_vm12  ;;  %v2472_v7 = vsel %vm572_vm4, %v3395_v54, 0.0 }
 0xff8   :  { %v2204_v12 = vsub.f32 1.0, %v2203_v41 }
 0xffa   :  { %v2205_v25 = vmul.f32 %v3393_v4, %v2204_v12 }
 0xffc   :  { %v2206_v15 = vadd.f32 %v3393_v4, %v2205_v25 }
 0xffd   :  { %v2356_v9 = vpop.f32.mrf.mxu2 }
 0xffe   :  { %3235 = vmatmul.msk.f32.vlgmr.msra.gmra.mxu1 %vm572_vm4, %v2356_v9  ;;  %v2210_v1 = vsel %vm2209_vm14, %v3393_v4, %v2206_v15 }
 0xfff   :  { %v2215_v30 = vsel %vm2212_vm15, %v2214_v62, %v2210_v1 }
0x1000   :  { %v2216_v53 = vmul.f32 %v4524_v37, %v2215_v30 }
0x1002   :  { %3226 = vmatmul.msk.f32.gmra.mxu3 %vm572_vm4, %v2216_v53 }
0x1005   :  { %v2359_v47 = vpop.f32.mrf.mxu2 }
0x1006   :  { %3236 = vmatmul.msk.f32.gmra.mxu1 %vm572_vm4, %v2359_v47 }
0x100d   :  { %v2240_v16 = vpop.f32.mrf.mxu3 }
0x100e   :  { %3237 = vmatmul.msk.f32.vlgmr.msrb.gmra.mxu3 %vm572_vm4, %v2240_v16  ;;  %3247 = vmatmul.msk.f32.vlgmr.msrb.gmra.mxu1 %vm572_vm4, %v4495_v5  ;;  %v2467_v5 = vsub.f32 %v4529_v40, %v2465_v18 }
0x1010   :  { %v2470_v44 = vmul.f32 1.442695, %v2467_v5 }
0x1012   :  { %3396 = vpow2.f32 %v2470_v44 }
0x1016   :  { %3248 = vmatmul.msk.f32.gmra.mxu1 %vm572_vm4, %v2052_v52 }
0x1018   :  { %v4555_v23 = vpop.eup %3396 }
0x1019   :  { %v2475_v28 = vsel %vm572_vm4, %v4555_v23, 0.0 }
0x107b   :  { %v2388_v27 = vpop.f32.mrf.mxu1 }
0x1083   :  { %v2391_v8 = vpop.f32.mrf.mxu1 }
0x1085   :  { %v2243_v17 = vpop.f32.mrf.mxu3 }
0x1086   :  { %3238 = vmatmul.msk.f32.gmra.mxu3 %vm572_vm4, %v2243_v17 }
0x108b   :  { %v2566_v37 = vpop.f32.mrf.mxu1 }
0x108c   :  { %v2572_v34 = vmul.f32 0.25, %v2566_v37 }
0x108e   :  { %v2574_v51 = vsel %vm572_vm4, %v2572_v34, -inf }
0x108f   :  { %2575 = vmax.xlane.f32.xlu1 %v2574_v51 }
0x1091   :  { %v2417_v26 = vpop.f32.mrf.mxu3 }
0x1092   :  { %v2418_v61 = vadd.f32 %v2417_v26, %v2388_v27 }
0x1093   :  { %v2569_v20 = vpop.f32.mrf.mxu1 }
0x1094   :  { %v2573_v22 = vmul.f32 0.25, %v2569_v20  ;;  %v2709_v50 = vadd.f32 %v2418_v61, %v4277_v0 }
0x1096   :  { %v2577_v56 = vsel %vm572_vm4, %v2573_v22, -inf  ;;  %v2714_v60 = vadd.f32 %v4563_v46, %v2709_v50 }
0x1097   :  { %2578 = vmax.xlane.f32.xlu0 %v2577_v56  ;;  %2473 = vadd.xlane.f32.xlu1 %v2472_v7 }
0x1098   :  { %v2718_v12 = vsel %vm157_vm3, %v2714_v60, 0.0 }
0x109f   :  { %2476 = vadd.xlane.f32.xlu0 %v2475_v28 }
0x1102   :  { %v2576_v29 = vpop.xlane.xlu1 %2575 }
0x1103   :  { %v2580_v40 = vsub.f32 %v2572_v34, %v2576_v29 }
0x1105   :  { %v2582_v31 = vmul.f32 1.442695, %v2580_v40 }
0x1107   :  { %3398 = vpow2.f32 %v2582_v31 }
0x1109   :  { %v2420_v45 = vpop.f32.mrf.mxu3 }
0x110a   :  { %v2421_v24 = vadd.f32 %v2420_v45, %v2391_v8  ;;  %v2579_v32 = vpop.xlane.xlu0 %2578  ;;  %v2474_v33 = vpop.xlane.xlu1 %2473 }
0x110b   :  { %v2581_v35 = vsub.f32 %v2573_v22, %v2579_v32  ;;  %3400 = vrcp.f32 %v2474_v33  ;;  %v2489_v41 = vand.u32 2147483648, %v2474_v33  ;;  %v2487_v25 = vand.u32 2147483647, %v2474_v33 }
0x110c   :  { %v2710_v38 = vadd.f32 %v2421_v24, %v4229_v11  ;;  %vm2483_vm1 = vweird.f32 %v2474_v33 }
0x110d   :  { %v4565_v48 = vpop.eup %3398  ;;  %v2584_v43 = vmul.f32 1.442695, %v2581_v35  ;;  %v2490_v9 = vor.u32 1.1754944e-38, %v2489_v41  ;;  %vm2488_vm2 = vcmp.eq.f32.partialorder %v2487_v25, 8.507059e+37 }
0x110e   :  { %v4569_v21 = vadd.f32 %v4563_v46, %v2710_v38  ;;  %v2586_v57 = vsel %vm572_vm4, %v4565_v48, 0.0 }
0x110f   :  { %3402 = vpow2.f32 %v2584_v43  ;;  %2587 = vadd.xlane.f32.xlu2 %v2586_v57 }
0x1110   :  { %v2721_v11 = vsel %vm157_vm3, %v4569_v21, 0.0 }
0x1111   :  { %v3401_v58 = vpop.eup %3400  ;;  %2722 = vadd.xlane.f32.xlu0 %v2721_v11 }
0x1112   :  { %v2479_v2 = vmul.f32 %v3401_v58, %v2474_v33  ;;  %v2477_v3 = vpop.xlane.xlu0 %2476  ;;  %vm2484_vm0 = vweird.f32 %v3401_v58 }
0x1113   :  { %3404 = vrcp.f32 %v2477_v3  ;;  %vm2485_vm5 = vmor %vm2483_vm1, %vm2484_vm0  ;;  %v2504_v52 = vand.u32 2147483648, %v2477_v3  ;;  %v2502_v59 = vand.u32 2147483647, %v2477_v3  ;;  %vm2498_vm7 = vweird.f32 %v2477_v3 }
0x1114   :  { %v2480_v0 = vsub.f32 1.0, %v2479_v2 }
0x1115   :  { %v4576_v4 = vpop.eup %3402  ;;  %v2505_v19 = vor.u32 1.1754944e-38, %v2504_v52  ;;  %vm2503_vm9 = vcmp.eq.f32.partialorder %v2502_v59, 8.507059e+37 }
0x1116   :  { %v2481_v13 = vmul.f32 %v3401_v58, %v2480_v0  ;;  %v2589_v14 = vsel %vm572_vm4, %v4576_v4, 0.0  ;;  %v2818_v0 = vld [vmem:[%s4801_s15 + $0x10] sm:$0xff] }
0x1117   :  { %2590 = vadd.xlane.f32.xlu1 %v2589_v14  ;;  %2719 = vadd.xlane.f32.xlu2 %v2718_v12  ;;  %v2816_v12 = vld [vmem:[%s4801_s15] sm:$0xff] }
0x1118   :  { %v2482_v15 = vadd.f32 %v3401_v58, %v2481_v13 }
0x1119   :  { %v3405_v62 = vpop.eup %3404 }
0x111a   :  { %v2486_v1 = vsel %vm2485_vm5, %v3401_v58, %v2482_v15  ;;  %v2494_v30 = vmul.f32 %v3405_v62, %v2477_v3  ;;  %vm2499_vm6 = vweird.f32 %v3405_v62  ;;  %v2819_v3 = vld [vmem:[%s4801_s15 + $0x18] sm:$0xff] }
0x111b   :  { %v2491_v53 = vsel %vm2488_vm2, %v2490_v9, %v2486_v1  ;;  %vm2500_vm8 = vmor %vm2498_vm7, %vm2499_vm6  ;;  %2845 = vmatpush.msra.mxu1 %v2819_v3 }
0x111c   :  { %v2492_v47 = vmul.f32 %v3395_v54, %v2491_v53  ;;  %v2495_v16 = vsub.f32 1.0, %v2494_v30 }
0x111d   :  { %2846 = vmatpush.msra.mxu1 %v2818_v0 }
0x111e   :  { %v2496_v27 = vmul.f32 %v3405_v62, %v2495_v16  ;;  %3243 = vmatmul.msk.f32.vlgmr.msra.gmra.mxu2 %vm572_vm4, %v2492_v47  ;;  %v4611_v16 = vld [vmem:[%s4804_s18 + $0xe] ss:$0 sm:$0xff] }
0x1120   :  { %v2497_v8 = vadd.f32 %v3405_v62, %v2496_v27  ;;  %v4616_v27 = vld [vmem:[%s4804_s18 + $0xf] ss:$0 sm:$0xff] }
0x1122   :  { %v2501_v17 = vsel %vm2500_vm8, %v3405_v62, %v2497_v8 }
0x1123   :  { %v2506_v10 = vsel %vm2503_vm9, %v2505_v19, %v2501_v17 }
0x1124   :  { %v2507_v18 = vmul.f32 %v4555_v23, %v2506_v10  ;;  %v2913_v10 = vld [vmem:[%s4802_s16 + $0x78] sm:$0xff] }
0x1125   :  { %2915 = vmatpush.msrb.mxu3 %v2913_v10 }
0x1126   :  { %3244 = vmatmul.msk.f32.gmra.mxu2 %vm572_vm4, %v2507_v18  ;;  %v2912_v18 = vld [vmem:[%s4802_s16 + $0x70] sm:$0xff] }
0x1127   :  { %2916 = vmatpush.msrb.mxu3 %v2912_v18 }
0x1182   :  { %v2588_v37 = vpop.xlane.xlu2 %2587 }
0x1183   :  { %3406 = vrcp.f32 %v2588_v37  ;;  %v2603_v22 = vand.u32 2147483648, %v2588_v37  ;;  %v2601_v7 = vand.u32 2147483647, %v2588_v37  ;;  %vm2597_vm11 = vweird.f32 %v2588_v37 }
0x1184   :  { %v4598_v41 = vpop.xlane.xlu0 %2722 }
0x1185   :  { %v2604_v40 = vor.u32 1.1754944e-38, %v2603_v22  ;;  %vm2602_vm13 = vcmp.eq.f32.partialorder %v2601_v7, 8.507059e+37  ;;  %v2904_v22 = vld [vmem:[%s4802_s16 + $0x30] sm:$0xff]  ;;  %v2902_v7 = vld [vmem:[%s4802_s16 + $0x20] sm:$0xff] }
0x1189   :  { %v3407_v34 = vpop.eup %3406 }
0x118a   :  { %v2593_v5 = vmul.f32 %v3407_v34, %v2588_v37  ;;  %v2591_v51 = vpop.xlane.xlu1 %2590  ;;  %v2720_v44 = vpop.xlane.xlu2 %2719  ;;  %vm2598_vm10 = vweird.f32 %v3407_v34  ;;  %v2911_v37 = vld [vmem:[%s4802_s16 + $0x68] sm:$0xff] }
0x118b   :  { %3408 = vrcp.f32 %v2591_v51  ;;  %v2730_v20 = vmul.f32 %v2720_v44, %v3695_v55  ;;  %vm2599_vm12 = vmor %vm2597_vm11, %vm2598_vm10  ;;  %v2618_v35 = vand.u32 2147483648, %v2591_v51  ;;  %v2616_v50 = vand.u32 2147483647, %v2591_v51  ;;  %2917 = vmatpush.msrb.mxu3 %v2911_v37  ;;  %v2907_v44 = vld [vmem:[%s4802_s16 + $0x48] sm:$0xff] }
0x118c   :  { %v2594_v54 = vsub.f32 1.0, %v2593_v5  ;;  %vm2612_vm15 = vweird.f32 %v2591_v51  ;;  %v2909_v5 = vld [vmem:[%s4802_s16 + $0x58] sm:$0xff] }
0x118d   :  { %v2734_v28 = vsub.f32 %v2714_v60, %v2730_v20  ;;  %v2619_v57 = vor.u32 1.1754944e-38, %v2618_v35  ;;  %vm2617_vm1 = vcmp.eq.f32.partialorder %v2616_v50, 8.507059e+37  ;;  %v2905_v20 = vld [vmem:[%s4802_s16 + $0x38] sm:$0xff] }
0x118e   :  { %v2595_v56 = vmul.f32 %v3407_v34, %v2594_v54  ;;  %v2906_v54 = vld [vmem:[%s4802_s16 + $0x40] sm:$0xff] }
0x118f   :  { %v2738_v23 = vmul.f32 %v2734_v28, %v2734_v28 }
0x1190   :  { %v2596_v26 = vadd.f32 %v3407_v34, %v2595_v56  ;;  %v2903_v56 = vld [vmem:[%s4802_s16 + $0x28] sm:$0xff] }
0x1191   :  { %v3409_v29 = vpop.eup %3408  ;;  %v2742_v45 = vsel %vm157_vm3, %v2738_v23, 0.0 }
0x1192   :  { %v2600_v31 = vsel %vm2599_vm12, %v3407_v34, %v2596_v26  ;;  %v2608_v61 = vmul.f32 %v3409_v29, %v2591_v51  ;;  %2743 = vadd.xlane.f32.xlu0 %v2742_v45  ;;  %vm2613_vm14 = vweird.f32 %v3409_v29  ;;  %v2910_v34 = vld [vmem:[%s4802_s16 + $0x60] sm:$0xff]  ;;  %v2908_v51 = vld [vmem:[%s4802_s16 + $0x50] sm:$0xff]  ;;  %v2731_v45 = vmul.f32 %v4598_v41, %v3695_v55 }
0x1193   :  { %v2605_v24 = vsel %vm2602_vm13, %v2604_v40, %v2600_v31  ;;  %vm2614_vm0 = vmor %vm2612_vm15, %vm2613_vm14  ;;  %2918 = vmatpush.msrb.mxu3 %v2910_v34  ;;  %v2900_v26 = vld [vmem:[%s4802_s16 + $0x10] sm:$0xff] }
0x1194   :  { %v2606_v32 = vmul.f32 %v4565_v48, %v2605_v24  ;;  %v2609_v33 = vsub.f32 1.0, %v2608_v61  ;;  %v2898_v61 = vld [vmem:[%s4802_s16] sm:$0xff]  ;;  %v2735_v35 = vsub.f32 %v4569_v21, %v2731_v45 }
0x1195   :  { %2919 = vmatpush.msrb.mxu3 %v2909_v5 }
0x1196   :  { %v2610_v38 = vmul.f32 %v3409_v29, %v2609_v33  ;;  %3249 = vmatmul.msk.f32.vlgmr.msra.gmra.mxu3 %vm572_vm4, %v2606_v32  ;;  %v4677_v33 = vld [vmem:[%s4805_s19 + $0x1] ss:$0 sm:$0xff]  ;;  %s3495_s19 = smov [#allocation2]  }
0x1197   :  { %2920 = vmatpush.msrb.mxu3 %v2908_v51  ;;  %s3039_s21 = sshll.u32 %s3495_s19, 4  ;;  %s3040_s21 = int_to_ptr.vmem [resolvable:$true] %s3039_s21 }
0x1198   :  { %v2611_v43 = vadd.f32 %v3409_v29, %v2610_v38 }
0x1199   :  { %2921 = vmatpush.msrb.mxu3 %v2907_v44 }
0x119a   :  { %v2615_v11 = vsel %vm2614_vm0, %v3409_v29, %v2611_v43  ;;  %v2899_v29 = vld [vmem:[%s4802_s16 + $0x8] sm:$0xff] }
0x119b   :  { %v2620_v58 = vsel %vm2617_vm1, %v2619_v57, %v2615_v11  ;;  %2922 = vmatpush.msrb.mxu3 %v2906_v54 }
0x119c   :  { %v2621_v60 = vmul.f32 %v4576_v4, %v2620_v58  ;;  %v2817_v4 = vld [vmem:[%s4801_s15 + $0x8] sm:$0xff] }
0x119d   :  { %2847 = vmatpush.msra.mxu1 %v2817_v4  ;;  %2923 = vmatpush.msrb.mxu3 %v2905_v20 }
0x119e   :  { %3250 = vmatmul.msk.f32.gmra.mxu3 %vm572_vm4, %v2621_v60  ;;  %v2739_v60 = vmul.f32 %v2735_v35, %v2735_v35 }
0x119f   :  { %2848 = vmatpush.msra.mxu1 %v2816_v12  ;;  %2924 = vmatpush.msrb.mxu3 %v2904_v22 }
0x11a0   :  { %v2745_v0 = vsel %vm157_vm3, %v2739_v60, 0.0 }
0x11a1   :  { %v2531_v2 = vpop.f32.mrf.mxu2  ;;  %2925 = vmatpush.msrb.mxu3 %v2903_v56 }
0x11a2   :  { %3253 = vmatmul.msk.f32.vlgmr.msrb.gmra.mxu2 %vm572_vm4, %v2531_v2 }
0x11a3   :  { %2926 = vmatpush.msrb.mxu3 %v2902_v7 }
0x11a9   :  { %v2534_v48 = vpop.f32.mrf.mxu2 }
0x11aa   :  { %3254 = vmatmul.msk.f32.gmra.mxu2 %vm572_vm4, %v2534_v48 }
0x1205   :  { %v2744_v13 = vpop.xlane.xlu0 %2743 }
0x1206   :  { %v2754_v25 = vmul.f32 %v2744_v13, %v3695_v55 }
0x1208   :  { %v2758_v14 = vadd.f32 1e-05, %v2754_v25 }
0x120a   :  { %3410 = vrsqrt.f32 %v2758_v14  ;;  %vm2768_vm2 = vweird.f32 %v2758_v14 }
0x1210   :  { %v3411_v15 = vpop.eup %3410 }
0x1211   :  { %v2763_v62 = vmul.f32 %v3411_v15, %v2758_v14  ;;  %vm2769_vm5 = vweird.f32 %v3411_v15 }
0x1212   :  { %vm2770_vm6 = vmor %vm2768_vm2, %vm2769_vm5 }
0x1213   :  { %v2764_v9 = vmul.f32 %v3411_v15, %v2763_v62 }
0x1215   :  { %v2765_v1 = vmul.f32 0.5, %v2764_v9 }
0x1217   :  { %v2766_v30 = vsub.f32 1.5, %v2765_v1 }
0x1219   :  { %v2645_v53 = vpop.f32.mrf.mxu3  ;;  %v2767_v47 = vmul.f32 %v3411_v15, %v2766_v30 }
0x121a   :  { %3251 = vmatmul.msk.f32.vlgmr.msrb.gmra.mxu0 %vm572_vm4, %v2645_v53 }
0x121b   :  { %v2771_v52 = vsel %vm2770_vm6, %v3411_v15, %v2767_v47 }
0x121c   :  { %v2802_v59 = vmul.f32 %v2771_v52, %v2734_v28  ;;  %v2901_v28 = vld [vmem:[%s4802_s16 + $0x18] sm:$0xff]  ;;  %s3494_s16 = smov 8  }
0x121d   :  { %2927 = vmatpush.msrb.mxu3 %v2901_v28 }
0x121e   :  { %v2807_v8 = vmul.f32 %v4611_v16, %v2802_v59 }
0x121f   :  { %2928 = vmatpush.msrb.mxu3 %v2900_v26 }
0x1220   :  { %v2812_v19 = vadd.f32 %v4616_v27, %v2807_v8 }
0x1221   :  { %v2648_v17 = vpop.f32.mrf.mxu3  ;;  %2929 = vmatpush.msrb.mxu3 %v2899_v29 }
0x1222   :  { %3252 = vmatmul.msk.f32.gmra.mxu0 %vm572_vm4, %v2648_v17  ;;  %3255 = vmatmul.msk.f32.vlgmr.msra.gmra.mxu1 %vm157_vm3, %v2812_v19 }
0x1223   :  { %2930 = vmatpush.msrb.mxu3 %v2898_v61 }
0x1225   :  { %v2703_v23 = vpop.f32.mrf.mxu2 }
0x122d   :  { %v2706_v50 = vpop.f32.mrf.mxu2 }
0x1297   :  { %v2674_v40 = vpop.f32.mrf.mxu0 }
0x1298   :  { %v2704_v31 = vadd.f32 %v2703_v23, %v2674_v40 }
0x129a   :  { %v2711_v24 = vadd.f32 %v2704_v31, %v4285_v6 }
0x129c   :  { %v2716_v32 = vadd.f32 %v4563_v46, %v2711_v24 }
0x129e   :  { %v2724_v38 = vsel %vm157_vm3, %v2716_v32, 0.0 }
0x129f   :  { %2725 = vadd.xlane.f32.xlu1 %v2724_v38  ;;  %v2677_v43 = vpop.f32.mrf.mxu0  ;;  %v2850_v11 = vpop.f32.mrf.mxu1 }
0x12a0   :  { %v2707_v57 = vadd.f32 %v2706_v50, %v2677_v43  ;;  %v2851_v58 = vadd.f32 %v4677_v33, %v2850_v11 }
0x12a2   :  { %v2712_v6 = vadd.f32 %v2707_v57, %v4282_v49  ;;  %v2862_v2 = vmul.f32 %v2851_v58, %v2851_v58 }
0x12a4   :  { %v4684_v48 = vadd.f32 %v4563_v46, %v2712_v6  ;;  %v2866_v3 = vmul.f32 %v2862_v2, %v2851_v58 }
0x12a6   :  { %v2727_v41 = vsel %vm157_vm3, %v4684_v48, 0.0  ;;  %v2870_v4 = vmul.f32 0.044715, %v2866_v3 }
0x12a7   :  { %2746 = vadd.xlane.f32.xlu1 %v2745_v0  ;;  %2728 = vadd.xlane.f32.xlu2 %v2727_v41 }
0x12a8   :  { %v2874_v12 = vadd.f32 %v2870_v4, %v2851_v58 }
0x12aa   :  { %v2878_v13 = vmul.f32 0.7978846, %v2874_v12 }
0x12ac   :  { %3412 = vtanh.f32 %v2878_v13 }
0x12b2   :  { %v3413_v25 = vpop.eup %3412 }
0x12b3   :  { %v2886_v14 = vadd.f32 1.0, %v3413_v25 }
0x12b5   :  { %v2890_v49 = vmul.f32 0.5, %v2886_v14 }
0x12b7   :  { %v2894_v15 = vmul.f32 %v2890_v49, %v2851_v58 }
0x12b9   :  { %2931 = vmatmul.f32.vlgmr.msrb.gmra.mxu3 %v2894_v15 }
0x1312   :  { %v2726_v62 = vpop.xlane.xlu1 %2725 }
0x1313   :  { %v2732_v46 = vmul.f32 %v2726_v62, %v3695_v55 }
0x1315   :  { %v2736_v9 = vsub.f32 %v2716_v32, %v2732_v46 }
0x1317   :  { %v2740_v1 = vmul.f32 %v2736_v9, %v2736_v9 }
0x1319   :  { %v2748_v30 = vsel %vm157_vm3, %v2740_v1, 0.0 }
0x131a   :  { %v2747_v53 = vpop.xlane.xlu1 %2746  ;;  %2749 = vadd.xlane.f32.xlu2 %v2748_v30  ;;  %v2729_v47 = vpop.xlane.xlu2 %2728 }
0x131b   :  { %v2755_v52 = vmul.f32 %v2747_v53, %v3695_v55  ;;  %v2733_v59 = vmul.f32 %v2729_v47, %v3695_v55 }
0x131d   :  { %v2759_v8 = vadd.f32 1e-05, %v2755_v52  ;;  %v2737_v19 = vsub.f32 %v4684_v48, %v2733_v59 }
0x131f   :  { %3414 = vrsqrt.f32 %v2759_v8  ;;  %v2741_v17 = vmul.f32 %v2737_v19, %v2737_v19  ;;  %vm2778_vm7 = vweird.f32 %v2759_v8 }
0x1321   :  { %v2751_v10 = vsel %vm157_vm3, %v2741_v17, 0.0 }
0x1322   :  { %2752 = vadd.xlane.f32.xlu0 %v2751_v10 }
0x1325   :  { %v3415_v18 = vpop.eup %3414 }
0x1326   :  { %v2773_v37 = vmul.f32 %v3415_v18, %v2759_v8  ;;  %vm2779_vm4 = vweird.f32 %v3415_v18 }
0x1327   :  { %vm2780_vm8 = vmor %vm2778_vm7, %vm2779_vm4 }
0x1328   :  { %v2774_v34 = vmul.f32 %v3415_v18, %v2773_v37 }
0x132a   :  { %v2775_v5 = vmul.f32 0.5, %v2774_v34 }
0x132c   :  { %v2776_v51 = vsub.f32 1.5, %v2775_v5 }
0x132e   :  { %v2777_v44 = vmul.f32 %v3415_v18, %v2776_v51 }
0x1330   :  { %v2781_v54 = vsel %vm2780_vm8, %v3415_v18, %v2777_v44 }
0x1331   :  { %v2803_v20 = vmul.f32 %v2781_v54, %v2735_v35 }
0x1333   :  { %v2808_v22 = vmul.f32 %v4611_v16, %v2803_v20 }
0x1335   :  { %v2813_v56 = vadd.f32 %v4616_v27, %v2808_v22 }
0x1337   :  { %3256 = vmatmul.msk.f32.gmra.mxu1 %vm157_vm3, %v2813_v56 }
0x133c   :  { %v2932_v7 = vpop.f32.mrf.mxu3 }
0x138d   :  { %v2750_v28 = vpop.xlane.xlu2 %2749 }
0x138e   :  { %v2756_v26 = vmul.f32 %v2750_v28, %v3695_v55 }
0x1390   :  { %v2760_v23 = vadd.f32 1e-05, %v2756_v26 }
0x1392   :  { %3416 = vrsqrt.f32 %v2760_v23  ;;  %vm2788_vm10 = vweird.f32 %v2760_v23 }
0x1395   :  { %v2753_v29 = vpop.xlane.xlu0 %2752 }
0x1396   :  { %v2757_v40 = vmul.f32 %v2753_v29, %v3695_v55 }
0x1398   :  { %v3417_v31 = vpop.eup %3416  ;;  %v2761_v61 = vadd.f32 1e-05, %v2757_v40 }
0x1399   :  { %v2783_v45 = vmul.f32 %v3417_v31, %v2760_v23  ;;  %vm2789_vm9 = vweird.f32 %v3417_v31 }
0x139a   :  { %3418 = vrsqrt.f32 %v2761_v61  ;;  %vm2790_vm11 = vmor %vm2788_vm10, %vm2789_vm9  ;;  %vm2798_vm13 = vweird.f32 %v2761_v61 }
0x139b   :  { %v2784_v24 = vmul.f32 %v3417_v31, %v2783_v45 }
0x139d   :  { %v2785_v32 = vmul.f32 0.5, %v2784_v24 }
0x139f   :  { %v2786_v35 = vsub.f32 1.5, %v2785_v32 }
0x13a0   :  { %v3419_v38 = vpop.eup %3418 }
0x13a1   :  { %v2787_v50 = vmul.f32 %v3417_v31, %v2786_v35  ;;  %v2793_v43 = vmul.f32 %v3419_v38, %v2761_v61  ;;  %vm2799_vm12 = vweird.f32 %v3419_v38 }
0x13a2   :  { %vm2800_vm14 = vmor %vm2798_vm13, %vm2799_vm12 }
0x13a3   :  { %v2791_v57 = vsel %vm2790_vm11, %v3417_v31, %v2787_v50  ;;  %v2794_v11 = vmul.f32 %v3419_v38, %v2793_v43 }
0x13a4   :  { %v2804_v58 = vmul.f32 %v2791_v57, %v2736_v9 }
0x13a5   :  { %v2795_v6 = vmul.f32 0.5, %v2794_v11  ;;  %v3434_v11 = vld [vmem:[%s4804_s18 + $0x6] ss:$0 sm:$0xff] }
0x13a6   :  { %v2809_v60 = vmul.f32 %v4611_v16, %v2804_v58  ;;  %v1585_v58 = vadd.f32 %v3434_v11, %v4446_v63  ;;  %v2999_v63 = vld [vmem:[%s4803_s17 + $0x18] sm:$0xff] }
0x13a7   :  { %v2796_v2 = vsub.f32 1.5, %v2795_v6  ;;  %3020 = vmatpush.msra.mxu0 %v2999_v63  ;;  %v3307_v63 = vld [vmem:[%s4804_s18 + $0x13] ss:$0 sm:$0xff] }
0x13a8   :  { %v2814_v3 = vadd.f32 %v4616_v27, %v2809_v60 }
0x13a9   :  { %v2797_v0 = vmul.f32 %v3419_v38, %v2796_v2 }
0x13aa   :  { %3257 = vmatmul.msk.f32.gmra.mxu1 %vm157_vm3, %v2814_v3  ;;  %v1592_v3 = vadd.f32 %v1585_v58, %v4194_v36  ;;  %v2997_v36 = vld [vmem:[%s4803_s17 + $0x8] sm:$0xff] }
0x13ab   :  { %v2801_v41 = vsel %vm2800_vm14, %v3419_v38, %v2797_v0 }
0x13ac   :  { %v2805_v4 = vmul.f32 %v2801_v41, %v2737_v19  ;;  %v1602_v0 = vsel %vm157_vm3, %v1592_v3, 0.0 }
0x13ae   :  { %v2810_v12 = vmul.f32 %v4611_v16, %v2805_v4 }
0x13b0   :  { %v2815_v13 = vadd.f32 %v4616_v27, %v2810_v12 }
0x13b2   :  { %3258 = vmatmul.msk.f32.gmra.mxu1 %vm157_vm3, %v2815_v13 }
0x13b4   :  { %v2853_v25 = vpop.f32.mrf.mxu1 }
0x13b5   :  { %v2854_v14 = vadd.f32 %v4677_v33, %v2853_v25 }
0x13b7   :  { %v2863_v49 = vmul.f32 %v2854_v14, %v2854_v14 }
0x13b9   :  { %v2867_v15 = vmul.f32 %v2863_v49, %v2854_v14 }
0x13bb   :  { %v2871_v62 = vmul.f32 0.044715, %v2867_v15 }
0x13bd   :  { %v2875_v46 = vadd.f32 %v2871_v62, %v2854_v14 }
0x13bf   :  { %v2879_v9 = vmul.f32 0.7978846, %v2875_v46 }
0x13c1   :  { %3420 = vtanh.f32 %v2879_v9 }
0x13c7   :  { %v3421_v1 = vpop.eup %3420 }
0x13c8   :  { %v2887_v30 = vadd.f32 1.0, %v3421_v1 }
0x13ca   :  { %v2891_v53 = vmul.f32 0.5, %v2887_v30 }
0x13cc   :  { %v2895_v47 = vmul.f32 %v2891_v53, %v2854_v14 }
0x13ce   :  { %2933 = vmatmul.f32.gmra.mxu3 %v2895_v47 }
0x1427   :  { %v2856_v52 = vpop.f32.mrf.mxu1 }
0x1428   :  { %v2857_v16 = vadd.f32 %v4677_v33, %v2856_v52 }
0x142a   :  { %v2864_v27 = vmul.f32 %v2857_v16, %v2857_v16 }
0x142c   :  { %v2868_v59 = vmul.f32 %v2864_v27, %v2857_v16 }
0x142e   :  { %v2872_v8 = vmul.f32 0.044715, %v2868_v59 }
0x142f   :  { %v2859_v19 = vpop.f32.mrf.mxu1 }
0x1430   :  { %v2876_v17 = vadd.f32 %v2872_v8, %v2857_v16  ;;  %v2860_v10 = vadd.f32 %v4677_v33, %v2859_v19  ;;  %v3304_v33 = vld [vmem:[%s4804_s18 + $0x10] ss:$0 sm:$0xff] }
0x1432   :  { %v2865_v18 = vmul.f32 %v2860_v10, %v2860_v10  ;;  %v2880_v37 = vmul.f32 0.7978846, %v2876_v17 }
0x1434   :  { %v2869_v34 = vmul.f32 %v2865_v18, %v2860_v10  ;;  %3422 = vtanh.f32 %v2880_v37  ;;  %v3305_v37 = vld [vmem:[%s4804_s18 + $0x11] ss:$0 sm:$0xff] }
0x1436   :  { %v2873_v5 = vmul.f32 0.044715, %v2869_v34 }
0x1438   :  { %v2877_v51 = vadd.f32 %v2873_v5, %v2860_v10  ;;  %v3306_v5 = vld [vmem:[%s4804_s18 + $0x12] ss:$0 sm:$0xff] }
0x143a   :  { %v3423_v44 = vpop.eup %3422  ;;  %v2881_v54 = vmul.f32 0.7978846, %v2877_v51 }
0x143b   :  { %v2888_v20 = vadd.f32 1.0, %v3423_v44 }
0x143c   :  { %3424 = vtanh.f32 %v2881_v54 }
0x143d   :  { %v2892_v22 = vmul.f32 0.5, %v2888_v20 }
0x143f   :  { %v2896_v56 = vmul.f32 %v2892_v22, %v2857_v16 }
0x1441   :  { %2936 = vmatmul.f32.gmra.mxu3 %v2896_v56 }
0x1442   :  { %v3425_v7 = vpop.eup %3424 }
0x1443   :  { %v2889_v28 = vadd.f32 1.0, %v3425_v7 }
0x1445   :  { %v2893_v26 = vmul.f32 0.5, %v2889_v28 }
0x1447   :  { %v2897_v23 = vmul.f32 %v2893_v26, %v2860_v10 }
0x1449   :  { %2938 = vmatmul.f32.gmra.mxu3 %v2897_v23 }
0x1451   :  { %v2934_v29 = vpop.f32.mrf.mxu3 }
0x1452   :  { %v2935_v40 = vadd.f32 %v3304_v33, %v2934_v29 }
0x1454   :  { %v2942_v31 = vadd.f32 %v2935_v40, %v4569_v21  ;;  %v1588_v21 = vadd.f32 %v3434_v11, %v4451_v42  ;;  %v2998_v42 = vld [vmem:[%s4803_s17 + $0x10] sm:$0xff] }
0x1455   :  { %3021 = vmatpush.msra.mxu0 %v2998_v42 }
0x1456   :  { %v2946_v61 = vsel %vm157_vm3, %v2942_v31, 0.0  ;;  %v1593_v2 = vadd.f32 %v1588_v21, %v4207_v39  ;;  %v2996_v39 = vld [vmem:[%s4803_s17] sm:$0xff] }
0x1457   :  { %2947 = vadd.xlane.f32.xlu1 %v2946_v61  ;;  %3022 = vmatpush.msra.mxu0 %v2997_v36 }
0x1459   :  { %3023 = vmatpush.msra.mxu0 %v2996_v39 }
0x14c4   :  { %v2937_v45 = vpop.f32.mrf.mxu3 }
0x14ca   :  { %v2948_v24 = vpop.xlane.xlu1 %2947 }
0x14cb   :  { %v2952_v32 = vmul.f32 %v2948_v24, %v3695_v55 }
0x14cc   :  { %v2939_v35 = vpop.f32.mrf.mxu3 }
0x14cd   :  { %v2954_v38 = vsub.f32 %v2942_v31, %v2952_v32  ;;  %v2940_v50 = vadd.f32 %v3304_v33, %v2939_v35 }
0x14cf   :  { %v2956_v43 = vmul.f32 %v2954_v38, %v2954_v38  ;;  %v2943_v57 = vadd.f32 %v2940_v50, %v4684_v48  ;;  %v1605_v48 = vsel %vm157_vm3, %v1593_v2, 0.0 }
0x14d1   :  { %v2958_v6 = vsel %vm157_vm3, %v2956_v43, 0.0  ;;  %v2949_v60 = vsel %vm157_vm3, %v2943_v57, 0.0 }
0x14d2   :  { %2959 = vadd.xlane.f32.xlu0 %v2958_v6  ;;  %2950 = vadd.xlane.f32.xlu2 %v2949_v60 }
0x14da   :  { %1606 = vadd.xlane.f32.xlu0 %v1605_v48  ;;  %1603 = vadd.xlane.f32.xlu2 %v1602_v0 }
0x1545   :  { %v2960_v41 = vpop.xlane.xlu0 %2959  ;;  %v2951_v4 = vpop.xlane.xlu2 %2950 }
0x1546   :  { %v2964_v12 = vmul.f32 %v2960_v41, %v3695_v55  ;;  %v2953_v13 = vmul.f32 %v2951_v4, %v3695_v55 }
0x1548   :  { %v2966_v25 = vadd.f32 1e-05, %v2964_v12  ;;  %v2955_v14 = vsub.f32 %v2943_v57, %v2953_v13 }
0x154a   :  { %3426 = vrsqrt.f32 %v2966_v25  ;;  %v2957_v49 = vmul.f32 %v2955_v14, %v2955_v14  ;;  %vm2974_vm0 = vweird.f32 %v2966_v25 }
0x154c   :  { %v2961_v15 = vsel %vm157_vm3, %v2957_v49, 0.0 }
0x154d   :  { %v1607_v62 = vpop.xlane.xlu0 %1606  ;;  %2962 = vadd.xlane.f32.xlu1 %v2961_v15  ;;  %v1604_v46 = vpop.xlane.xlu2 %1603  ;;  %v3436_v15 = vld [vmem:[%s4804_s18 + $0x8] ss:$0 sm:$0xff] }
0x154e   :  { %v1611_v9 = vmul.f32 %v1607_v62, %v3695_v55  ;;  %v1610_v1 = vmul.f32 %v1604_v46, %v3695_v55 }
0x1550   :  { %v3427_v30 = vpop.eup %3426  ;;  %v4744_v53 = vsub.f32 %v1593_v2, %v1611_v9  ;;  %v4746_v47 = vsub.f32 %v1592_v3, %v1610_v1 }
0x1551   :  { %v2969_v52 = vmul.f32 %v3427_v30, %v2966_v25  ;;  %vm2975_vm15 = vweird.f32 %v3427_v30  ;;  %v3435_v25 = vld [vmem:[%s4804_s18 + $0x7] ss:$0 sm:$0xff] }
0x1552   :  { %v1619_v16 = vmul.f32 %v4744_v53, %v4744_v53  ;;  %v1618_v27 = vmul.f32 %v4746_v47, %v4746_v47  ;;  %vm2976_vm1 = vmor %vm2974_vm0, %vm2975_vm15 }
0x1553   :  { %v2970_v59 = vmul.f32 %v3427_v30, %v2969_v52 }
0x1554   :  { %v1629_v8 = vsel %vm157_vm3, %v1619_v16, 0.0  ;;  %v1626_v19 = vsel %vm157_vm3, %v1618_v27, 0.0 }
0x1555   :  { %v2971_v17 = vmul.f32 0.5, %v2970_v59  ;;  %1630 = vadd.xlane.f32.xlu2 %v1629_v8  ;;  %1627 = vadd.xlane.f32.xlu1 %v1626_v19 }
0x1557   :  { %v2972_v10 = vsub.f32 1.5, %v2971_v17 }
0x1559   :  { %v2973_v18 = vmul.f32 %v3427_v30, %v2972_v10 }
0x155b   :  { %v2977_v34 = vsel %vm2976_vm1, %v3427_v30, %v2973_v18 }
0x155c   :  { %v2988_v51 = vmul.f32 %v2977_v34, %v2954_v38 }
0x155e   :  { %v2991_v44 = vmul.f32 %v3305_v37, %v2988_v51 }
0x1560   :  { %v2994_v54 = vadd.f32 %v3306_v5, %v2991_v44 }
0x1562   :  { %3259 = vmatmul.msk.f32.vlgmr.msra.gmra.mxu0 %vm157_vm3, %v2994_v54 }
0x15c0   :  { %v2963_v20 = vpop.xlane.xlu1 %2962 }
0x15c1   :  { %v2965_v22 = vmul.f32 %v2963_v20, %v3695_v55 }
0x15c3   :  { %v2967_v56 = vadd.f32 1e-05, %v2965_v22 }
0x15c5   :  { %3428 = vrsqrt.f32 %v2967_v56  ;;  %vm2984_vm2 = vweird.f32 %v2967_v56 }
0x15c8   :  { %v1628_v7 = vpop.xlane.xlu1 %1627  ;;  %v1631_v28 = vpop.xlane.xlu2 %1630 }
0x15c9   :  { %v1634_v26 = vmul.f32 %v1628_v7, %v3695_v55  ;;  %v1635_v23 = vmul.f32 %v1631_v28, %v3695_v55 }
0x15cb   :  { %v3429_v33 = vpop.eup %3428  ;;  %v1638_v29 = vadd.f32 1e-05, %v1634_v26  ;;  %v1639_v40 = vadd.f32 1e-05, %v1635_v23 }
0x15cc   :  { %v2979_v31 = vmul.f32 %v3429_v33, %v2967_v56  ;;  %vm2985_vm5 = vweird.f32 %v3429_v33 }
0x15cd   :  { %3430 = vrsqrt.f32 %v1638_v29  ;;  %vm2986_vm6 = vmor %vm2984_vm2, %vm2985_vm5  ;;  %vm1666_vm8 = vweird.f32 %v1638_v29  ;;  %vm1676_vm10 = vweird.f32 %v1639_v40 }
0x15ce   :  { %v2980_v61 = vmul.f32 %v3429_v33, %v2979_v31  ;;  %3432 = vrsqrt.f32 %v1639_v40 }
0x15d0   :  { %v2981_v45 = vmul.f32 0.5, %v2980_v61 }
0x15d2   :  { %v2982_v24 = vsub.f32 1.5, %v2981_v45 }
0x15d3   :  { %v3431_v32 = vpop.eup %3430 }
0x15d4   :  { %v3433_v35 = vpop.eup %3432  ;;  %v2983_v38 = vmul.f32 %v3429_v33, %v2982_v24  ;;  %v1661_v50 = vmul.f32 %v3431_v32, %v1638_v29  ;;  %vm1667_vm4 = vweird.f32 %v3431_v32 }
0x15d5   :  { %v1671_v43 = vmul.f32 %v3433_v35, %v1639_v40  ;;  %vm1677_vm7 = vweird.f32 %v3433_v35  ;;  %vm1668_vm9 = vmor %vm1666_vm8, %vm1667_vm4 }
0x15d6   :  { %v2987_v57 = vsel %vm2986_vm6, %v3429_v33, %v2983_v38  ;;  %v1662_v11 = vmul.f32 %v3431_v32, %v1661_v50  ;;  %vm1678_vm11 = vmor %vm1676_vm10, %vm1677_vm7 }
0x15d7   :  { %v2989_v55 = vmul.f32 %v2987_v57, %v2955_v14  ;;  %v1672_v58 = vmul.f32 %v3433_v35, %v1671_v43 }
0x15d8   :  { %v1663_v21 = vmul.f32 0.5, %v1662_v11 }
0x15d9   :  { %v1673_v6 = vmul.f32 0.5, %v1672_v58  ;;  %v2992_v60 = vmul.f32 %v3305_v37, %v2989_v55 }
0x15da   :  { %v1664_v2 = vsub.f32 1.5, %v1663_v21 }
0x15db   :  { %v1674_v3 = vsub.f32 1.5, %v1673_v6  ;;  %v2995_v48 = vadd.f32 %v3306_v5, %v2992_v60 }
0x15dc   :  { %v1665_v0 = vmul.f32 %v3431_v32, %v1664_v2 }
0x15dd   :  { %v1675_v42 = vmul.f32 %v3433_v35, %v1674_v3  ;;  %3260 = vmatmul.msk.f32.gmra.mxu0 %vm157_vm3, %v2995_v48 }
0x15de   :  { %v1669_v36 = vsel %vm1668_vm9, %v3431_v32, %v1665_v0 }
0x15df   :  { %v1682_v39 = vmul.f32 %v1669_v36, %v4746_v47  ;;  %v1679_v41 = vsel %vm1678_vm11, %v3433_v35, %v1675_v42  ;;  %v3025_v4 = vpop.f32.mrf.mxu0 }
0x15e0   :  { %v1683_v12 = vmul.f32 %v1679_v41, %v4744_v53  ;;  %v3026_v13 = vadd.f32 %v3307_v63, %v3025_v4 }
0x15e1   :  { %v1687_v14 = vmul.f32 %v3435_v25, %v1682_v39 }
0x15e2   :  { %v1688_v49 = vmul.f32 %v3435_v25, %v1683_v12  ;;  %3031 = vst.msk [vmem:[#allocation2] sm:$0xff] %vm157_vm3, %v3026_v13 }
0x15e3   :  { %v1692_v62 = vadd.f32 %v3436_v15, %v1687_v14 }
0x15e4   :  { %v1693_v46 = vadd.f32 %v3436_v15, %v1688_v49 }
0x15e5   :  { %3033 = vst.msk [vmem:[#allocation4] sm:$0xff] %vm157_vm3, %v1692_v62 }
0x15e6   :  { %3034 = vst.msk [vmem:[#allocation4 + $0x8] sm:$0xff] %vm157_vm3, %v1693_v46 }
0x15e7   :  { %3060 = dma.vmem_to_hbm [thread:$0]  %s3053_s8, 256, %s3055_s23, [#allocation5], %s3493_s11, %s3493_s11, %s3494_s16  }
0x165a   :  { %v3028_v9 = vpop.f32.mrf.mxu0 }
0x165b   :  { %v3029_v1 = vadd.f32 %v3307_v63, %v3028_v9 }
0x165d   :  { %3032 = vst.msk [vmem:[#allocation2 + $0x8] sm:$0xff] %vm157_vm3, %v3029_v1 }
0x165e   :  { %3047 = dma.vmem_to_hbm [thread:$0]  %s3040_s21, 256, %s3042_s14, [#allocation3], %s3493_s11, %s3493_s11, %s3494_s16  }
0x165f   :  { %3485 = dma.done.wait [#allocation3], 256  }
0x1660   :  { %3486 = vsyncadd [#allocation3], 4294967040 }
0x1661   :  { %3487 = dma.done.wait [#allocation5], 256  }
0x1662   :  { %3488 = vsyncadd [#allocation5], 4294967040 }
0x1663   :  { %3069 = vsyncpa [#allocation3], 1 }
0x1664   :  { %3070 = vsyncpa [#allocation5], 1 }

</bundles_post_ra>
